<compile_context>
chip_gen: v5e
topology: v5e:2x2
jax: 0.10.0
libtpu: 0.0.40
codegen_flags: <defaults>
</compile_context>

<pallas_src>
import math
import functools

import jax
import jax.numpy as jnp
from jax import lax
from jax.experimental import pallas as pl
from jax.experimental.pallas import tpu as pltpu


# =============================================================================
# Kernel 1: fused q/k/v projection + RMSNorm (+gain, with the 1/sqrt(d)
# attention scale folded into the q gain).  Gridded over (batch, seq-tile).
# =============================================================================
def _qkv_norm_kernel(x_ref,
                     wq_ref, bq_ref, gq_ref,
                     wk_ref, bk_ref, gk_ref,
                     wv_ref, bv_ref,
                     q_ref, k_ref, v_ref,
                     *, eps):
    x = x_ref[0].astype(jnp.bfloat16)                       # (ts, D)

    def proj(w_ref, b_ref):
        return jnp.dot(x, w_ref[...],
                       preferred_element_type=jnp.float32) + b_ref[...]

    def rmsnorm(h, g_ref):
        ms = jnp.mean(h * h, axis=-1, keepdims=True)
        return h * lax.rsqrt(ms + eps) * g_ref[...]

    q_ref[0] = rmsnorm(proj(wq_ref, bq_ref), gq_ref).astype(q_ref.dtype)
    k_ref[0] = rmsnorm(proj(wk_ref, bk_ref), gk_ref).astype(k_ref.dtype)
    v_ref[0] = proj(wv_ref, bv_ref).astype(v_ref.dtype)


# =============================================================================
# Kernel 2: flash-style attention with in-kernel RoPE (pltpu.roll) and the
# output projection accumulated per head.
# grid = (B, q_tiles, heads, kv_tiles); heads & kv_tiles are reduction axes.
# =============================================================================
def _flash_attn_kernel(q_ref, k_ref, v_ref,
                       cq_ref, sq_ref, ck_ref, sk_ref,
                       wo_ref, bo_ref,
                       o_ref,
                       qr_sc, m_sc, l_sc, acc_sc, y_sc,
                       *, half):
    h = pl.program_id(2)
    kv = pl.program_id(3)
    nh = pl.num_programs(2)
    nk = pl.num_programs(3)

    @pl.when(jnp.logical_and(h == 0, kv == 0))
    def _():                                    # bias-initialize output accumulator
        y_sc[...] = jnp.zeros(y_sc.shape, jnp.float32) + bo_ref[...]

    @pl.when(kv == 0)
    def _():                                    # RoPE the q tile once per head
        q = q_ref[0].astype(jnp.float32)                     # (tq, d)
        qr = q * cq_ref[...] + pltpu.roll(q, shift=half, axis=1) * sq_ref[...]
        qr_sc[...] = qr.astype(jnp.bfloat16)
        m_sc[...] = jnp.full(m_sc.shape, -jnp.inf, jnp.float32)
        l_sc[...] = jnp.zeros(l_sc.shape, jnp.float32)
        acc_sc[...] = jnp.zeros(acc_sc.shape, jnp.float32)

    k = k_ref[0].astype(jnp.float32)                         # (tk, d)
    kr = (k * ck_ref[...] +
          pltpu.roll(k, shift=half, axis=1) * sk_ref[...]).astype(jnp.bfloat16)

    # scores: (tq, tk); scale already folded into the q gain.
    s = lax.dot_general(qr_sc[...], kr, (((1,), (1,)), ((), ())),
                        preferred_element_type=jnp.float32)

    m_prev = m_sc[...]
    m_new = jnp.maximum(m_prev, jnp.max(s, axis=-1, keepdims=True))
    alpha = jnp.exp(m_prev - m_new)
    p = jnp.exp(s - m_new)
    l_sc[...] = alpha * l_sc[...] + jnp.sum(p, axis=-1, keepdims=True)
    acc_sc[...] = alpha * acc_sc[...] + jnp.dot(
        p.astype(jnp.bfloat16), v_ref[0], preferred_element_type=jnp.float32)
    m_sc[...] = m_new

    @pl.when(kv == nk - 1)
    def _():                                    # fold this head into the output proj
        attn = acc_sc[...] * pl.reciprocal(l_sc[...], approx=True)    # (tq, d)
        y_sc[...] += jnp.dot(attn.astype(jnp.bfloat16), wo_ref[...],
                             preferred_element_type=jnp.float32)

    @pl.when(jnp.logical_and(h == nh - 1, kv == nk - 1))
    def _():
        o_ref[0] = y_sc[...].astype(o_ref.dtype)


# =============================================================================
# Wrapper (one-time parameter / RoPE-table prep is plain-JAX glue).
# =============================================================================
def wan_self_attention(x, params, freqs, *, num_heads, eps=1e-6,
                       ts=None, tq=64, tk=64):
    B, S, D = x.shape
    assert D % num_heads == 0
    d = D // num_heads
    half = d // 2
    assert d % 128 == 0, "head_dim must be a multiple of 128 (lane-aligned per-head blocks)"
    if ts is None:
        ts = S if S <= 256 else 256
    assert S % ts == 0 and S % tq == 0 and S % tk == 0
    assert ts % 8 == 0 and tq % 8 == 0 and tk % 8 == 0

    f32, bf16 = jnp.float32, jnp.bfloat16

    # Per-head de-interleave permutation of the q/k projection OUTPUT columns:
    # within each head order channels [0,2,...,d-2, 1,3,...,d-1] so RoPE becomes
    # roll(half) with a sign-folded sin.  q.k dot products are unchanged.
    base = jnp.concatenate([jnp.arange(0, d, 2), jnp.arange(1, d, 2)])
    perm = (jnp.arange(num_heads)[:, None] * d + base[None, :]).reshape(-1)

    scale = 1.0 / math.sqrt(d)                 # folded (exactly) into the q gain
    wq = params["wq"][:, perm].astype(bf16)
    bq = params["bq"][:, perm].astype(f32)
    gq = (params["gq"] * scale)[:, perm].astype(f32)
    wk = params["wk"][:, perm].astype(bf16)
    bk = params["bk"][:, perm].astype(f32)
    gk = params["gk"][:, perm].astype(f32)
    wv = params["wv"].astype(bf16)
    bv = params["bv"].astype(f32)
    wo = params["wo"].astype(bf16)
    bo = params["bo"].astype(f32)

    # RoPE tables in the de-interleaved per-head layout: (S, head_dim) only.
    ang = freqs[:S].astype(f32)                                       # (S, d//2)
    cosH = jnp.concatenate([jnp.cos(ang), jnp.cos(ang)], axis=-1)     # (S, d)
    sinH = jnp.concatenate([-jnp.sin(ang), jnp.sin(ang)], axis=-1)    # (S, d)

    cparams_proj = pltpu.CompilerParams(
        dimension_semantics=("parallel", "parallel"),
        vmem_limit_bytes=48 * 1024 * 1024)

    # ---- stage 1: q/k/v projection + RMSNorm --------------------------------
    # TODO(synk): for production D (e.g. 5120) tile the projection over D_out
    # (needs a two-pass / partial-sum RMSNorm) so a single bf16 (D,D) weight
    # does not dominate VMEM on v7x.
    full2d = lambda b, i: (0, 0)
    w_spec = pl.BlockSpec((D, D), full2d)
    r_spec = pl.BlockSpec((1, D), full2d)
    qkv_shape = jax.ShapeDtypeStruct((B, S, D), bf16)

    q, k, v = pl.pallas_call(
        functools.partial(_qkv_norm_kernel, eps=eps),
        out_shape=(qkv_shape, qkv_shape, qkv_shape),
        grid_spec=pltpu.PrefetchScalarGridSpec(
            num_scalar_prefetch=0,
            grid=(B, S // ts),
            in_specs=[
                pl.BlockSpec((1, ts, D), lambda b, i: (b, i, 0)),   # x
                w_spec, r_spec, r_spec,                             # wq, bq, gq
                w_spec, r_spec, r_spec,                             # wk, bk, gk
                w_spec, r_spec,                                     # wv, bv
            ],
            out_specs=(pl.BlockSpec((1, ts, D), lambda b, i: (b, i, 0)),
                       pl.BlockSpec((1, ts, D), lambda b, i: (b, i, 0)),
                       pl.BlockSpec((1, ts, D), lambda b, i: (b, i, 0))),
        ),
        compiler_params=cparams_proj,
    )(x, wq, bq, gq, wk, bk, gk, wv, bv)

    # ---- stage 2: flash attention + fused output projection -----------------
    cparams_attn = pltpu.CompilerParams(
        dimension_semantics=("parallel", "parallel", "arbitrary", "arbitrary"),
        vmem_limit_bytes=48 * 1024 * 1024)

    out = pl.pallas_call(
        functools.partial(_flash_attn_kernel, half=half),
        out_shape=jax.ShapeDtypeStruct((B, S, D), x.dtype),
        grid_spec=pltpu.PrefetchScalarGridSpec(
            num_scalar_prefetch=0,
            grid=(B, S // tq, num_heads, S // tk),
            in_specs=[
                pl.BlockSpec((1, tq, d), lambda b, i, h, kv: (b, i, h)),   # q head tile
                pl.BlockSpec((1, tk, d), lambda b, i, h, kv: (b, kv, h)),  # k head tile
                pl.BlockSpec((1, tk, d), lambda b, i, h, kv: (b, kv, h)),  # v head tile
                pl.BlockSpec((tq, d), lambda b, i, h, kv: (i, 0)),         # cos (q rows)
                pl.BlockSpec((tq, d), lambda b, i, h, kv: (i, 0)),         # sin (q rows)
                pl.BlockSpec((tk, d), lambda b, i, h, kv: (kv, 0)),        # cos (k rows)
                pl.BlockSpec((tk, d), lambda b, i, h, kv: (kv, 0)),        # sin (k rows)
                pl.BlockSpec((d, D), lambda b, i, h, kv: (h, 0)),          # wo head rows
                pl.BlockSpec((1, D), lambda b, i, h, kv: (0, 0)),          # bo
            ],
            out_specs=pl.BlockSpec((1, tq, D), lambda b, i, h, kv: (b, i, 0)),
            scratch_shapes=[
                pltpu.VMEM((tq, d), bf16),     # roped q, cached across kv tiles
                pltpu.VMEM((tq, 1), f32),      # running max
                pltpu.VMEM((tq, 1), f32),      # running sum
                pltpu.VMEM((tq, d), f32),      # unnormalized attention accumulator
                pltpu.VMEM((tq, D), f32),      # output-projection accumulator
            ],
        ),
        compiler_params=cparams_attn,
    )(q, k, v, cosH, sinH, cosH, sinH, wo, bo)

    return out


# =============================================================================
# Pure-JAX f32 reference (mirrors the PyTorch forward exactly).
# =============================================================================
def wan_self_attention_ref(x, params, freqs, *, num_heads, eps=1e-6):
    B, S, D = x.shape
    d = D // num_heads

    def lin(w, b):
        return x @ w + b

    def rms(h, g):
        return h * jax.lax.rsqrt(jnp.mean(h * h, -1, keepdims=True) + eps) * g

    q = rms(lin(params["wq"], params["bq"]), params["gq"]).reshape(B, S, num_heads, d)
    k = rms(lin(params["wk"], params["bk"]), params["gk"]).reshape(B, S, num_heads, d)
    v = lin(params["wv"], params["bv"]).reshape(B, S, num_heads, d)

    ang = freqs[:S].astype(jnp.float32)                 # (S, d//2)
    cos = jnp.cos(ang)[None, :, None, :]
    sin = jnp.sin(ang)[None, :, None, :]

    def rope(t):
        tr = t.reshape(B, S, num_heads, d // 2, 2)
        te, to = tr[..., 0], tr[..., 1]
        out = jnp.stack([te * cos - to * sin, te * sin + to * cos], axis=-1)
        return out.reshape(B, S, num_heads, d)

    q, k = rope(q), rope(k)
    scale = 1.0 / math.sqrt(d)
    s = jnp.einsum("bqnd,bknd->bnqk", q, k) * scale
    p = jax.nn.softmax(s, axis=-1)
    o = jnp.einsum("bnqk,bknd->bqnd", p, v).reshape(B, S, D)
    return o @ params["wo"] + params["bo"]


# =============================================================================
if __name__ == "__main__":
    # Small shapes, but production-shaped heads (head_dim=128, lane-aligned).
    B, H, head_dim, S = 2, 2, 128, 128
    D = H * head_dim
    MAX_LEN = 1024

    key = jax.random.PRNGKey(0)
    ks = jax.random.split(key, 12)

    x = jax.random.normal(ks[0], (B, S, D), jnp.float32)

    def w(k):
        return 0.02 * jax.random.normal(k, (D, D), jnp.float32)

    params = {
        "wq": w(ks[1]), "bq": 0.01 * jax.random.normal(ks[5], (1, D), jnp.float32),
        "gq": 1.0 + 0.05 * jax.random.normal(ks[6], (1, D), jnp.float32),
        "wk": w(ks[2]), "bk": 0.01 * jax.random.normal(ks[7], (1, D), jnp.float32),
        "gk": 1.0 + 0.05 * jax.random.normal(ks[8], (1, D), jnp.float32),
        "wv": w(ks[3]), "bv": 0.01 * jax.random.normal(ks[9], (1, D), jnp.float32),
        "wo": w(ks[4]), "bo": 0.01 * jax.random.normal(ks[10], (1, D), jnp.float32),
    }

    # RoPE angle table [1024, head_dim // 2] (the PyTorch module stores this as
    # a complex polar tensor; real angles are the equivalent representation).
    pos = jnp.arange(MAX_LEN, dtype=jnp.float32)[:, None]
    inv_freq = 1.0 / (10000.0 ** (jnp.arange(0, head_dim, 2, dtype=jnp.float32) / head_dim))
    freqs = pos * inv_freq[None, :]                        # (1024, head_dim // 2)

    out = wan_self_attention(x, params, freqs, num_heads=H)
    out = jax.block_until_ready(out)

    ref = wan_self_attention_ref(x, params, freqs, num_heads=H)
    assert out.shape == (B, S, D)
    err = jnp.max(jnp.abs(out - ref))
    # bf16 MXU operands + approx reciprocal -> loose-ish tolerance vs f32 ref.
    assert jnp.allclose(out, ref, rtol=2e-2, atol=2e-2), f"max abs err {err}"

    print("KERNEL_OK")
</pallas_src>

<mosaic_0001>
module attributes {stable_mosaic.version = 11 : i64} {
  func.func @_qkv_norm_kernel(%arg0: i32, %arg1: i32, %arg2: memref<1x128x256xf32, #tpu.memory_space<vmem>>, %arg3: memref<256x256xbf16, #tpu.memory_space<vmem>>, %arg4: memref<1x256xf32, #tpu.memory_space<vmem>>, %arg5: memref<1x256xf32, #tpu.memory_space<vmem>>, %arg6: memref<256x256xbf16, #tpu.memory_space<vmem>>, %arg7: memref<1x256xf32, #tpu.memory_space<vmem>>, %arg8: memref<1x256xf32, #tpu.memory_space<vmem>>, %arg9: memref<256x256xbf16, #tpu.memory_space<vmem>>, %arg10: memref<1x256xf32, #tpu.memory_space<vmem>>, %arg11: memref<1x128x256xbf16, #tpu.memory_space<vmem>>, %arg12: memref<1x128x256xbf16, #tpu.memory_space<vmem>>, %arg13: memref<1x128x256xbf16, #tpu.memory_space<vmem>>) attributes {dimension_semantics = [#tpu.dimension_semantics<parallel>, #tpu.dimension_semantics<parallel>], iteration_bounds = array<i64: 2, 1>, scalar_prefetch = 0 : i64, scratch_operands = 0 : i64, tpu.core_type = #tpu.core_type<tc>, window_params = [{transform_indices = @transform_0, window_bounds = array<i64: 1, 128, 256>}, {pipeline_mode = #tpu.pipeline_mode<synchronous>, transform_indices = @transform_1, window_bounds = array<i64: 256, 256>}, {pipeline_mode = #tpu.pipeline_mode<synchronous>, transform_indices = @transform_2, window_bounds = array<i64: 1, 256>}, {pipeline_mode = #tpu.pipeline_mode<synchronous>, transform_indices = @transform_3, window_bounds = array<i64: 1, 256>}, {pipeline_mode = #tpu.pipeline_mode<synchronous>, transform_indices = @transform_4, window_bounds = array<i64: 256, 256>}, {pipeline_mode = #tpu.pipeline_mode<synchronous>, transform_indices = @transform_5, window_bounds = array<i64: 1, 256>}, {pipeline_mode = #tpu.pipeline_mode<synchronous>, transform_indices = @transform_6, window_bounds = array<i64: 1, 256>}, {pipeline_mode = #tpu.pipeline_mode<synchronous>, transform_indices = @transform_7, window_bounds = array<i64: 256, 256>}, {pipeline_mode = #tpu.pipeline_mode<synchronous>, transform_indices = @transform_8, window_bounds = array<i64: 1, 256>}, {transform_indices = @transform_9, window_bounds = array<i64: 1, 128, 256>}, {transform_indices = @transform_10, window_bounds = array<i64: 1, 128, 256>}, {transform_indices = @transform_11, window_bounds = array<i64: 1, 128, 256>}]} {
    %c0 = arith.constant 0 : index
    %c0_0 = arith.constant 0 : index
    %c0_1 = arith.constant 0 : index
    %0 = vector.load %arg2[%c0, %c0_0, %c0_1] : memref<1x128x256xf32, #tpu.memory_space<vmem>>, vector<1x128x256xf32>
    %1 = vector.shape_cast %0 : vector<1x128x256xf32> to vector<128x256xf32>
    %2 = arith.truncf %1 : vector<128x256xf32> to vector<128x256xbf16>
    %c0_2 = arith.constant 0 : index
    %c0_3 = arith.constant 0 : index
    %3 = vector.load %arg3[%c0_2, %c0_3] : memref<256x256xbf16, #tpu.memory_space<vmem>>, vector<256x256xbf16>
    %cst = arith.constant dense<0.000000e+00> : vector<128x256xf32>
    %4 = tpu.matmul %2, %3, %cst {dimension_numbers = #tpu.dot_dimension_numbers<[1], [0], [0], [1], [0, 0, 1, 1], [], []>} : vector<128x256xbf16>, vector<256x256xbf16>, vector<128x256xf32> -> vector<128x256xf32>
    %c0_4 = arith.constant 0 : index
    %c0_5 = arith.constant 0 : index
    %5 = vector.load %arg4[%c0_4, %c0_5] : memref<1x256xf32, #tpu.memory_space<vmem>>, vector<1x256xf32>
    %6 = vector.broadcast %5 : vector<1x256xf32> to vector<128x256xf32>
    %7 = arith.addf %4, %6 : vector<128x256xf32>
    %8 = arith.mulf %7, %7 : vector<128x256xf32>
    %cst_6 = arith.constant dense<0.000000e+00> : vector<128xf32>
    %9 = vector.multi_reduction <add>, %8, %cst_6 [1] : vector<128x256xf32> to vector<128xf32>
    %10 = vector.shape_cast %9 : vector<128xf32> to vector<128x1xf32>
    %cst_7 = arith.constant 2.560000e+02 : f32
    %11 = vector.broadcast %cst_7 : f32 to vector<128x1xf32>
    %12 = arith.divf %10, %11 : vector<128x1xf32>
    %cst_8 = arith.constant 9.99999997E-7 : f32
    %13 = vector.broadcast %cst_8 : f32 to vector<128x1xf32>
    %14 = arith.addf %12, %13 : vector<128x1xf32>
    %15 = math.rsqrt %14 : vector<128x1xf32>
    %16 = vector.broadcast %15 : vector<128x1xf32> to vector<128x256xf32>
    %17 = arith.mulf %7, %16 : vector<128x256xf32>
    %c0_9 = arith.constant 0 : index
    %c0_10 = arith.constant 0 : index
    %18 = vector.load %arg5[%c0_9, %c0_10] : memref<1x256xf32, #tpu.memory_space<vmem>>, vector<1x256xf32>
    %19 = vector.broadcast %18 : vector<1x256xf32> to vector<128x256xf32>
    %20 = arith.mulf %17, %19 : vector<128x256xf32>
    %21 = arith.truncf %20 : vector<128x256xf32> to vector<128x256xbf16>
    %c0_11 = arith.constant 0 : index
    %c0_12 = arith.constant 0 : index
    %c0_13 = arith.constant 0 : index
    %22 = vector.load %arg11[%c0_11, %c0_12, %c0_13] : memref<1x128x256xbf16, #tpu.memory_space<vmem>>, vector<1x128x256xbf16>
    %23 = vector.shape_cast %22 : vector<1x128x256xbf16> to vector<128x256xbf16>
    %24 = vector.shape_cast %21 : vector<128x256xbf16> to vector<1x128x256xbf16>
    tpu.vector_store %arg11[%c0_11, %c0_12, %c0_13], %24 {strides = array<i32>} : memref<1x128x256xbf16, #tpu.memory_space<vmem>>, vector<1x128x256xbf16>,
    %c0_14 = arith.constant 0 : index
    %c0_15 = arith.constant 0 : index
    %25 = vector.load %arg6[%c0_14, %c0_15] : memref<256x256xbf16, #tpu.memory_space<vmem>>, vector<256x256xbf16>
    %cst_16 = arith.constant dense<0.000000e+00> : vector<128x256xf32>
    %26 = tpu.matmul %2, %25, %cst_16 {dimension_numbers = #tpu.dot_dimension_numbers<[1], [0], [0], [1], [0, 0, 1, 1], [], []>} : vector<128x256xbf16>, vector<256x256xbf16>, vector<128x256xf32> -> vector<128x256xf32>
    %c0_17 = arith.constant 0 : index
    %c0_18 = arith.constant 0 : index
    %27 = vector.load %arg7[%c0_17, %c0_18] : memref<1x256xf32, #tpu.memory_space<vmem>>, vector<1x256xf32>
    %28 = vector.broadcast %27 : vector<1x256xf32> to vector<128x256xf32>
    %29 = arith.addf %26, %28 : vector<128x256xf32>
    %30 = arith.mulf %29, %29 : vector<128x256xf32>
    %cst_19 = arith.constant dense<0.000000e+00> : vector<128xf32>
    %31 = vector.multi_reduction <add>, %30, %cst_19 [1] : vector<128x256xf32> to vector<128xf32>
    %32 = vector.shape_cast %31 : vector<128xf32> to vector<128x1xf32>
    %cst_20 = arith.constant 2.560000e+02 : f32
    %33 = vector.broadcast %cst_20 : f32 to vector<128x1xf32>
    %34 = arith.divf %32, %33 : vector<128x1xf32>
    %cst_21 = arith.constant 9.99999997E-7 : f32
    %35 = vector.broadcast %cst_21 : f32 to vector<128x1xf32>
    %36 = arith.addf %34, %35 : vector<128x1xf32>
    %37 = math.rsqrt %36 : vector<128x1xf32>
    %38 = vector.broadcast %37 : vector<128x1xf32> to vector<128x256xf32>
    %39 = arith.mulf %29, %38 : vector<128x256xf32>
    %c0_22 = arith.constant 0 : index
    %c0_23 = arith.constant 0 : index
    %40 = vector.load %arg8[%c0_22, %c0_23] : memref<1x256xf32, #tpu.memory_space<vmem>>, vector<1x256xf32>
    %41 = vector.broadcast %40 : vector<1x256xf32> to vector<128x256xf32>
    %42 = arith.mulf %39, %41 : vector<128x256xf32>
    %43 = arith.truncf %42 : vector<128x256xf32> to vector<128x256xbf16>
    %c0_24 = arith.constant 0 : index
    %c0_25 = arith.constant 0 : index
    %c0_26 = arith.constant 0 : index
    %44 = vector.load %arg12[%c0_24, %c0_25, %c0_26] : memref<1x128x256xbf16, #tpu.memory_space<vmem>>, vector<1x128x256xbf16>
    %45 = vector.shape_cast %44 : vector<1x128x256xbf16> to vector<128x256xbf16>
    %46 = vector.shape_cast %43 : vector<128x256xbf16> to vector<1x128x256xbf16>
    tpu.vector_store %arg12[%c0_24, %c0_25, %c0_26], %46 {strides = array<i32>} : memref<1x128x256xbf16, #tpu.memory_space<vmem>>, vector<1x128x256xbf16>,
    %c0_27 = arith.constant 0 : index
    %c0_28 = arith.constant 0 : index
    %47 = vector.load %arg9[%c0_27, %c0_28] : memref<256x256xbf16, #tpu.memory_space<vmem>>, vector<256x256xbf16>
    %cst_29 = arith.constant dense<0.000000e+00> : vector<128x256xf32>
    %48 = tpu.matmul %2, %47, %cst_29 {dimension_numbers = #tpu.dot_dimension_numbers<[1], [0], [0], [1], [0, 0, 1, 1], [], []>} : vector<128x256xbf16>, vector<256x256xbf16>, vector<128x256xf32> -> vector<128x256xf32>
    %c0_30 = arith.constant 0 : index
    %c0_31 = arith.constant 0 : index
    %49 = vector.load %arg10[%c0_30, %c0_31] : memref<1x256xf32, #tpu.memory_space<vmem>>, vector<1x256xf32>
    %50 = vector.broadcast %49 : vector<1x256xf32> to vector<128x256xf32>
    %51 = arith.addf %48, %50 : vector<128x256xf32>
    %52 = arith.truncf %51 : vector<128x256xf32> to vector<128x256xbf16>
    %c0_32 = arith.constant 0 : index
    %c0_33 = arith.constant 0 : index
    %c0_34 = arith.constant 0 : index
    %53 = vector.load %arg13[%c0_32, %c0_33, %c0_34] : memref<1x128x256xbf16, #tpu.memory_space<vmem>>, vector<1x128x256xbf16>
    %54 = vector.shape_cast %53 : vector<1x128x256xbf16> to vector<128x256xbf16>
    %55 = vector.shape_cast %52 : vector<128x256xbf16> to vector<1x128x256xbf16>
    tpu.vector_store %arg13[%c0_32, %c0_33, %c0_34], %55 {strides = array<i32>} : memref<1x128x256xbf16, #tpu.memory_space<vmem>>, vector<1x128x256xbf16>,
    return
  }
  func.func @transform_0(%arg0: i32, %arg1: i32) -> (i32, i32, i32) {
    %c0_i32 = arith.constant 0 : i32
    %c0_i32_0 = arith.constant 0 : i32
    return %arg0, %arg1, %c0_i32 : i32, i32, i32
  }
  func.func @transform_1(%arg0: i32, %arg1: i32) -> (i32, i32) {
    %c0_i32 = arith.constant 0 : i32
    %c0_i32_0 = arith.constant 0 : i32
    %c0_i32_1 = arith.constant 0 : i32
    return %c0_i32, %c0_i32_0 : i32, i32
  }
  func.func @transform_2(%arg0: i32, %arg1: i32) -> (i32, i32) {
    %c0_i32 = arith.constant 0 : i32
    %c0_i32_0 = arith.constant 0 : i32
    %c0_i32_1 = arith.constant 0 : i32
    return %c0_i32, %c0_i32_0 : i32, i32
  }
  func.func @transform_3(%arg0: i32, %arg1: i32) -> (i32, i32) {
    %c0_i32 = arith.constant 0 : i32
    %c0_i32_0 = arith.constant 0 : i32
    %c0_i32_1 = arith.constant 0 : i32
    return %c0_i32, %c0_i32_0 : i32, i32
  }
  func.func @transform_4(%arg0: i32, %arg1: i32) -> (i32, i32) {
    %c0_i32 = arith.constant 0 : i32
    %c0_i32_0 = arith.constant 0 : i32
    %c0_i32_1 = arith.constant 0 : i32
    return %c0_i32, %c0_i32_0 : i32, i32
  }
  func.func @transform_5(%arg0: i32, %arg1: i32) -> (i32, i32) {
    %c0_i32 = arith.constant 0 : i32
    %c0_i32_0 = arith.constant 0 : i32
    %c0_i32_1 = arith.constant 0 : i32
    return %c0_i32, %c0_i32_0 : i32, i32
  }
  func.func @transform_6(%arg0: i32, %arg1: i32) -> (i32, i32) {
    %c0_i32 = arith.constant 0 : i32
    %c0_i32_0 = arith.constant 0 : i32
    %c0_i32_1 = arith.constant 0 : i32
    return %c0_i32, %c0_i32_0 : i32, i32
  }
  func.func @transform_7(%arg0: i32, %arg1: i32) -> (i32, i32) {
    %c0_i32 = arith.constant 0 : i32
    %c0_i32_0 = arith.constant 0 : i32
    %c0_i32_1 = arith.constant 0 : i32
    return %c0_i32, %c0_i32_0 : i32, i32
  }
  func.func @transform_8(%arg0: i32, %arg1: i32) -> (i32, i32) {
    %c0_i32 = arith.constant 0 : i32
    %c0_i32_0 = arith.constant 0 : i32
    %c0_i32_1 = arith.constant 0 : i32
    return %c0_i32, %c0_i32_0 : i32, i32
  }
  func.func @transform_9(%arg0: i32, %arg1: i32) -> (i32, i32, i32) {
    %c0_i32 = arith.constant 0 : i32
    %c0_i32_0 = arith.constant 0 : i32
    return %arg0, %arg1, %c0_i32 : i32, i32, i32
  }
  func.func @transform_10(%arg0: i32, %arg1: i32) -> (i32, i32, i32) {
    %c0_i32 = arith.constant 0 : i32
    %c0_i32_0 = arith.constant 0 : i32
    return %arg0, %arg1, %c0_i32 : i32, i32, i32
  }
  func.func @transform_11(%arg0: i32, %arg1: i32) -> (i32, i32, i32) {
    %c0_i32 = arith.constant 0 : i32
    %c0_i32_0 = arith.constant 0 : i32
    return %arg0, %arg1, %c0_i32 : i32, i32, i32
  }
}

</mosaic_0001>

<bundles_post_ra>
// kernel: tpu_custom_call.1
= control target key start
LH: loop header
LB: loop body
LE: loop exit
PB: predicated region body
PF: predicated region fallthrough
CT: control target
= control target key end

     0   :  { %s5113_s0 = inlined_call_operand.hbm [shape: f32[2,128,256], index: 0, kind: input, shape index: {}]   ;;  %s5114_s1 = inlined_call_operand.hbm [shape: bf16[256,256], index: 1, kind: input, shape index: {}]   ;;  %s5115_s2 = inlined_call_operand.hbm [shape: f32[1,256], index: 2, kind: input, shape index: {}]   ;;  %s5116_s3 = inlined_call_operand.vmem [shape: f32[1,256], index: 3, kind: input, shape index: {}]   ;;  %s5117_s4 = inlined_call_operand.hbm [shape: bf16[256,256], index: 4, kind: input, shape index: {}]   ;;  %s5118_s5 = inlined_call_operand.vmem [shape: f32[1,256], index: 5, kind: input, shape index: {}]   ;;  %s5119_s6 = inlined_call_operand.hbm [shape: f32[1,256], index: 6, kind: input, shape index: {}]   ;;  %s5120_s7 = inlined_call_operand.hbm [shape: bf16[256,256], index: 7, kind: input, shape index: {}]   ;;  %s5121_s8 = inlined_call_operand.vmem [shape: f32[1,256], index: 8, kind: input, shape index: {}]   ;;  %s5122_s9 = inlined_call_operand.hbm [shape: bf16[2,128,256], index: 9, kind: output, shape index: {0}]   ;;  %s5123_s10 = inlined_call_operand.hbm [shape: bf16[2,128,256], index: 10, kind: output, shape index: {1}]   ;;  %s5124_s11 = inlined_call_operand.hbm [shape: bf16[2,128,256], index: 11, kind: output, shape index: {2}]  }
   0x1   :  { %5142 = sst [smem:[#allocation36_spill]] %s5113_s0 }
   0x2   :  { %5143 = sst [smem:[#allocation37_spill]] %s5114_s1 }
   0x3   :  { %5144 = sst [smem:[#allocation38_spill]] %s5115_s2 }
   0x4   :  { %5145 = sst [smem:[#allocation39_spill]] %s5116_s3 }
   0x5   :  { %5146 = sst [smem:[#allocation40_spill]] %s5117_s4 }
   0x6   :  { %5147 = sst [smem:[#allocation41_spill]] %s5119_s6 }
   0x7   :  { %5148 = sst [smem:[#allocation42_spill]] %s5120_s7 }
   0x8   :  { %5149 = sst [smem:[#allocation43_spill]] %s5122_s9 }
   0x9   :  { %5150 = sst [smem:[#allocation44_spill]] %s5124_s11 }
   0xa   :  { %17 = vsyncpa [#allocation3], 0 }
   0xb   :  { %19 = vsyncpa [#allocation3 + $0x1], 0 }
   0xc   :  { %20 = vsyncpa [#allocation6], 0 }
   0xd   :  { %21 = vsyncpa [#allocation9], 0 }
   0xe   :  { %22 = vsyncpa [#allocation12], 0 }
   0xf   :  { %23 = vsyncpa [#allocation4], 0 }
  0x10   :  { %25 = vsyncpa [#allocation4 + $0x1], 0 }
  0x11   :  { %26 = vsyncpa [#allocation15], 0 }
  0x12   :  { %28 = vsyncpa [#allocation15 + $0x1], 0  ;;  %s3942_s17 = smov 0   ;;  %s3944_s18 = smov 0  }
  0x13   :  { %s3946_s19 = smov 0   ;;  %s3948_s20 = smov 0  }
  0x14   :  { %s3950_s21 = smov 0   ;;  %s3952_s22 = smov 0  }
  0x15 LB: > { %s3973_s23 = sadd.s32 4294967295, %s3868_s22   ;;  %p2823_p0 = scmp.ge.s32.totalorder %s3868_s22, 1  ;;  %s3868_s22 = sphi %s3952_s22, %s34_s22   ;;  %s3864_s21 = sphi %s3950_s21, %s5201_s21   ;;  %s3860_s20 = sphi %s3948_s20, %s5200_s20   ;;  %s3856_s19 = sphi %s3946_s19, %s5199_s19   ;;  %s3852_s18 = sphi %s3944_s18, %s5198_s18   ;;  %s3848_s17 = sphi %s3942_s17, %s5197_s17  }
  0x16   : > { %p69_p1 = scmp.eq.s32.totalorder %s3973_s23, 0  ;;  %p331_p2 = scmp.lt.s32.totalorder %s3868_s22, 3 }
  0x17   : > { %s5151_s1 = sld [smem:[#allocation37_spill]]  ;;  %s3870_s28 = smov [#allocation5]  }
  0x18   : > { %p3981_p3 = pnand %p2823_p0, %p331_p2  ;;  %s344_s29 = sshll.u32 %s3870_s28, 4  ;;  %s345_s29 = int_to_ptr.vmem [resolvable:$true] %s344_s29 }
  0x19   : > { %p2829_p6 = scmp.ge.s32.totalorder %s3868_s22, 2  ;;  %s5154_s4 = sld [smem:[#allocation40_spill]] }
  0x1a   : > { %p3366_p4 = pneg %p3981_p3  ;;  %s3871_s15 = smov 128  }
  0x1b   : > { %s3872_s16 = smov 8   ;;  %s3873_s24 = smov [#allocation8]  }
  0x1c   : > { %p3989_p5 = pnand %p3366_p4, %p69_p1  ;;  %s373_s25 = sshll.u32 %s3873_s24, 4  ;;  %s374_s25 = int_to_ptr.vmem [resolvable:$true] %s373_s25 }
  0x1d   : > { %s342_s26 = sshll.u32 %s5151_s1, 4  ;;  %s5155_s2 = sld [smem:[#allocation38_spill]]  ;;  %s343_s26 = int_to_ptr.hbm [resolvable:$true] %s342_s26 }
  0x1e   : > { %3369 = dma.hbm_to_vmem [thread:$0]  (!%p3989_p5), %s343_s26, 4096, %s345_s29, [#allocation6], %s3871_s15, %s3871_s15, %s3872_s16  }
  0x1f   : > { %s371_s14 = sshll.u32 %s5154_s4, 4  ;;  %s5156_s6 = sld [smem:[#allocation41_spill]]  ;;  %s372_s14 = int_to_ptr.hbm [resolvable:$true] %s371_s14 }
  0x20   : > { %3375 = dma.hbm_to_vmem [thread:$0]  (!%p3989_p5), %s372_s14, 4096, %s374_s25, [#allocation9], %s3871_s15, %s3871_s15, %s3872_s16  }
  0x21   : > { %s3874_s4 = smov [#allocation7]   ;;  %s3875_s1 = smov [#allocation10]  }
  0x22   : > { %s359_s26 = sshll.u32 %s3874_s4, 4  ;;  %s391_s29 = sshll.u32 %s3875_s1, 4  ;;  %s360_s26 = int_to_ptr.vmem [resolvable:$true] %s359_s26  ;;  %s392_s29 = int_to_ptr.vmem [resolvable:$true] %s391_s29 }
  0x23   : > { %s357_s9 = sshll.u32 %s5155_s2, 4  ;;  %s5157_s7 = sld [smem:[#allocation42_spill]]  ;;  %s358_s9 = int_to_ptr.hbm [resolvable:$true] %s357_s9 }
  0x24   : > { %3372 = dma.hbm_to_vmem [thread:$0]  (!%p3989_p5), %s358_s9, 32, %s360_s26, [#allocation6]  }
  0x25   : > { %s389_s13 = sshll.u32 %s5156_s6, 4  ;;  %s3876_s4 = smov [#allocation11]   ;;  %s390_s13 = int_to_ptr.hbm [resolvable:$true] %s389_s13 }
  0x26   : > { %3378 = dma.hbm_to_vmem [thread:$0]  (!%p3989_p5), %s390_s13, 32, %s392_s29, [#allocation9]  }
  0x27   : > { %s402_s25 = sshll.u32 %s3876_s4, 4  ;;  %s5127_s9 = sadd.s32 4294967294, %s3868_s22   ;;  %s403_s25 = int_to_ptr.vmem [resolvable:$true] %s402_s25 }
  0x28   : > { %s46_s28 = sadd.s32 1, %s3864_s21  ;;  %s55_s12 = sadd.s32 1, %s3856_s19 }
  0x29   : > { %s400_s24 = sshll.u32 %s5157_s7, 4  ;;  %p48_p7 = scmp.ge.s32.totalorder %s46_s28, 2  ;;  %s401_s24 = int_to_ptr.hbm [resolvable:$true] %s400_s24 }
  0x2a   : > { %3381 = dma.hbm_to_vmem [thread:$0]  (!%p3989_p5), %s401_s24, 4096, %s403_s25, [#allocation12], %s3871_s15, %s3871_s15, %s3872_s16  }
  0x2b   : > { %p62_p8 = scmp.ne.s32.totalorder %s3856_s19, %s3852_s18  ;;  %p63_p9 = scmp.eq.s32.totalorder %s3868_s22, 0 }
  0x2c   : > { %p68_p10 = scmp.ne.s32.totalorder %s3852_s18, %s3848_s17  ;;  %s5203_s28 = smov (%p48_p7, %s46_s28), 0 }
  0x2d   : > { %5158 = sst [smem:[#allocation23_spill]] %s5203_s28  ;;  %p4026_p11 = por %p63_p9, %p62_p8 }
  0x2e   : > { %p4032_p12 = por %p69_p1, %p68_p10  ;;  %s50_s15 = ssub.s32 %s3864_s21, %s5203_s28 }
  0x2f   : > { %p262_p13 = scmp.eq.s32.totalorder %s3973_s23, 1  ;;  %p53_p0 = scmp.eq.s32.totalorder %s50_s15, 0 }
  0x30   : > { %p268_p2 = scmp.eq.s32.totalorder %s5127_s9, 1  ;;  %p3401_p5 = scmp.lt.s32.totalorder %s3868_s22, 2 }
  0x31   : > { %p4041_p4 = por %p262_p13, %p62_p8  ;;  %s419_s29 = sand.u32 1, %s3856_s19  }
  0x32   : > { %s4047_s26 = scalar_select %p53_p0, %s3856_s19, %s55_s12  }
  0x33   : > { %p4049_p7 = por %p268_p2, %p68_p10  ;;  %s2830_s14 = sshll.u32 %s419_s29, 8 }
  0x34   : > { %s3238_s11 = sshll.u32 %s3864_s21, 8  ;;  %s5163_s0 = sld [smem:[#allocation36_spill]] }
  0x35   : > { %s423_s15 = scalar_lea.vmem [#allocation2], %s2830_s14  ;;  %p3383_p8 = pnand %p3401_p5, %p4026_p11 }
  0x36   : > { %s434_s9 = sshll.u32 %s423_s15, 4  ;;  %s420_s12 = scalar_lea.sflag [#allocation3], %s419_s29  ;;  %s435_s9 = int_to_ptr.vmem [resolvable:$true] %s434_s9 }
  0x37   : > { %s3877_s6 = smov 256   ;;  %s3878_s7 = smov 16  }
  0x38   : > { %446 = sbr.rel (%p3981_p3) target bundleno = 675 (0x2a3), region = 56 }
  0x3a   : > { %s431_s25 = scalar_lea.hbm %s5163_s0, %s3238_s11 }
  0x3b   : > { %s432_s2 = sshll.u32 %s431_s25, 4  ;;  %s433_s2 = int_to_ptr.hbm [resolvable:$true] %s432_s2 }
  0x3c   : > { %3385 = dma.hbm_to_vmem [thread:$0]  (!%p3383_p8), %s433_s2, 4096, %s435_s9, %s420_s12, %s3877_s6, %s3877_s6, %s3878_s7  }
  0x3d   : > { %s4063_s28 = sand.u32 1, %s3852_s18  }
  0x3e   : > { %s2834_s14 = sshll.u32 %s4063_s28, 8  ;;  %s449_s11 = scalar_lea.sflag [#allocation3], %s4063_s28 }
  0x3f   : > { %s4067_s24 = scalar_lea.vmem [#allocation2], %s2834_s14 }
  0x40   : > { %3823 = dma.done.wait (%p4032_p12), %s449_s11, 4096  }
  0x41   : > { %3825 = vsyncadd (%p4032_p12), %s449_s11, 4294963200 }
  0x42   : > { %3827 = dma.done.wait (%p69_p1), [#allocation6], 4128  }
  0x43   : > { %3829 = vsyncadd (%p69_p1), [#allocation6], 4294963168 }
  0x44   : > { %3831 = dma.done.wait (%p69_p1), [#allocation9], 4128  }
  0x45   : > { %3833 = vsyncadd (%p69_p1), [#allocation9], 4294963168 }
  0x46   : > { %3835 = dma.done.wait (%p69_p1), [#allocation12], 4096  }
  0x47   : > { %3837 = vsyncadd (%p69_p1), [#allocation12], 4294963200  ;;  %v2901_v0 = vld [vmem:[#allocation5 + $0x70] sm:$0xf]  ;;  %v3254_v1 = vld [vmem:[#allocation5 + $0x74] sm:$0xf0] }
  0x48   : > { %v2965_v2 = vld [vmem:[#allocation5 + $0xf0] sm:$0xf]  ;;  %v2902_v3 = vor.u32 %v3254_v1, %v2901_v0  ;;  %v3270_v4 = vld [vmem:[#allocation5 + $0xf4] sm:$0xf0]  ;;  %v3253_v5 = vld [vmem:[#allocation5 + $0x74] sm:$0xf] }
  0x49   : > { %v2903_v6 = vld [vmem:[#allocation5 + $0x78] sm:$0xf0]  ;;  %v2966_v7 = vor.u32 %v3270_v4, %v2965_v2  ;;  %v3269_v9 = vld [vmem:[#allocation5 + $0xf4] sm:$0xf]  ;;  %v2893_v11 = vld [vmem:[#allocation5 + $0x60] sm:$0xf] }
  0x4a   : > { %v2906_v8 = vor.u32 %v3253_v5, %v2903_v6  ;;  %v2967_v10 = vld [vmem:[#allocation5 + $0xf8] sm:$0xf0]  ;;  %777 = vmatpush.bf16.msra.mxu0 %v2902_v3  ;;  %v3252_v13 = vld [vmem:[#allocation5 + $0x64] sm:$0xf0]  ;;  %v2957_v14 = vld [vmem:[#allocation5 + $0xe0] sm:$0xf] }
  0x4b   : > { %v2970_v12 = vor.u32 %v3269_v9, %v2967_v10  ;;  %v3268_v15 = vld [vmem:[#allocation5 + $0xe4] sm:$0xf0]  ;;  %826 = vmatpush.bf16.msra.mxu1 %v2966_v7  ;;  %v2894_v16 = vor.u32 %v3252_v13, %v2893_v11  ;;  %v3251_v18 = vld [vmem:[#allocation5 + $0x64] sm:$0xf]  ;;  %v2895_v19 = vld [vmem:[#allocation5 + $0x68] sm:$0xf0] }
  0x4c   : > { %875 = vmatpush.bf16.msra.mxu2 %v2906_v8  ;;  %v2958_v17 = vor.u32 %v3268_v15, %v2957_v14  ;;  %v3267_v20 = vld [vmem:[#allocation5 + $0xe4] sm:$0xf]  ;;  %v2898_v21 = vor.u32 %v3251_v18, %v2895_v19  ;;  %v2959_v22 = vld [vmem:[#allocation5 + $0xe8] sm:$0xf0]  ;;  %v2885_v23 = vld [vmem:[#allocation5 + $0x50] sm:$0xf] }
  0x4d   : > { %924 = vmatpush.bf16.msra.mxu3 %v2970_v12  ;;  %v3250_v24 = vld [vmem:[#allocation5 + $0x54] sm:$0xf0]  ;;  %v2962_v25 = vor.u32 %v3267_v20, %v2959_v22  ;;  %v2949_v26 = vld [vmem:[#allocation5 + $0xd0] sm:$0xf]  ;;  %v3249_v28 = vld [vmem:[#allocation5 + $0x54] sm:$0xf] }
  0x4e   : > { %v3266_v27 = vld [vmem:[#allocation5 + $0xd4] sm:$0xf0]  ;;  %778 = vmatpush.bf16.msra.mxu0 %v2894_v16  ;;  %v2886_v29 = vor.u32 %v3250_v24, %v2885_v23  ;;  %v2887_v30 = vld [vmem:[#allocation5 + $0x58] sm:$0xf0]  ;;  %v3265_v31 = vld [vmem:[#allocation5 + $0xd4] sm:$0xf] }
  0x4f   : > { %v2951_v32 = vld [vmem:[#allocation5 + $0xd8] sm:$0xf0]  ;;  %827 = vmatpush.bf16.msra.mxu1 %v2958_v17  ;;  %v2950_v33 = vor.u32 %v3266_v27, %v2949_v26  ;;  %v2890_v34 = vor.u32 %v3249_v28, %v2887_v30  ;;  %v2877_v35 = vld [vmem:[#allocation5 + $0x40] sm:$0xf]  ;;  %v3248_v36 = vld [vmem:[#allocation5 + $0x44] sm:$0xf0] }
  0x50   : > { %876 = vmatpush.bf16.msra.mxu2 %v2898_v21  ;;  %v2941_v37 = vld [vmem:[#allocation5 + $0xc0] sm:$0xf]  ;;  %v2954_v38 = vor.u32 %v3265_v31, %v2951_v32  ;;  %v3264_v39 = vld [vmem:[#allocation5 + $0xc4] sm:$0xf0]  ;;  %v3247_v40 = vld [vmem:[#allocation5 + $0x44] sm:$0xf]  ;;  %v2878_v44 = vor.u32 %v3248_v36, %v2877_v35 }
  0x51   : > { %925 = vmatpush.bf16.msra.mxu3 %v2962_v25  ;;  %v2879_v41 = vld [vmem:[#allocation5 + $0x48] sm:$0xf0]  ;;  %v3263_v42 = vld [vmem:[#allocation5 + $0xc4] sm:$0xf]  ;;  %v2942_v45 = vor.u32 %v3264_v39, %v2941_v37  ;;  %v2869_v47 = vld [vmem:[#allocation5 + $0x30] sm:$0xf] }
  0x52   : > { %v2943_v43 = vld [vmem:[#allocation5 + $0xc8] sm:$0xf0]  ;;  %779 = vmatpush.bf16.msra.mxu0 %v2886_v29  ;;  %v2882_v46 = vor.u32 %v3247_v40, %v2879_v41  ;;  %v3246_v48 = vld [vmem:[#allocation5 + $0x34] sm:$0xf0]  ;;  %v2933_v49 = vld [vmem:[#allocation5 + $0xb0] sm:$0xf] }
  0x53   : > { %828 = vmatpush.bf16.msra.mxu1 %v2950_v33  ;;  %v2946_v50 = vor.u32 %v3263_v42, %v2943_v43  ;;  %v3262_v51 = vld [vmem:[#allocation5 + $0xb4] sm:$0xf0]  ;;  %v3245_v52 = vld [vmem:[#allocation5 + $0x34] sm:$0xf]  ;;  %v2871_v53 = vld [vmem:[#allocation5 + $0x38] sm:$0xf0]  ;;  %v2870_v56 = vor.u32 %v3246_v48, %v2869_v47 }
  0x54   : > { %877 = vmatpush.bf16.msra.mxu2 %v2890_v34  ;;  %v3261_v54 = vld [vmem:[#allocation5 + $0xb4] sm:$0xf]  ;;  %v2935_v55 = vld [vmem:[#allocation5 + $0xb8] sm:$0xf0]  ;;  %v2934_v57 = vor.u32 %v3262_v51, %v2933_v49  ;;  %v2874_v58 = vor.u32 %v3245_v52, %v2871_v53  ;;  %v2861_v59 = vld [vmem:[#allocation5 + $0x20] sm:$0xf] }
  0x55   : > { %926 = vmatpush.bf16.msra.mxu3 %v2954_v38  ;;  %v3244_v60 = vld [vmem:[#allocation5 + $0x24] sm:$0xf0]  ;;  %v2925_v61 = vld [vmem:[#allocation5 + $0xa0] sm:$0xf]  ;;  %v2938_v62 = vor.u32 %v3261_v54, %v2935_v55  ;;  %v3243_v0 = vld [vmem:[#allocation5 + $0x24] sm:$0xf] }
  0x56   : > { %780 = vmatpush.bf16.msra.mxu0 %v2878_v44  ;;  %v3260_v63 = vld [vmem:[#allocation5 + $0xa4] sm:$0xf0]  ;;  %v2863_v1 = vld [vmem:[#allocation5 + $0x28] sm:$0xf0]  ;;  %v3259_v2 = vld [vmem:[#allocation5 + $0xa4] sm:$0xf]  ;;  %v2862_v4 = vor.u32 %v3244_v60, %v2861_v59 }
  0x57   : > { %829 = vmatpush.bf16.msra.mxu1 %v2942_v45  ;;  %v2927_v3 = vld [vmem:[#allocation5 + $0xa8] sm:$0xf0]  ;;  %v2926_v5 = vor.u32 %v3260_v63, %v2925_v61  ;;  %v2866_v6 = vor.u32 %v3243_v0, %v2863_v1  ;;  %v2853_v7 = vld [vmem:[#allocation5 + $0x10] sm:$0xf]  ;;  %v3242_v8 = vld [vmem:[#allocation5 + $0x14] sm:$0xf0] }
  0x58   : > { %878 = vmatpush.bf16.msra.mxu2 %v2882_v46  ;;  %v2917_v9 = vld [vmem:[#allocation5 + $0x90] sm:$0xf]  ;;  %v2930_v10 = vor.u32 %v3259_v2, %v2927_v3  ;;  %v3258_v11 = vld [vmem:[#allocation5 + $0x94] sm:$0xf0]  ;;  %v3241_v12 = vld [vmem:[#allocation5 + $0x14] sm:$0xf]  ;;  %v2854_v16 = vor.u32 %v3242_v8, %v2853_v7 }
  0x59   : > { %927 = vmatpush.bf16.msra.mxu3 %v2946_v50  ;;  %v2855_v13 = vld [vmem:[#allocation5 + $0x18] sm:$0xf0]  ;;  %v3257_v14 = vld [vmem:[#allocation5 + $0x94] sm:$0xf]  ;;  %v2845_v17 = vld [vmem:[#allocation5] sm:$0xf]  ;;  %v2918_v19 = vor.u32 %v3258_v11, %v2917_v9 }
  0x5a   : > { %781 = vmatpush.bf16.msra.mxu0 %v2870_v56  ;;  %v2919_v15 = vld [vmem:[#allocation5 + $0x98] sm:$0xf0]  ;;  %v3240_v18 = vld [vmem:[#allocation5 + $0x4] sm:$0xf0]  ;;  %v2858_v20 = vor.u32 %v3241_v12, %v2855_v13  ;;  %v2909_v21 = vld [vmem:[#allocation5 + $0x80] sm:$0xf] }
  0x5b   : > { %830 = vmatpush.bf16.msra.mxu1 %v2934_v57  ;;  %v3256_v22 = vld [vmem:[#allocation5 + $0x84] sm:$0xf0]  ;;  %v3239_v23 = vld [vmem:[#allocation5 + $0x4] sm:$0xf]  ;;  %v2922_v24 = vor.u32 %v3257_v14, %v2919_v15  ;;  %v2847_v25 = vld [vmem:[#allocation5 + $0x8] sm:$0xf0]  ;;  %v2846_v31 = vor.u32 %v3240_v18, %v2845_v17 }
  0x5c   : > { %879 = vmatpush.bf16.msra.mxu2 %v2874_v58  ;;  %v3255_v26 = vld [vmem:[#allocation5 + $0x84] sm:$0xf]  ;;  %v2911_v27 = vld [vmem:[#allocation5 + $0x88] sm:$0xf0]  ;;  %v3285_v29 = vld [vmem:[#allocation8 + $0x74] sm:$0xf]  ;;  %v2910_v35 = vor.u32 %v3256_v22, %v2909_v21  ;;  %v2850_v36 = vor.u32 %v3239_v23, %v2847_v25 }
  0x5d   : > { %928 = vmatpush.bf16.msra.mxu3 %v2938_v62  ;;  %v531_v28 = vld [vmem:[%s4067_s24] sm:$0xff]  ;;  %v533_v32 = vld [vmem:[%s4067_s24 + $0x10] sm:$0xff]  ;;  %v532_v37 = vld [vmem:[%s4067_s24 + $0x8] sm:$0xff]  ;;  %v2914_v39 = vor.u32 %v3255_v26, %v2911_v27  ;;  %s5174_s3 = sld [smem:[#allocation39_spill]]  ;;  %s4424_s9 = sshll.u32 %s4063_s28, 7 }
  0x5e   : > { %782 = vmatpush.bf16.msra.mxu0 %v2862_v4  ;;  %v3031_v30 = vld [vmem:[#allocation8 + $0x78] sm:$0xf0]  ;;  %v3301_v33 = vld [vmem:[#allocation8 + $0xf4] sm:$0xf]  ;;  %v3029_v41 = vld [vmem:[#allocation8 + $0x70] sm:$0xf]  ;;  %v4089_v44 = vpack.c.bf16 %v533_v32, %v531_v28 }
  0x5f   : > { %831 = vmatpush.bf16.msra.mxu1 %v2926_v5  ;;  %v3095_v34 = vld [vmem:[#allocation8 + $0xf8] sm:$0xf0]  ;;  %v3034_v40 = vor.u32 %v3285_v29, %v3031_v30  ;;  %v3286_v42 = vld [vmem:[#allocation8 + $0x74] sm:$0xf0]  ;;  %v3093_v43 = vld [vmem:[#allocation8 + $0xf0] sm:$0xf] }
  0x60   : > { %880 = vmatpush.bf16.msra.mxu2 %v2866_v6  ;;  %v534_v38 = vld [vmem:[%s4067_s24 + $0x18] sm:$0xff]  ;;  %v3098_v45 = vor.u32 %v3301_v33, %v3095_v34  ;;  %v3283_v47 = vld [vmem:[#allocation8 + $0x64] sm:$0xf]  ;;  %v3023_v48 = vld [vmem:[#allocation8 + $0x68] sm:$0xf0]  ;;  %v3030_v52 = vor.u32 %v3286_v42, %v3029_v41  ;;  %s4445_s13 = scalar_lea.vmem [#allocation13], %s4424_s9 }
  0x61   : > { %929 = vmatpush.bf16.msra.mxu3 %v2930_v10  ;;  %v3302_v46 = vld [vmem:[#allocation8 + $0xf4] sm:$0xf0]  ;;  %v4091_v49 = vpack.c.bf16 %v534_v38, %v532_v37  ;;  %v3299_v50 = vld [vmem:[#allocation8 + $0xe4] sm:$0xf]  ;;  %v3087_v51 = vld [vmem:[#allocation8 + $0xe8] sm:$0xf0]  ;;  %v3026_v54 = vor.u32 %v3283_v47, %v3023_v48 }
  0x62   : > { %783 = vmatpush.bf16.msra.mxu0 %v2854_v16  ;;  %v3094_v53 = vor.u32 %v3302_v46, %v3093_v43  ;;  %v3021_v55 = vld [vmem:[#allocation8 + $0x60] sm:$0xf]  ;;  %v3284_v56 = vld [vmem:[#allocation8 + $0x64] sm:$0xf0]  ;;  %v3090_v57 = vor.u32 %v3299_v50, %v3087_v51  ;;  %v3281_v61 = vld [vmem:[#allocation8 + $0x54] sm:$0xf] }
  0x63   : > { %832 = vmatpush.bf16.msra.mxu1 %v2918_v19  ;;  %v3085_v58 = vld [vmem:[#allocation8 + $0xe0] sm:$0xf]  ;;  %v3300_v59 = vld [vmem:[#allocation8 + $0xe4] sm:$0xf0]  ;;  %v3022_v60 = vor.u32 %v3284_v56, %v3021_v55  ;;  %v3015_v62 = vld [vmem:[#allocation8 + $0x58] sm:$0xf0] }
  0x64   : > { %881 = vmatpush.bf16.msra.mxu2 %v2858_v20  ;;  %v3297_v63 = vld [vmem:[#allocation8 + $0xd4] sm:$0xf]  ;;  %v3086_v0 = vor.u32 %v3300_v59, %v3085_v58  ;;  %v3018_v1 = vor.u32 %v3281_v61, %v3015_v62  ;;  %v3079_v2 = vld [vmem:[#allocation8 + $0xd8] sm:$0xf0]  ;;  %v3013_v3 = vld [vmem:[#allocation8 + $0x50] sm:$0xf] }
  0x65   : > { %930 = vmatpush.bf16.msra.mxu3 %v2922_v24  ;;  %v3282_v4 = vld [vmem:[#allocation8 + $0x54] sm:$0xf0]  ;;  %v3082_v5 = vor.u32 %v3297_v63, %v3079_v2  ;;  %v3077_v6 = vld [vmem:[#allocation8 + $0xd0] sm:$0xf]  ;;  %v535_v10 = vld [vmem:[%s4067_s24 + $0x20] sm:$0xff]  ;;  %s4744_s4 = scalar_lea.vmem [#allocation16], %s4424_s9 }
  0x66   : > { %784 = vmatpush.bf16.msra.mxu0 %v2846_v31  ;;  %v3298_v7 = vld [vmem:[#allocation8 + $0xd4] sm:$0xf0]  ;;  %v3014_v8 = vor.u32 %v3282_v4, %v3013_v3  ;;  %v537_v11 = vld [vmem:[%s4067_s24 + $0x30] sm:$0xff]  ;;  %v536_v12 = vld [vmem:[%s4067_s24 + $0x28] sm:$0xff]  ;;  %s4773_s25 = scalar_lea.vmem [#allocation14], %s4424_s9  ;;  %s4978_s15 = sshll.u32 %s3860_s20, 7 }
  0x67   : > { %833 = vmatpush.bf16.msra.mxu1 %v2910_v35  ;;  %v3078_v9 = vor.u32 %v3298_v7, %v3077_v6  ;;  %v538_v13 = vld [vmem:[%s4067_s24 + $0x38] sm:$0xff]  ;;  %v4101_v14 = vpack.c.bf16 %v537_v11, %v535_v10  ;;  %v3279_v16 = vld [vmem:[#allocation8 + $0x44] sm:$0xf]  ;;  %v3007_v17 = vld [vmem:[#allocation8 + $0x48] sm:$0xf0]  ;;  %s2553_s12 = sand.u32 1, %s3973_s23   ;;  %s2593_s11 = scalar_lea.hbm %s5123_s10, %s4978_s15 }
  0x68   : > { %882 = vmatpush.bf16.msra.mxu2 %v2850_v36  ;;  %v4103_v15 = vpack.c.bf16 %v538_v13, %v536_v12  ;;  %v3295_v18 = vld [vmem:[#allocation8 + $0xc4] sm:$0xf]  ;;  %v3010_v19 = vor.u32 %v3279_v16, %v3007_v17  ;;  %v3071_v20 = vld [vmem:[#allocation8 + $0xc8] sm:$0xf0]  ;;  %v3005_v21 = vld [vmem:[#allocation8 + $0x40] sm:$0xf] }
  0x69   : > { %931 = vmatpush.bf16.msra.mxu3 %v2914_v39  ;;  %785 = vmatmul.bf16.vlgmr.msra.gmra.mxu0 %v4089_v44  ;;  %v3280_v22 = vld [vmem:[#allocation8 + $0x44] sm:$0xf0]  ;;  %v3074_v23 = vor.u32 %v3295_v18, %v3071_v20  ;;  %v3069_v25 = vld [vmem:[#allocation8 + $0xc0] sm:$0xf]  ;;  %v541_v29 = vld [vmem:[%s4067_s24 + $0x50] sm:$0xff]  ;;  %s5187_s6 = sld [smem:[#allocation44_spill]] }
  0x6a   : > { %834 = vmatmul.bf16.vlgmr.msra.gmra.mxu1 %v4091_v49  ;;  %1552 = vmatpush.bf16.msrb.mxu0 %v3030_v52  ;;  %v3006_v24 = vor.u32 %v3280_v22, %v3005_v21  ;;  %v3296_v26 = vld [vmem:[#allocation8 + $0xc4] sm:$0xf0]  ;;  %v539_v28 = vld [vmem:[%s4067_s24 + $0x40] sm:$0xff]  ;;  %v542_v31 = vld [vmem:[%s4067_s24 + $0x58] sm:$0xff]  ;;  %s2594_s27 = sshll.u32 %s4773_s25, 4  ;;  %s5001_s9 = sshll.u32 %s2593_s11, 4  ;;  %s5013_s27 = int_to_ptr.vmem [resolvable:$true] %s2594_s27  ;;  %s2597_s9 = int_to_ptr.hbm [resolvable:$true] %s5001_s9 }
  0x6b   : > { %883 = vmatmul.bf16.vlgmr.msra.gmra.mxu2 %v4089_v44  ;;  %1601 = vmatpush.bf16.msrb.mxu1 %v3094_v53  ;;  %v3070_v27 = vor.u32 %v3296_v26, %v3069_v25  ;;  %v540_v30 = vld [vmem:[%s4067_s24 + $0x48] sm:$0xff]  ;;  %v4113_v32 = vpack.c.bf16 %v541_v29, %v539_v28  ;;  %v3277_v34 = vld [vmem:[#allocation8 + $0x34] sm:$0xf]  ;;  %v2999_v35 = vld [vmem:[#allocation8 + $0x38] sm:$0xf0]  ;;  %s2614_s29 = sshll.u32 %s4744_s4, 4  ;;  %s5018_s29 = int_to_ptr.vmem [resolvable:$true] %s2614_s29 }
  0x6c   : > { %1650 = vmatpush.bf16.msrb.mxu2 %v3034_v40  ;;  %932 = vmatmul.bf16.vlgmr.msra.gmra.mxu3 %v4091_v49  ;;  %v4115_v33 = vpack.c.bf16 %v542_v31, %v540_v30  ;;  %v3293_v36 = vld [vmem:[#allocation8 + $0xb4] sm:$0xf]  ;;  %v3002_v37 = vor.u32 %v3277_v34, %v2999_v35  ;;  %v3063_v38 = vld [vmem:[#allocation8 + $0xb8] sm:$0xf0]  ;;  %v2997_v39 = vld [vmem:[#allocation8 + $0x30] sm:$0xf] }
  0x6d   : > { %1699 = vmatpush.bf16.msrb.mxu3 %v3098_v45  ;;  %v3278_v40 = vld [vmem:[#allocation8 + $0x34] sm:$0xf0]  ;;  %v3066_v41 = vor.u32 %v3293_v36, %v3063_v38  ;;  %v3061_v43 = vld [vmem:[#allocation8 + $0xb0] sm:$0xf]  ;;  %v543_v47 = vld [vmem:[%s4067_s24 + $0x60] sm:$0xff] }
  0x6e   : > { %1553 = vmatpush.bf16.msrb.mxu0 %v3022_v60  ;;  %v2998_v42 = vor.u32 %v3278_v40, %v2997_v39  ;;  %v3294_v45 = vld [vmem:[#allocation8 + $0xb4] sm:$0xf0]  ;;  %v545_v48 = vld [vmem:[%s4067_s24 + $0x70] sm:$0xff]  ;;  %v544_v50 = vld [vmem:[%s4067_s24 + $0x68] sm:$0xff] }
  0x6f   : > { %1602 = vmatpush.bf16.msrb.mxu1 %v3086_v0  ;;  %v3062_v46 = vor.u32 %v3294_v45, %v3061_v43  ;;  %v546_v51 = vld [vmem:[%s4067_s24 + $0x78] sm:$0xff]  ;;  %v4125_v52 = vpack.c.bf16 %v545_v48, %v543_v47  ;;  %v2991_v55 = vld [vmem:[#allocation8 + $0x28] sm:$0xf0]  ;;  %v3291_v56 = vld [vmem:[#allocation8 + $0xa4] sm:$0xf]  ;;  %s2613_s7 = scalar_lea.hbm %s5187_s6, %s4978_s15 }
  0x70   : > { %1651 = vmatpush.bf16.msrb.mxu2 %v3026_v54  ;;  %v4127_v53 = vpack.c.bf16 %v546_v51, %v544_v50  ;;  %v3275_v54 = vld [vmem:[#allocation8 + $0x24] sm:$0xf]  ;;  %v3055_v58 = vld [vmem:[#allocation8 + $0xa8] sm:$0xf0]  ;;  %v2989_v59 = vld [vmem:[#allocation8 + $0x20] sm:$0xf] }
  0x71   : > { %1700 = vmatpush.bf16.msrb.mxu3 %v3090_v57  ;;  %v2994_v57 = vor.u32 %v3275_v54, %v2991_v55  ;;  %v3276_v60 = vld [vmem:[#allocation8 + $0x24] sm:$0xf0]  ;;  %v3058_v61 = vor.u32 %v3291_v56, %v3055_v58  ;;  %v3053_v63 = vld [vmem:[#allocation8 + $0xa0] sm:$0xf]  ;;  %v549_v3 = vld [vmem:[%s4067_s24 + $0x90] sm:$0xff]  ;;  %s5005_s30 = sshll.u32 %s2613_s7, 4 }
  0x72   : > { %1554 = vmatpush.bf16.msrb.mxu0 %v3014_v8  ;;  %v2990_v62 = vor.u32 %v3276_v60, %v2989_v59  ;;  %v3292_v0 = vld [vmem:[#allocation8 + $0xa4] sm:$0xf0]  ;;  %v547_v2 = vld [vmem:[%s4067_s24 + $0x80] sm:$0xff]  ;;  %v3273_v8 = vld [vmem:[#allocation8 + $0x14] sm:$0xf]  ;;  %5188 = sst [smem:[#allocation35_spill]] %s5005_s30 }
  0x73   : > { %1603 = vmatpush.bf16.msrb.mxu1 %v3078_v9  ;;  %v548_v4 = vld [vmem:[%s4067_s24 + $0x88] sm:$0xff]  ;;  %v4137_v6 = vpack.c.bf16 %v549_v3, %v547_v2  ;;  %v2983_v9 = vld [vmem:[#allocation8 + $0x18] sm:$0xf0]  ;;  %v3289_v10 = vld [vmem:[#allocation8 + $0x94] sm:$0xf]  ;;  %s3728_s7 = sshra.s32 %s2597_s9, 4  ;;  %s3729_s7 = int_to_ptr.hbm [resolvable:$true] %s3728_s7 }
  0x74   : > { %1652 = vmatpush.bf16.msrb.mxu2 %v3018_v1  ;;  %v3054_v1 = vor.u32 %v3292_v0, %v3053_v63  ;;  %v2986_v11 = vor.u32 %v3273_v8, %v2983_v9  ;;  %v3047_v12 = vld [vmem:[#allocation8 + $0x98] sm:$0xf0]  ;;  %v2981_v13 = vld [vmem:[#allocation8 + $0x10] sm:$0xf]  ;;  %v3274_v16 = vld [vmem:[#allocation8 + $0x14] sm:$0xf0]  ;;  %p3735_p10 = scmp.lt.s32.totalorder %s3729_s7, %s5123_s10 }
  0x75   : > { %1701 = vmatpush.bf16.msrb.mxu3 %v3082_v5  ;;  %v550_v5 = vld [vmem:[%s4067_s24 + $0x98] sm:$0xff]  ;;  %v3050_v17 = vor.u32 %v3289_v10, %v3047_v12  ;;  %v2982_v18 = vor.u32 %v3274_v16, %v2981_v13  ;;  %v551_v22 = vld [vmem:[%s4067_s24 + $0xa0] sm:$0xff]  ;;  %v2975_v29 = vld [vmem:[#allocation8 + $0x8] sm:$0xf0]  ;;  %s3730_s20 = scalar_lea.hbm %s3729_s7, 128 }
  0x76   : > { %1555 = vmatpush.bf16.msrb.mxu0 %v3006_v24  ;;  %v4139_v7 = vpack.c.bf16 %v550_v5, %v548_v4  ;;  %v3290_v20 = vld [vmem:[#allocation8 + $0x94] sm:$0xf0]  ;;  %v552_v24 = vld [vmem:[%s4067_s24 + $0xa8] sm:$0xff]  ;;  %v2973_v35 = vld [vmem:[#allocation8] sm:$0xf]  ;;  %p3731_p1 = scmp.ne.s32.totalorder %s3729_s7, %s3730_s20 }
  0x77   : > { %1604 = vmatpush.bf16.msrb.mxu1 %v3070_v27  ;;  %v554_v25 = vld [vmem:[%s4067_s24 + $0xb8] sm:$0xff]  ;;  %v3271_v28 = vld [vmem:[#allocation8 + $0x4] sm:$0xf]  ;;  %v3039_v34 = vld [vmem:[#allocation8 + $0x88] sm:$0xf0] }
  0x78   : > { %1653 = vmatpush.bf16.msrb.mxu2 %v3010_v19  ;;  %v3045_v19 = vld [vmem:[#allocation8 + $0x90] sm:$0xf]  ;;  %v4151_v27 = vpack.c.bf16 %v554_v25, %v552_v24  ;;  %v3287_v30 = vld [vmem:[#allocation8 + $0x84] sm:$0xf]  ;;  %v2978_v31 = vor.u32 %v3271_v28, %v2975_v29  ;;  %v3272_v36 = vld [vmem:[#allocation8 + $0x4] sm:$0xf0]  ;;  %p3732_p3 = pnand %p3731_p1, %p4041_p4 }
  0x79   : > { %790 = vmatmul.bf16.gmra.mxu0 %v4101_v14  ;;  %1702 = vmatpush.bf16.msrb.mxu3 %v3074_v23  ;;  %v3046_v21 = vor.u32 %v3290_v20, %v3045_v19  ;;  %v553_v23 = vld [vmem:[%s4067_s24 + $0xb0] sm:$0xff]  ;;  %v2974_v38 = vor.u32 %v3272_v36, %v2973_v35  ;;  %v3037_v39 = vld [vmem:[#allocation8 + $0x80] sm:$0xf]  ;;  %v3288_v40 = vld [vmem:[#allocation8 + $0x84] sm:$0xf0] }
  0x7a   : > { %839 = vmatmul.bf16.gmra.mxu1 %v4103_v15  ;;  %1556 = vmatpush.bf16.msrb.mxu0 %v2998_v42  ;;  %v4149_v26 = vpack.c.bf16 %v553_v23, %v551_v22  ;;  %v555_v42 = vld [vmem:[%s4067_s24 + $0xc0] sm:$0xff]  ;;  %v557_v43 = vld [vmem:[%s4067_s24 + $0xd0] sm:$0xff]  ;;  %v556_v45 = vld [vmem:[%s4067_s24 + $0xc8] sm:$0xff]  ;;  %p3733_p9 = pneg %p3732_p3 }
  0x7b   : > { %888 = vmatmul.bf16.gmra.mxu2 %v4101_v14  ;;  %1605 = vmatpush.bf16.msrb.mxu1 %v3062_v46  ;;  %v558_v46 = vld [vmem:[%s4067_s24 + $0xd8] sm:$0xff]  ;;  %v4161_v47 = vpack.c.bf16 %v557_v43, %v555_v42  ;;  %v559_v50 = vld [vmem:[%s4067_s24 + $0xe0] sm:$0xff]  ;;  %v561_v51 = vld [vmem:[%s4067_s24 + $0xf0] sm:$0xff] }
  0x7c   : > { %937 = vmatmul.bf16.gmra.mxu3 %v4103_v15  ;;  %1654 = vmatpush.bf16.msrb.mxu2 %v3002_v37  ;;  %v3042_v37 = vor.u32 %v3287_v30, %v3039_v34  ;;  %v4163_v48 = vpack.c.bf16 %v558_v46, %v556_v45  ;;  %v560_v54 = vld [vmem:[%s4067_s24 + $0xe8] sm:$0xff]  ;;  %v562_v55 = vld [vmem:[%s4067_s24 + $0xf8] sm:$0xff]  ;;  %v4173_v56 = vpack.c.bf16 %v561_v51, %v559_v50  ;;  %v611_v58 = vld [vmem:[#allocation7] sm:$0x3]  ;;  %s5189_s24 = sld [smem:[#allocation43_spill]] }
  0x7d   : > { %1703 = vmatpush.bf16.msrb.mxu3 %v3066_v41  ;;  %v3038_v41 = vor.u32 %v3288_v40, %v3037_v39  ;;  %v3317_v59 = vld [vmem:[#allocation11 + $0x74] sm:$0xf]  ;;  %v3159_v60 = vld [vmem:[#allocation11 + $0x78] sm:$0xf0]  ;;  %v4187_v5 = vperm.slane %v611_v58, 1 }
  0x7e   : > { %1557 = vmatpush.bf16.msrb.mxu0 %v2990_v62  ;;  %v4181_v62 = vperm.slane %v611_v58, 0  ;;  %v3333_v2 = vld [vmem:[#allocation11 + $0xf4] sm:$0xf]  ;;  %v3223_v3 = vld [vmem:[#allocation11 + $0xf8] sm:$0xf0] }
  0x7f   : > { %1606 = vmatpush.bf16.msrb.mxu1 %v3054_v1  ;;  %v3226_v4 = vor.u32 %v3333_v2, %v3223_v3  ;;  %v3157_v8 = vld [vmem:[#allocation11 + $0x70] sm:$0xf]  ;;  %v3318_v9 = vld [vmem:[#allocation11 + $0x74] sm:$0xf0]  ;;  %v3315_v24 = vld [vmem:[#allocation11 + $0x64] sm:$0xf] }
  0x80   : > { %1655 = vmatpush.bf16.msrb.mxu2 %v2994_v57  ;;  %v4175_v57 = vpack.c.bf16 %v562_v55, %v560_v54  ;;  %v3221_v10 = vld [vmem:[#allocation11 + $0xf0] sm:$0xf]  ;;  %v3158_v12 = vor.u32 %v3318_v9, %v3157_v8  ;;  %v3334_v13 = vld [vmem:[#allocation11 + $0xf4] sm:$0xf0]  ;;  %v3151_v25 = vld [vmem:[#allocation11 + $0x68] sm:$0xf0] }
  0x81   : > { %1704 = vmatpush.bf16.msrb.mxu3 %v3058_v61  ;;  %v3162_v61 = vor.u32 %v3317_v59, %v3159_v60  ;;  %v3154_v30 = vor.u32 %v3315_v24, %v3151_v25  ;;  %v3331_v42 = vld [vmem:[#allocation11 + $0xe4] sm:$0xf]  ;;  %v3215_v43 = vld [vmem:[#allocation11 + $0xe8] sm:$0xf0]  ;;  %v3149_v51 = vld [vmem:[#allocation11 + $0x60] sm:$0xf] }
  0x82   : > { %1558 = vmatpush.bf16.msrb.mxu0 %v2982_v18  ;;  %v3218_v45 = vor.u32 %v3331_v42, %v3215_v43  ;;  %v3316_v54 = vld [vmem:[#allocation11 + $0x64] sm:$0xf0]  ;;  %v3213_v55 = vld [vmem:[#allocation11 + $0xe0] sm:$0xf]  ;;  %s2573_s2 = scalar_lea.hbm %s5189_s24, %s4978_s15  ;;  %s5028_s15 = scalar_lea.sflag [#allocation15], %s2553_s12 }
  0x83   : > { %1607 = vmatpush.bf16.msrb.mxu1 %v3046_v21  ;;  %v3150_v60 = vor.u32 %v3316_v54, %v3149_v51  ;;  %s5022_s11 = sshll.u32 %s2573_s2, 4  ;;  %s3734_s2 = scalar_lea.hbm %s5123_s10, 256  ;;  %s2577_s11 = int_to_ptr.hbm [resolvable:$true] %s5022_s11 }
  0x84   : > { %1656 = vmatpush.bf16.msrb.mxu2 %v2986_v11  ;;  %p3736_p11 = scmp.lt.s32.totalorder %s3734_s2, %s3730_s20 }
  0x85   : > { %1705 = vmatpush.bf16.msrb.mxu3 %v3050_v17  ;;  %v3222_v17 = vor.u32 %v3334_v13, %v3221_v10  ;;  %v3313_v13 = vld [vmem:[#allocation11 + $0x54] sm:$0xf] }
  0x86   : > { %1559 = vmatpush.bf16.msrb.mxu0 %v2974_v38  ;;  %p3737_p12 = por %p3736_p11, %p3735_p10 }
  0x87   : > { %1608 = vmatpush.bf16.msrb.mxu1 %v3038_v41 }
  0x88   : > { %1657 = vmatpush.bf16.msrb.mxu2 %v2978_v31  ;;  %p3738_p13 = pnand %p3737_p12, %p3733_p9 }
  0x89   : > { %795 = vmatmul.bf16.gmra.mxu0 %v4113_v32  ;;  %1706 = vmatpush.bf16.msrb.mxu3 %v3042_v37 }
  0x8a   : > { %844 = vmatmul.bf16.gmra.mxu1 %v4115_v33  ;;  %2320 = vmatpush.bf16.msra.mxu0 %v3158_v12 }
  0x8b   : > { %893 = vmatmul.bf16.gmra.mxu2 %v4113_v32  ;;  %2369 = vmatpush.bf16.msra.mxu1 %v3222_v17 }
  0x8c   : > { %942 = vmatmul.bf16.gmra.mxu3 %v4115_v33  ;;  %2418 = vmatpush.bf16.msra.mxu2 %v3162_v61  ;;  %v3332_v61 = vld [vmem:[#allocation11 + $0xe4] sm:$0xf0] }
  0x8d   : > { %2467 = vmatpush.bf16.msra.mxu3 %v3226_v4 }
  0x8e   : > { %2321 = vmatpush.bf16.msra.mxu0 %v3150_v60 }
  0x90   : > { %2419 = vmatpush.bf16.msra.mxu2 %v3154_v30  ;;  %v3329_v30 = vld [vmem:[#allocation11 + $0xd4] sm:$0xf] }
  0x91   : > { %2468 = vmatpush.bf16.msra.mxu3 %v3218_v45 }
  0x99   : > { %800 = vmatmul.bf16.gmra.mxu0 %v4125_v52 }
  0x9a   : > { %849 = vmatmul.bf16.gmra.mxu1 %v4127_v53 }
  0x9b   : > { %898 = vmatmul.bf16.gmra.mxu2 %v4125_v52 }
  0x9c   : > { %947 = vmatmul.bf16.gmra.mxu3 %v4127_v53 }
  0xa9   : > { %805 = vmatmul.bf16.gmra.mxu0 %v4137_v6 }
  0xaa   : > { %854 = vmatmul.bf16.gmra.mxu1 %v4139_v7 }
  0xab   : > { %903 = vmatmul.bf16.gmra.mxu2 %v4137_v6 }
  0xac   : > { %952 = vmatmul.bf16.gmra.mxu3 %v4139_v7 }
  0xb9   : > { %810 = vmatmul.bf16.gmra.mxu0 %v4149_v26 }
  0xba   : > { %859 = vmatmul.bf16.gmra.mxu1 %v4151_v27 }
  0xbb   : > { %908 = vmatmul.bf16.gmra.mxu2 %v4149_v26 }
  0xbc   : > { %957 = vmatmul.bf16.gmra.mxu3 %v4151_v27 }
  0xc9   : > { %815 = vmatmul.bf16.gmra.mxu0 %v4161_v47 }
  0xca   : > { %864 = vmatmul.bf16.gmra.mxu1 %v4163_v48 }
  0xcb   : > { %913 = vmatmul.bf16.gmra.mxu2 %v4161_v47 }
  0xcc   : > { %962 = vmatmul.bf16.gmra.mxu3 %v4163_v48 }
  0xd9   : > { %820 = vmatmul.bf16.gmra.mxu0 %v4173_v56 }
  0xda   : > { %869 = vmatmul.bf16.gmra.mxu1 %v4175_v57 }
  0xdb   : > { %918 = vmatmul.bf16.gmra.mxu2 %v4173_v56 }
  0xdc   : > { %967 = vmatmul.bf16.gmra.mxu3 %v4175_v57 }
  0xe6   : > { %v786_v63 = vpop.f32.mrf.mxu0 }
  0xe7   : > { %v835_v0 = vpop.f32.mrf.mxu1  ;;  %v787_v1 = vadd.f32 %v786_v63, %v4181_v62 }
  0xe9   : > { %1560 = vmatmul.bf16.vlgmr.msrb.gmra.mxu0 %v4089_v44  ;;  %v4190_v11 = vadd.f32 %v835_v0, %v787_v1  ;;  %v3214_v0 = vor.u32 %v3332_v61, %v3213_v55 }
  0xea   : > { %1609 = vmatmul.bf16.vlgmr.msrb.gmra.mxu1 %v4091_v49 }
  0xeb   : > { %1658 = vmatmul.bf16.vlgmr.msrb.gmra.mxu2 %v4089_v44  ;;  %v973_v23 = vmul.f32 %v4190_v11, %v4190_v11  ;;  %2370 = vmatpush.bf16.msra.mxu1 %v3214_v0 }
  0xec   : > { %1707 = vmatmul.bf16.vlgmr.msrb.gmra.mxu3 %v4091_v49 }
  0xee   : > { %v884_v16 = vpop.f32.mrf.mxu2  ;;  %v788_v20 = vpop.f32.mrf.mxu0 }
  0xef   : > { %v885_v18 = vadd.f32 %v884_v16, %v4187_v5  ;;  %v933_v19 = vpop.f32.mrf.mxu3  ;;  %v837_v21 = vpop.f32.mrf.mxu1  ;;  %v789_v28 = vadd.f32 %v788_v20, %v4181_v62  ;;  %v3143_v16 = vld [vmem:[#allocation11 + $0x58] sm:$0xf0] }
  0xf0   : > { %v3146_v17 = vor.u32 %v3313_v13, %v3143_v16 }
  0xf1   : > { %v4193_v22 = vadd.f32 %v933_v19, %v885_v18  ;;  %v4200_v35 = vadd.f32 %v837_v21, %v789_v28 }
  0xf2   : > { %2420 = vmatpush.bf16.msra.mxu2 %v3146_v17 }
  0xf3   : > { %v974_v29 = vmul.f32 %v4193_v22, %v4193_v22  ;;  %v975_v46 = vmul.f32 %v4200_v35, %v4200_v35 }
  0xf5   : > { %v1005_v31 = vadd.f32 %v974_v29, %v973_v23 }
  0xf6   : > { %v886_v34 = vpop.f32.mrf.mxu2  ;;  %v791_v38 = vpop.f32.mrf.mxu0 }
  0xf7   : > { %v887_v36 = vadd.f32 %v886_v34, %v4187_v5  ;;  %v935_v37 = vpop.f32.mrf.mxu3  ;;  %1006 = vadd.xlane.f32.xlu0 %v1005_v31  ;;  %v840_v39 = vpop.f32.mrf.mxu1  ;;  %v792_v41 = vadd.f32 %v791_v38, %v4181_v62  ;;  %v3207_v31 = vld [vmem:[#allocation11 + $0xd8] sm:$0xf0]  ;;  %v3141_v38 = vld [vmem:[#allocation11 + $0x50] sm:$0xf] }
  0xf8   : > { %v3210_v34 = vor.u32 %v3329_v30, %v3207_v31  ;;  %v3133_v31 = vld [vmem:[#allocation11 + $0x40] sm:$0xf] }
  0xf9   : > { %v4203_v40 = vadd.f32 %v935_v37, %v887_v36  ;;  %1565 = vmatmul.bf16.gmra.mxu0 %v4101_v14  ;;  %v4214_v58 = vadd.f32 %v840_v39, %v792_v41  ;;  %v3314_v39 = vld [vmem:[#allocation11 + $0x54] sm:$0xf0]  ;;  %v3205_v41 = vld [vmem:[#allocation11 + $0xd0] sm:$0xf] }
  0xfa   : > { %1614 = vmatmul.bf16.gmra.mxu1 %v4103_v15  ;;  %2469 = vmatpush.bf16.msra.mxu3 %v3210_v34  ;;  %v3142_v45 = vor.u32 %v3314_v39, %v3141_v38  ;;  %v3312_v34 = vld [vmem:[#allocation11 + $0x44] sm:$0xf0] }
  0xfb   : > { %1663 = vmatmul.bf16.gmra.mxu2 %v4101_v14  ;;  %v976_v50 = vmul.f32 %v4203_v40, %v4203_v40  ;;  %v977_v9 = vmul.f32 %v4214_v58, %v4214_v58  ;;  %v3134_v39 = vor.u32 %v3312_v34, %v3133_v31  ;;  %v3125_v31 = vld [vmem:[#allocation11 + $0x30] sm:$0xf]  ;;  %v3310_v34 = vld [vmem:[#allocation11 + $0x34] sm:$0xf0] }
  0xfc   : > { %1712 = vmatmul.bf16.gmra.mxu3 %v4103_v15  ;;  %2322 = vmatpush.bf16.msra.mxu0 %v3142_v45 }
  0xfd   : > { %v1008_v59 = vadd.f32 %v976_v50, %v975_v46  ;;  %v3330_v46 = vld [vmem:[#allocation11 + $0xd4] sm:$0xf0] }
  0xfe   : > { %v889_v63 = vpop.f32.mrf.mxu2  ;;  %v793_v3 = vpop.f32.mrf.mxu0  ;;  %v3206_v51 = vor.u32 %v3330_v46, %v3205_v41  ;;  %v3328_v41 = vld [vmem:[#allocation11 + $0xc4] sm:$0xf0] }
  0xff   : > { %v890_v1 = vadd.f32 %v889_v63, %v4187_v5  ;;  %v938_v2 = vpop.f32.mrf.mxu3  ;;  %1009 = vadd.xlane.f32.xlu0 %v1008_v59  ;;  %v842_v4 = vpop.f32.mrf.mxu1  ;;  %v794_v10 = vadd.f32 %v793_v3, %v4181_v62  ;;  %v3135_v3 = vld [vmem:[#allocation11 + $0x48] sm:$0xf0] }
 0x100   : > { %2371 = vmatpush.bf16.msra.mxu1 %v3206_v51  ;;  %2323 = vmatpush.bf16.msra.mxu0 %v3134_v39 }
 0x101   : > { %v4217_v8 = vadd.f32 %v938_v2, %v890_v1  ;;  %v4224_v20 = vadd.f32 %v842_v4, %v794_v10  ;;  %v3311_v2 = vld [vmem:[#allocation11 + $0x44] sm:$0xf] }
 0x102   : > { %v3138_v4 = vor.u32 %v3311_v2, %v3135_v3 }
 0x103   : > { %v978_v12 = vmul.f32 %v4217_v8, %v4217_v8  ;;  %v979_v36 = vmul.f32 %v4224_v20, %v4224_v20 }
 0x104   : > { %2421 = vmatpush.bf16.msra.mxu2 %v3138_v4 }
 0x105   : > { %v1011_v18 = vadd.f32 %v978_v12, %v977_v9 }
 0x106   : > { %v891_v19 = vpop.f32.mrf.mxu2  ;;  %v796_v24 = vpop.f32.mrf.mxu0 }
 0x107   : > { %v892_v21 = vadd.f32 %v891_v19, %v4187_v5  ;;  %v940_v23 = vpop.f32.mrf.mxu3  ;;  %1012 = vadd.xlane.f32.xlu1 %v1011_v18  ;;  %v845_v25 = vpop.f32.mrf.mxu1  ;;  %v797_v29 = vadd.f32 %v796_v24, %v4181_v62  ;;  %v3199_v24 = vld [vmem:[#allocation11 + $0xc8] sm:$0xf0] }
 0x109   : > { %v4227_v28 = vadd.f32 %v940_v23, %v892_v21  ;;  %1570 = vmatmul.bf16.gmra.mxu0 %v4113_v32  ;;  %v4238_v42 = vadd.f32 %v845_v25, %v797_v29  ;;  %v3327_v23 = vld [vmem:[#allocation11 + $0xc4] sm:$0xf] }
 0x10a   : > { %1619 = vmatmul.bf16.gmra.mxu1 %v4115_v33  ;;  %v3202_v25 = vor.u32 %v3327_v23, %v3199_v24  ;;  %v3325_v23 = vld [vmem:[#allocation11 + $0xb4] sm:$0xf]  ;;  %v3191_v24 = vld [vmem:[#allocation11 + $0xb8] sm:$0xf0] }
 0x10b   : > { %1668 = vmatmul.bf16.gmra.mxu2 %v4113_v32  ;;  %v980_v37 = vmul.f32 %v4227_v28, %v4227_v28  ;;  %v981_v63 = vmul.f32 %v4238_v42, %v4238_v42 }
 0x10c   : > { %1717 = vmatmul.bf16.gmra.mxu3 %v4115_v33 }
 0x10d   : > { %v1014_v43 = vadd.f32 %v980_v37, %v979_v36  ;;  %v3197_v36 = vld [vmem:[#allocation11 + $0xc0] sm:$0xf]  ;;  %2470 = vmatpush.bf16.msra.mxu3 %v3202_v25  ;;  %v3194_v25 = vor.u32 %v3325_v23, %v3191_v24 }
 0x10e   : > { %v894_v50 = vpop.f32.mrf.mxu2  ;;  %v798_v59 = vpop.f32.mrf.mxu0  ;;  %v3198_v45 = vor.u32 %v3328_v41, %v3197_v36  ;;  %v3189_v36 = vld [vmem:[#allocation11 + $0xb0] sm:$0xf]  ;;  %v3126_v41 = vor.u32 %v3310_v34, %v3125_v31  ;;  %v3183_v31 = vld [vmem:[#allocation11 + $0xa8] sm:$0xf0] }
 0x10f   : > { %v895_v54 = vadd.f32 %v894_v50, %v4187_v5  ;;  %v943_v55 = vpop.f32.mrf.mxu3  ;;  %1015 = vadd.xlane.f32.xlu1 %v1014_v43  ;;  %v847_v60 = vpop.f32.mrf.mxu1  ;;  %v799_v0 = vadd.f32 %v798_v59, %v4181_v62 }
 0x110   : > { %2372 = vmatpush.bf16.msra.mxu1 %v3198_v45  ;;  %2324 = vmatpush.bf16.msra.mxu0 %v3126_v41  ;;  %v3117_v41 = vld [vmem:[#allocation11 + $0x20] sm:$0xf] }
 0x111   : > { %v4241_v61 = vadd.f32 %v943_v55, %v895_v54  ;;  %v4248_v12 = vadd.f32 %v847_v60, %v799_v0  ;;  %v3309_v0 = vld [vmem:[#allocation11 + $0x34] sm:$0xf]  ;;  %2471 = vmatpush.bf16.msra.mxu3 %v3194_v25 }
 0x113   : > { %v982_v1 = vmul.f32 %v4241_v61, %v4241_v61  ;;  %v983_v29 = vmul.f32 %v4248_v12, %v4248_v12 }
 0x115   : > { %v1017_v9 = vadd.f32 %v982_v1, %v981_v63  ;;  %v3127_v1 = vld [vmem:[#allocation11 + $0x38] sm:$0xf0] }
 0x116   : > { %v896_v10 = vpop.f32.mrf.mxu2  ;;  %v801_v17 = vpop.f32.mrf.mxu0  ;;  %v3130_v2 = vor.u32 %v3309_v0, %v3127_v1 }
 0x117   : > { %v897_v13 = vadd.f32 %v896_v10, %v4187_v5  ;;  %v945_v16 = vpop.f32.mrf.mxu3  ;;  %1018 = vadd.xlane.f32.xlu2 %v1017_v9  ;;  %v850_v18 = vpop.f32.mrf.mxu1  ;;  %v802_v21 = vadd.f32 %v801_v17, %v4181_v62 }
 0x118   : > { %2422 = vmatpush.bf16.msra.mxu2 %v3130_v2  ;;  %v3307_v2 = vld [vmem:[#allocation11 + $0x24] sm:$0xf] }
 0x119   : > { %v4251_v19 = vadd.f32 %v945_v16, %v897_v13  ;;  %1575 = vmatmul.bf16.gmra.mxu0 %v4125_v52  ;;  %v4262_v37 = vadd.f32 %v850_v18, %v802_v21 }
 0x11a   : > { %1624 = vmatmul.bf16.gmra.mxu1 %v4127_v53 }
 0x11b   : > { %1673 = vmatmul.bf16.gmra.mxu2 %v4125_v52  ;;  %v984_v30 = vmul.f32 %v4251_v19, %v4251_v19  ;;  %v985_v55 = vmul.f32 %v4262_v37, %v4262_v37 }
 0x11c   : > { %1722 = vmatmul.bf16.gmra.mxu3 %v4127_v53 }
 0x11d   : > { %v1020_v38 = vadd.f32 %v984_v30, %v983_v29 }
 0x11e   : > { %v899_v43 = vpop.f32.mrf.mxu2  ;;  %v803_v51 = vpop.f32.mrf.mxu0 }
 0x11f   : > { %v900_v46 = vadd.f32 %v899_v43, %v4187_v5  ;;  %v948_v50 = vpop.f32.mrf.mxu3  ;;  %1021 = vadd.xlane.f32.xlu2 %v1020_v38  ;;  %v852_v54 = vpop.f32.mrf.mxu1  ;;  %v804_v63 = vadd.f32 %v803_v51, %v4181_v62  ;;  %v3326_v43 = vld [vmem:[#allocation11 + $0xb4] sm:$0xf0] }
 0x121   : > { %v4267_v59 = vadd.f32 %v948_v50, %v900_v46  ;;  %v4272_v9 = vadd.f32 %v852_v54, %v804_v63  ;;  %v3190_v46 = vor.u32 %v3326_v43, %v3189_v36  ;;  %v3308_v43 = vld [vmem:[#allocation11 + $0x24] sm:$0xf0] }
 0x123   : > { %v986_v60 = vmul.f32 %v4267_v59, %v4267_v59  ;;  %v987_v29 = vmul.f32 %v4272_v9, %v4272_v9  ;;  %2373 = vmatpush.bf16.msra.mxu1 %v3190_v46 }
 0x125   : > { %v1023_v3 = vadd.f32 %v986_v60, %v985_v55 }
 0x126   : > { %v901_v4 = vpop.f32.mrf.mxu2  ;;  %v806_v16 = vpop.f32.mrf.mxu0 }
 0x127   : > { %v902_v10 = vadd.f32 %v901_v4, %v4187_v5  ;;  %v950_v13 = vpop.f32.mrf.mxu3  ;;  %1024 = vadd.xlane.f32.xlu0 %v1023_v3  ;;  %v855_v17 = vpop.f32.mrf.mxu1  ;;  %v807_v21 = vadd.f32 %v806_v16, %v4181_v62  ;;  %v3119_v3 = vld [vmem:[#allocation11 + $0x28] sm:$0xf0] }
 0x128   : > { %v3122_v4 = vor.u32 %v3307_v2, %v3119_v3 }
 0x129   : > { %v4275_v18 = vadd.f32 %v950_v13, %v902_v10  ;;  %1580 = vmatmul.bf16.gmra.mxu0 %v4137_v6  ;;  %v4286_v38 = vadd.f32 %v855_v17, %v807_v21 }
 0x12a   : > { %1629 = vmatmul.bf16.gmra.mxu1 %v4139_v7  ;;  %2423 = vmatpush.bf16.msra.mxu2 %v3122_v4 }
 0x12b   : > { %1678 = vmatmul.bf16.gmra.mxu2 %v4137_v6  ;;  %v988_v30 = vmul.f32 %v4275_v18, %v4275_v18  ;;  %v989_v60 = vmul.f32 %v4286_v38, %v4286_v38 }
 0x12c   : > { %1727 = vmatmul.bf16.gmra.mxu3 %v4139_v7 }
 0x12d   : > { %v1026_v39 = vadd.f32 %v988_v30, %v987_v29  ;;  %v3323_v30 = vld [vmem:[#allocation11 + $0xa4] sm:$0xf] }
 0x12e   : > { %v904_v45 = vpop.f32.mrf.mxu2  ;;  %v808_v54 = vpop.f32.mrf.mxu0  ;;  %v3186_v34 = vor.u32 %v3323_v30, %v3183_v31 }
 0x12f   : > { %v905_v50 = vadd.f32 %v904_v45, %v4187_v5  ;;  %v953_v51 = vpop.f32.mrf.mxu3  ;;  %1027 = vadd.xlane.f32.xlu1 %v1026_v39  ;;  %v857_v55 = vpop.f32.mrf.mxu1  ;;  %v809_v1 = vadd.f32 %v808_v54, %v4181_v62  ;;  %v3181_v45 = vld [vmem:[#allocation11 + $0xa0] sm:$0xf]  ;;  %v3324_v54 = vld [vmem:[#allocation11 + $0xa4] sm:$0xf0] }
 0x130   : > { %2472 = vmatpush.bf16.msra.mxu3 %v3186_v34 }
 0x131   : > { %v4291_v63 = vadd.f32 %v953_v51, %v905_v50  ;;  %v4296_v16 = vadd.f32 %v857_v55, %v809_v1  ;;  %v3118_v51 = vor.u32 %v3308_v43, %v3117_v41 }
 0x133   : > { %v990_v0 = vmul.f32 %v4291_v63, %v4291_v63  ;;  %v991_v36 = vmul.f32 %v4296_v16, %v4296_v16  ;;  %2325 = vmatpush.bf16.msra.mxu0 %v3118_v51  ;;  %v3175_v51 = vld [vmem:[#allocation11 + $0x98] sm:$0xf0] }
 0x135   : > { %v1029_v10 = vadd.f32 %v990_v0, %v989_v60  ;;  %v3182_v60 = vor.u32 %v3324_v54, %v3181_v45 }
 0x136   : > { %v906_v13 = vpop.f32.mrf.mxu2  ;;  %v811_v23 = vpop.f32.mrf.mxu0 }
 0x137   : > { %v907_v17 = vadd.f32 %v906_v13, %v4187_v5  ;;  %v955_v21 = vpop.f32.mrf.mxu3  ;;  %1030 = vadd.xlane.f32.xlu2 %v1029_v10  ;;  %v860_v24 = vpop.f32.mrf.mxu1  ;;  %v812_v29 = vadd.f32 %v811_v23, %v4181_v62  ;;  %2374 = vmatpush.bf16.msra.mxu1 %v3182_v60  ;;  %v3111_v23 = vld [vmem:[#allocation11 + $0x18] sm:$0xf0] }
 0x139   : > { %v4299_v25 = vadd.f32 %v955_v21, %v907_v17  ;;  %1585 = vmatmul.bf16.gmra.mxu0 %v4149_v26  ;;  %v4310_v46 = vadd.f32 %v860_v24, %v812_v29  ;;  %v3305_v21 = vld [vmem:[#allocation11 + $0x14] sm:$0xf] }
 0x13a   : > { %1634 = vmatmul.bf16.gmra.mxu1 %v4151_v27  ;;  %v3114_v24 = vor.u32 %v3305_v21, %v3111_v23 }
 0x13b   : > { %1683 = vmatmul.bf16.gmra.mxu2 %v4149_v26  ;;  %v992_v39 = vmul.f32 %v4299_v25, %v4299_v25  ;;  %v993_v4 = vmul.f32 %v4310_v46, %v4310_v46 }
 0x13c   : > { %1732 = vmatmul.bf16.gmra.mxu3 %v4151_v27  ;;  %2424 = vmatpush.bf16.msra.mxu2 %v3114_v24 }
 0x13d   : > { %v1032_v50 = vadd.f32 %v992_v39, %v991_v36 }
 0x13e   : > { %v909_v55 = vpop.f32.mrf.mxu2  ;;  %v813_v2 = vpop.f32.mrf.mxu0 }
 0x13f   : > { %v910_v0 = vadd.f32 %v909_v55, %v4187_v5  ;;  %v958_v1 = vpop.f32.mrf.mxu3  ;;  %1033 = vadd.xlane.f32.xlu1 %v1032_v50  ;;  %v862_v3 = vpop.f32.mrf.mxu1  ;;  %v814_v17 = vadd.f32 %v813_v2, %v4181_v62  ;;  %v3321_v50 = vld [vmem:[#allocation11 + $0x94] sm:$0xf] }
 0x140   : > { %v3178_v54 = vor.u32 %v3321_v50, %v3175_v51 }
 0x141   : > { %v4315_v10 = vadd.f32 %v958_v1, %v910_v0  ;;  %v4320_v31 = vadd.f32 %v862_v3, %v814_v17  ;;  %v3879_v17 = vmov 256.0  }
 0x142   : > { %2473 = vmatpush.bf16.msra.mxu3 %v3178_v54  ;;  %3468 = vrcp.f32 %v3879_v17  ;;  %v3109_v17 = vld [vmem:[#allocation11 + $0x10] sm:$0xf] }
 0x143   : > { %v994_v13 = vmul.f32 %v4315_v10, %v4315_v10  ;;  %v995_v55 = vmul.f32 %v4320_v31, %v4320_v31 }
 0x145   : > { %v1035_v29 = vadd.f32 %v994_v13, %v993_v4 }
 0x146   : > { %v911_v30 = vpop.f32.mrf.mxu2  ;;  %v816_v39 = vpop.f32.mrf.mxu0 }
 0x147   : > { %v912_v34 = vadd.f32 %v911_v30, %v4187_v5  ;;  %v960_v36 = vpop.f32.mrf.mxu3  ;;  %1036 = vadd.xlane.f32.xlu2 %v1035_v29  ;;  %v865_v41 = vpop.f32.mrf.mxu1  ;;  %v817_v45 = vadd.f32 %v816_v39, %v4181_v62 }
 0x149   : > { %v4323_v43 = vadd.f32 %v960_v36, %v912_v34  ;;  %1590 = vmatmul.bf16.gmra.mxu0 %v4161_v47  ;;  %v4334_v0 = vadd.f32 %v865_v41, %v817_v45  ;;  %v3469_v36 = vpop.eup %3468 }
 0x14a   : > { %1639 = vmatmul.bf16.gmra.mxu1 %v4163_v48  ;;  %vm1058_vm0 = vweird.f32 %v3469_v36 }
 0x14b   : > { %1688 = vmatmul.bf16.gmra.mxu2 %v4161_v47  ;;  %v996_v60 = vmul.f32 %v4323_v43, %v4323_v43  ;;  %5164 = vst [vmem:[#allocation24_spill] sm:$0xff] %v4334_v0  ;;  %v997_v24 = vmul.f32 %v4334_v0, %v4334_v0  ;;  %v3320_v0 = vld [vmem:[#allocation11 + $0x84] sm:$0xf0] }
 0x14c   : > { %1737 = vmatmul.bf16.gmra.mxu3 %v4163_v48 }
 0x14d   : > { %v1038_v1 = vadd.f32 %v996_v60, %v995_v55  ;;  %v1054_v60 = vmul.f32 256.0, %v3469_v36 }
 0x14e   : > { %v914_v2 = vpop.f32.mrf.mxu2  ;;  %v818_v13 = vpop.f32.mrf.mxu0 }
 0x14f   : > { %v915_v3 = vadd.f32 %v914_v2, %v4187_v5  ;;  %v963_v4 = vpop.f32.mrf.mxu3  ;;  %1039 = vadd.xlane.f32.xlu0 %v1038_v1  ;;  %v819_v21 = vadd.f32 %v818_v13, %v4181_v62  ;;  %v867_v23 = vpop.f32.mrf.mxu1  ;;  %v3303_v1 = vld [vmem:[#allocation11 + $0x4] sm:$0xf]  ;;  %v3103_v2 = vld [vmem:[#allocation11 + $0x8] sm:$0xf0] }
 0x151   : > { %v4340_v29 = vadd.f32 %v963_v4, %v915_v3  ;;  %v4342_v30 = vadd.f32 %v867_v23, %v819_v21  ;;  %v3106_v4 = vor.u32 %v3303_v1, %v3103_v2  ;;  %v3306_v21 = vld [vmem:[#allocation11 + $0x14] sm:$0xf0]  ;;  %v3319_v23 = vld [vmem:[#allocation11 + $0x84] sm:$0xf]  ;;  %v3304_v1 = vld [vmem:[#allocation11 + $0x4] sm:$0xf0] }
 0x153   : > { %5165 = vst [vmem:[#allocation25_spill] sm:$0xff] %v4340_v29  ;;  %v998_v34 = vmul.f32 %v4340_v29, %v4340_v29  ;;  %2425 = vmatpush.bf16.msra.mxu2 %v3106_v4  ;;  %v3165_v29 = vld [vmem:[#allocation11 + $0x80] sm:$0xf] }
 0x154   : > { %5166 = vst [vmem:[#allocation26_spill] sm:$0xff] %v4342_v30 }
 0x155   : > { %v1041_v39 = vadd.f32 %v998_v34, %v997_v24  ;;  %v3110_v24 = vor.u32 %v3306_v21, %v3109_v17  ;;  %v3167_v34 = vld [vmem:[#allocation11 + $0x88] sm:$0xf0] }
 0x156   : > { %v916_v41 = vpop.f32.mrf.mxu2  ;;  %v821_v51 = vpop.f32.mrf.mxu0 }
 0x157   : > { %v917_v45 = vadd.f32 %v916_v41, %v4187_v5  ;;  %v965_v50 = vpop.f32.mrf.mxu3  ;;  %1042 = vadd.xlane.f32.xlu1 %v1041_v39  ;;  %v822_v54 = vadd.f32 %v821_v51, %v4181_v62  ;;  %v870_v55 = vpop.f32.mrf.mxu1  ;;  %v1055_v39 = vsub.f32 1.0, %v1054_v60  ;;  %v3173_v41 = vld [vmem:[#allocation11 + $0x90] sm:$0xf]  ;;  %2326 = vmatpush.bf16.msra.mxu0 %v3110_v24 }
 0x159   : > { %v4348_v3 = vadd.f32 %v965_v50, %v917_v45  ;;  %v4350_v13 = vadd.f32 %v870_v55, %v822_v54  ;;  %1595 = vmatmul.bf16.gmra.mxu0 %v4173_v56  ;;  %v3322_v45 = vld [vmem:[#allocation11 + $0x94] sm:$0xf0]  ;;  %v3170_v50 = vor.u32 %v3319_v23, %v3167_v34  ;;  %v3101_v55 = vld [vmem:[#allocation11] sm:$0xf]  ;;  %v1056_v60 = vmul.f32 %v3469_v36, %v1055_v39  ;;  %v1386_v34 = vld [vmem:[%s5118_s5] sm:$0x3] }
 0x15a   : > { %1644 = vmatmul.bf16.gmra.mxu1 %v4175_v57  ;;  %v3174_v51 = vor.u32 %v3322_v45, %v3173_v41  ;;  %v3102_v17 = vor.u32 %v3304_v1, %v3101_v55  ;;  %v3166_v23 = vor.u32 %v3320_v0, %v3165_v29  ;;  %v4365_v45 = vperm.slane %v1386_v34, 0 }
 0x15b   : > { %5167 = vst [vmem:[#allocation27_spill] sm:$0xff] %v4348_v3  ;;  %1693 = vmatmul.bf16.gmra.mxu2 %v4173_v56  ;;  %2474 = vmatpush.bf16.msra.mxu3 %v3170_v50  ;;  %v1057_v41 = vadd.f32 %v3469_v36, %v1056_v60  ;;  %v4375_v55 = vperm.slane %v1386_v34, 1 }
 0x15c   : > { %5168 = vst [vmem:[#allocation28_spill] sm:$0xff] %v4350_v13  ;;  %1742 = vmatmul.bf16.gmra.mxu3 %v4175_v57  ;;  %2375 = vmatpush.bf16.msra.mxu1 %v3174_v51 }
 0x15d   : > { %2327 = vmatpush.bf16.msra.mxu0 %v3102_v17  ;;  %v4368_v51 = vsel %vm1058_vm0, %v3469_v36, %v1057_v41 }
 0x15e   : > { %v919_v54 = vpop.f32.mrf.mxu2  ;;  %v823_v30 = vpop.f32.mrf.mxu0 }
 0x15f   : > { %v920_v2 = vadd.f32 %v919_v54, %v4187_v5  ;;  %v968_v13 = vpop.f32.mrf.mxu3  ;;  %v824_v21 = vadd.f32 %v823_v30, %v4181_v62  ;;  %v872_v3 = vpop.f32.mrf.mxu1 }
 0x160   : > { %2376 = vmatpush.bf16.msra.mxu1 %v3166_v23 }
 0x161   : > { %v4358_v4 = vadd.f32 %v968_v13, %v920_v2  ;;  %v4360_v24 = vadd.f32 %v872_v3, %v824_v21 }
 0x163   : > { %5169 = vst [vmem:[#allocation29_spill] sm:$0xff] %v4358_v4 }
 0x166   : > { %v921_v62 = vpop.f32.mrf.mxu2  ;;  %v1561_v50 = vpop.f32.mrf.mxu0 }
 0x167   : > { %v922_v30 = vadd.f32 %v921_v62, %v4187_v5  ;;  %v970_v39 = vpop.f32.mrf.mxu3  ;;  %v1610_v13 = vpop.f32.mrf.mxu1  ;;  %v1562_v29 = vadd.f32 %v1561_v50, %v4365_v45 }
 0x169   : > { %v4370_v0 = vadd.f32 %v970_v39, %v922_v30  ;;  %2328 = vmatmul.bf16.vlgmr.msra.gmra.mxu0 %v4089_v44  ;;  %v4380_v5 = vadd.f32 %v1610_v13, %v1562_v29 }
 0x16a   : > { %v1007_v3 = vpop.xlane.xlu0 %1006  ;;  %2377 = vmatmul.bf16.vlgmr.msra.gmra.mxu1 %v4091_v49 }
 0x16b   : > { %v1060_v54 = vmul.f32 %v4368_v51, %v1007_v3  ;;  %2426 = vmatmul.bf16.vlgmr.msra.gmra.mxu2 %v4089_v44  ;;  %5170 = vst [vmem:[#allocation30_spill] sm:$0xff] %v4380_v5  ;;  %v1748_v23 = vmul.f32 %v4380_v5, %v4380_v5 }
 0x16c   : > { %2475 = vmatmul.bf16.vlgmr.msra.gmra.mxu3 %v4091_v49 }
 0x16d   : > { %v1076_v36 = vadd.f32 1e-06, %v1060_v54 }
 0x16e   : > { %v1659_v1 = vpop.f32.mrf.mxu2  ;;  %v1563_v21 = vpop.f32.mrf.mxu0 }
 0x16f   : > { %3470 = vrsqrt.f32 %v1076_v36  ;;  %v1660_v2 = vadd.f32 %v1659_v1, %v4375_v55  ;;  %v1708_v17 = vpop.f32.mrf.mxu3  ;;  %v1612_v60 = vpop.f32.mrf.mxu1  ;;  %v1564_v49 = vadd.f32 %v1563_v21, %v4365_v45  ;;  %vm1098_vm2 = vweird.f32 %v1076_v36 }
 0x171   : > { %v4385_v34 = vadd.f32 %v1708_v17, %v1660_v2  ;;  %v4393_v3 = vadd.f32 %v1612_v60, %v1564_v49  ;;  %v1284_v49 = vld [vmem:[%s5174_s3] sm:$0x3] }
 0x172   : > { %v1010_v44 = vpop.xlane.xlu0 %1009 }
 0x173   : > { %5171 = vst [vmem:[#allocation31_spill] sm:$0xff] %v4385_v34  ;;  %v1749_v41 = vmul.f32 %v4385_v34, %v4385_v34  ;;  %v1061_v62 = vmul.f32 %v4368_v51, %v1010_v44 }
 0x174   : > { %5172 = vst [vmem:[#allocation32_spill] sm:$0xff] %v4393_v3 }
 0x175   : > { %v3471_v30 = vpop.eup %3470  ;;  %v4391_v39 = vadd.f32 1e-06, %v1061_v62  ;;  %v1780_v50 = vadd.f32 %v1749_v41, %v1748_v23  ;;  %v1750_v23 = vmul.f32 %v4393_v3, %v4393_v3 }
 0x176   : > { %v1093_v13 = vmul.f32 %v3471_v30, %v1076_v36  ;;  %v1661_v29 = vpop.f32.mrf.mxu2  ;;  %v1566_v2 = vpop.f32.mrf.mxu0  ;;  %vm1099_vm1 = vweird.f32 %v3471_v30 }
 0x177   : > { %3472 = vrsqrt.f32 %v4391_v39  ;;  %v1662_v54 = vadd.f32 %v1661_v29, %v4375_v55  ;;  %v1710_v1 = vpop.f32.mrf.mxu3  ;;  %1781 = vadd.xlane.f32.xlu0 %v1780_v50  ;;  %v1615_v34 = vpop.f32.mrf.mxu1  ;;  %v1567_v44 = vadd.f32 %v1566_v2, %v4365_v45  ;;  %vm1100_vm3 = vmor %vm1098_vm2, %vm1099_vm1  ;;  %vm1108_vm5 = vweird.f32 %v4391_v39 }
 0x178   : > { %v1094_v17 = vmul.f32 %v3471_v30, %v1093_v13 }
 0x179   : > { %v4397_v21 = vadd.f32 %v1710_v1, %v1662_v54  ;;  %2333 = vmatmul.bf16.gmra.mxu0 %v4101_v14 }
 0x17a   : > { %v1095_v62 = vmul.f32 0.5, %v1094_v17  ;;  %v1013_v5 = vpop.xlane.xlu1 %1012  ;;  %2382 = vmatmul.bf16.gmra.mxu1 %v4103_v15  ;;  %v4417_v17 = vperm.slane %v1284_v49, 0 }
 0x17b   : > { %5173 = vst [vmem:[#allocation33_spill] sm:$0xff] %v4397_v21  ;;  %v1062_v60 = vmul.f32 %v4368_v51, %v1013_v5  ;;  %v1751_v41 = vmul.f32 %v4397_v21, %v4397_v21  ;;  %2431 = vmatmul.bf16.gmra.mxu2 %v4101_v14  ;;  %v4412_v5 = vadd.f32 %v1615_v34, %v1567_v44  ;;  %v4419_v21 = vperm.slane %v1284_v49, 1 }
 0x17c   : > { %v1096_v50 = vsub.f32 1.5, %v1095_v62  ;;  %2480 = vmatmul.bf16.gmra.mxu3 %v4103_v15 }
 0x17d   : > { %v3473_v13 = vpop.eup %3472  ;;  %v4414_v29 = vadd.f32 1e-06, %v1062_v60  ;;  %v1783_v54 = vadd.f32 %v1751_v41, %v1750_v23  ;;  %v1752_v49 = vmul.f32 %v4412_v5, %v4412_v5 }
 0x17e   : > { %v1097_v1 = vmul.f32 %v3471_v30, %v1096_v50  ;;  %v1103_v14 = vmul.f32 %v3473_v13, %v4391_v39  ;;  %v1664_v2 = vpop.f32.mrf.mxu2  ;;  %v1568_v44 = vpop.f32.mrf.mxu0  ;;  %vm1109_vm4 = vweird.f32 %v3473_v13 }
 0x17f   : > { %3474 = vrsqrt.f32 %v4414_v29  ;;  %v1665_v15 = vadd.f32 %v1664_v2, %v4375_v55  ;;  %v1713_v34 = vpop.f32.mrf.mxu3  ;;  %1784 = vadd.xlane.f32.xlu1 %v1783_v54  ;;  %v1617_v23 = vpop.f32.mrf.mxu1  ;;  %v1569_v2 = vadd.f32 %v1568_v44, %v4365_v45  ;;  %vm1110_vm6 = vmor %vm1108_vm5, %vm1109_vm4  ;;  %vm1118_vm8 = vweird.f32 %v4414_v29 }
 0x180   : > { %v1101_v62 = vsel %vm1100_vm3, %v3471_v30, %v1097_v1  ;;  %v1104_v60 = vmul.f32 %v3473_v13, %v1103_v14 }
 0x181   : > { %v1252_v36 = vmul.f32 %v1101_v62, %v4190_v11  ;;  %v1253_v41 = vmul.f32 %v1101_v62, %v4193_v22  ;;  %v4430_v50 = vadd.f32 %v1713_v34, %v1665_v15 }
 0x182   : > { %v1105_v3 = vmul.f32 0.5, %v1104_v60  ;;  %v1016_v4 = vpop.xlane.xlu1 %1015 }
 0x183   : > { %5175 = vst [vmem:[#allocation34_spill] sm:$0xff] %v4430_v50  ;;  %v1290_v30 = vmul.f32 %v4417_v17, %v1252_v36  ;;  %v1291_v54 = vmul.f32 %v4419_v21, %v1253_v41  ;;  %v1753_v1 = vmul.f32 %v4430_v50, %v4430_v50  ;;  %v1063_v11 = vmul.f32 %v4368_v51, %v1016_v4 }
 0x184   : > { %v1106_v22 = vsub.f32 1.5, %v1105_v3  ;;  %v4442_v36 = vadd.f32 %v1617_v23, %v1569_v2 }
 0x185   : > { %v3475_v14 = vpop.eup %3474  ;;  %v1322_v62 = vpack.c.bf16 %v1291_v54, %v1290_v30  ;;  %v4438_v15 = vadd.f32 1e-06, %v1063_v11  ;;  %v1786_v34 = vadd.f32 %v1753_v1, %v1752_v49 }
 0x186   : > { %v1107_v60 = vmul.f32 %v3473_v13, %v1106_v22  ;;  %v1113_v44 = vmul.f32 %v3475_v14, %v4414_v29  ;;  %v1666_v41 = vpop.f32.mrf.mxu2  ;;  %v1571_v49 = vpop.f32.mrf.mxu0  ;;  %v1754_v50 = vmul.f32 %v4442_v36, %v4442_v36  ;;  %vm1119_vm7 = vweird.f32 %v3475_v14 }
 0x187   : > { %1338 = vst [vmem:[%s4445_s13] sm:$0xff] %v1322_v62  ;;  %3476 = vrsqrt.f32 %v4438_v15  ;;  %v1667_v4 = vadd.f32 %v1666_v41, %v4375_v55  ;;  %v1715_v3 = vpop.f32.mrf.mxu3  ;;  %1787 = vadd.xlane.f32.xlu2 %v1786_v34  ;;  %v1620_v39 = vpop.f32.mrf.mxu1  ;;  %v1572_v11 = vadd.f32 %v1571_v49, %v4365_v45  ;;  %vm1120_vm9 = vmor %vm1118_vm8, %vm1119_vm7  ;;  %vm1128_vm11 = vweird.f32 %v4438_v15 }
 0x188   : > { %v1111_v30 = vsel %vm1110_vm6, %v3473_v13, %v1107_v60  ;;  %v1114_v54 = vmul.f32 %v3475_v14, %v1113_v44 }
 0x189   : > { %v1254_v1 = vmul.f32 %v1111_v30, %v4200_v35  ;;  %v1255_v23 = vmul.f32 %v1111_v30, %v4203_v40  ;;  %v4452_v2 = vadd.f32 %v1715_v3, %v1667_v4  ;;  %2338 = vmatmul.bf16.gmra.mxu0 %v4113_v32  ;;  %v4466_v4 = vadd.f32 %v1620_v39, %v1572_v11 }
 0x18a   : > { %v1115_v22 = vmul.f32 0.5, %v1114_v54  ;;  %v1019_v62 = vpop.xlane.xlu2 %1018  ;;  %2387 = vmatmul.bf16.gmra.mxu1 %v4115_v33 }
 0x18b   : > { %v1292_v34 = vmul.f32 %v4417_v17, %v1254_v1  ;;  %v1293_v13 = vmul.f32 %v4419_v21, %v1255_v23  ;;  %v1064_v60 = vmul.f32 %v4368_v51, %v1019_v62  ;;  %v1755_v35 = vmul.f32 %v4452_v2, %v4452_v2  ;;  %2436 = vmatmul.bf16.gmra.mxu2 %v4113_v32 }
 0x18c   : > { %v1116_v40 = vsub.f32 1.5, %v1115_v22  ;;  %2485 = vmatmul.bf16.gmra.mxu3 %v4115_v33  ;;  %v1756_v29 = vmul.f32 %v4466_v4, %v4466_v4 }
 0x18d   : > { %v3477_v44 = vpop.eup %3476  ;;  %v1323_v41 = vpack.c.bf16 %v1293_v13, %v1292_v34  ;;  %v4468_v3 = vadd.f32 1e-06, %v1064_v60  ;;  %v1789_v49 = vadd.f32 %v1755_v35, %v1754_v50 }
 0x18e   : > { %v1117_v30 = vmul.f32 %v3475_v14, %v1116_v40  ;;  %v1123_v54 = vmul.f32 %v3477_v44, %v4438_v15  ;;  %v1669_v1 = vpop.f32.mrf.mxu2  ;;  %v1573_v23 = vpop.f32.mrf.mxu0  ;;  %vm1129_vm10 = vweird.f32 %v3477_v44 }
 0x18f   : > { %1339 = vst [vmem:[%s4445_s13 + $0x8] sm:$0xff] %v1323_v41  ;;  %3478 = vrsqrt.f32 %v4468_v3  ;;  %v1670_v32 = vadd.f32 %v1669_v1, %v4375_v55  ;;  %v1718_v33 = vpop.f32.mrf.mxu3  ;;  %1790 = vadd.xlane.f32.xlu0 %v1789_v49  ;;  %v1622_v22 = vpop.f32.mrf.mxu1  ;;  %v1574_v60 = vadd.f32 %v1573_v23, %v4365_v45  ;;  %vm1130_vm12 = vmor %vm1128_vm11, %vm1129_vm10  ;;  %vm1138_vm14 = vweird.f32 %v4468_v3 }
 0x190   : > { %v1121_v39 = vsel %vm1120_vm9, %v3475_v14, %v1117_v30  ;;  %v1124_v11 = vmul.f32 %v3477_v44, %v1123_v54 }
 0x191   : > { %v1256_v50 = vmul.f32 %v1121_v39, %v4214_v58  ;;  %v1257_v62 = vmul.f32 %v1121_v39, %v4217_v8  ;;  %v4479_v34 = vadd.f32 %v1718_v33, %v1670_v32  ;;  %v4491_v23 = vadd.f32 %v1622_v22, %v1574_v60 }
 0x192   : > { %v1125_v13 = vmul.f32 0.5, %v1124_v11  ;;  %v1022_v35 = vpop.xlane.xlu2 %1021 }
 0x193   : > { %v1294_v40 = vmul.f32 %v4417_v17, %v1256_v50  ;;  %v1295_v14 = vmul.f32 %v4419_v21, %v1257_v62  ;;  %v1757_v41 = vmul.f32 %v4479_v34, %v4479_v34  ;;  %v1065_v58 = vmul.f32 %v4368_v51, %v1022_v35 }
 0x194   : > { %v1126_v8 = vsub.f32 1.5, %v1125_v13 }
 0x195   : > { %v3479_v49 = vpop.eup %3478  ;;  %v1324_v30 = vpack.c.bf16 %v1295_v14, %v1294_v40  ;;  %v4487_v54 = vadd.f32 1e-06, %v1065_v58  ;;  %v1792_v1 = vadd.f32 %v1757_v41, %v1756_v29  ;;  %v1758_v58 = vmul.f32 %v4491_v23, %v4491_v23 }
 0x196   : > { %v1127_v32 = vmul.f32 %v3477_v44, %v1126_v8  ;;  %v1133_v33 = vmul.f32 %v3479_v49, %v4468_v3  ;;  %v1671_v39 = vpop.f32.mrf.mxu2  ;;  %v1576_v62 = vpop.f32.mrf.mxu0  ;;  %vm1139_vm13 = vweird.f32 %v3479_v49 }
 0x197   : > { %1340 = vst [vmem:[%s4445_s13 + $0x10] sm:$0xff] %v1324_v30  ;;  %3480 = vrsqrt.f32 %v4487_v54  ;;  %v1672_v11 = vadd.f32 %v1671_v39, %v4375_v55  ;;  %v1720_v50 = vpop.f32.mrf.mxu3  ;;  %1793 = vadd.xlane.f32.xlu1 %v1792_v1  ;;  %v1625_v29 = vpop.f32.mrf.mxu1  ;;  %v1577_v22 = vadd.f32 %v1576_v62, %v4365_v45  ;;  %vm1140_vm15 = vmor %vm1138_vm14, %vm1139_vm13  ;;  %vm1148_vm1 = vweird.f32 %v4487_v54 }
 0x198   : > { %v1131_v13 = vsel %vm1130_vm12, %v3477_v44, %v1127_v32  ;;  %v1134_v35 = vmul.f32 %v3479_v49, %v1133_v33 }
 0x199   : > { %v1258_v40 = vmul.f32 %v1131_v13, %v4224_v20  ;;  %v1259_v15 = vmul.f32 %v1131_v13, %v4227_v28  ;;  %v4498_v14 = vadd.f32 %v1720_v50, %v1672_v11  ;;  %2343 = vmatmul.bf16.gmra.mxu0 %v4125_v52  ;;  %v4512_v33 = vadd.f32 %v1625_v29, %v1577_v22 }
 0x19a   : > { %v1135_v60 = vmul.f32 0.5, %v1134_v35  ;;  %v1025_v41 = vpop.xlane.xlu0 %1024  ;;  %2392 = vmatmul.bf16.gmra.mxu1 %v4127_v53 }
 0x19b   : > { %v1296_v8 = vmul.f32 %v4417_v17, %v1258_v40  ;;  %v1297_v44 = vmul.f32 %v4419_v21, %v1259_v15  ;;  %v1066_v30 = vmul.f32 %v4368_v51, %v1025_v41  ;;  %v1759_v20 = vmul.f32 %v4498_v14, %v4498_v14  ;;  %2441 = vmatmul.bf16.gmra.mxu2 %v4125_v52 }
 0x19c   : > { %v1136_v28 = vsub.f32 1.5, %v1135_v60  ;;  %2490 = vmatmul.bf16.gmra.mxu3 %v4127_v53  ;;  %v1760_v3 = vmul.f32 %v4512_v33, %v4512_v33 }
 0x19d   : > { %v3481_v1 = vpop.eup %3480  ;;  %v1325_v32 = vpack.c.bf16 %v1297_v44, %v1296_v8  ;;  %v4514_v39 = vadd.f32 1e-06, %v1066_v30  ;;  %v1795_v11 = vadd.f32 %v1759_v20, %v1758_v58 }
 0x19e   : > { %v1137_v50 = vmul.f32 %v3479_v49, %v1136_v28  ;;  %v1143_v62 = vmul.f32 %v3481_v1, %v4487_v54  ;;  %v1674_v13 = vpop.f32.mrf.mxu2  ;;  %v1578_v35 = vpop.f32.mrf.mxu0  ;;  %vm1149_vm0 = vweird.f32 %v3481_v1 }
 0x19f   : > { %1341 = vst [vmem:[%s4445_s13 + $0x18] sm:$0xff] %v1325_v32  ;;  %3482 = vrsqrt.f32 %v4514_v39  ;;  %v1675_v52 = vadd.f32 %v1674_v13, %v4375_v55  ;;  %v1723_v53 = vpop.f32.mrf.mxu3  ;;  %1796 = vadd.xlane.f32.xlu2 %v1795_v11  ;;  %v1627_v15 = vpop.f32.mrf.mxu1  ;;  %v1579_v8 = vadd.f32 %v1578_v35, %v4365_v45  ;;  %vm1150_vm2 = vmor %vm1148_vm1, %vm1149_vm0  ;;  %vm1158_vm4 = vweird.f32 %v4514_v39 }
 0x1a0   : > { %v1141_v29 = vsel %vm1140_vm15, %v3479_v49, %v1137_v50  ;;  %v1144_v40 = vmul.f32 %v3481_v1, %v1143_v62 }
 0x1a1   : > { %v1260_v22 = vmul.f32 %v1141_v29, %v4238_v42  ;;  %v1261_v60 = vmul.f32 %v1141_v29, %v4241_v61  ;;  %v4525_v41 = vadd.f32 %v1723_v53, %v1675_v52  ;;  %v4537_v52 = vadd.f32 %v1627_v15, %v1579_v8 }
 0x1a2   : > { %v1145_v58 = vmul.f32 0.5, %v1144_v40  ;;  %v1028_v44 = vpop.xlane.xlu1 %1027 }
 0x1a3   : > { %v1298_v30 = vmul.f32 %v4417_v17, %v1260_v22  ;;  %v1299_v49 = vmul.f32 %v4419_v21, %v1261_v60  ;;  %v1761_v20 = vmul.f32 %v4525_v41, %v4525_v41  ;;  %v1067_v42 = vmul.f32 %v4368_v51, %v1028_v44 }
 0x1a4   : > { %v1146_v61 = vsub.f32 1.5, %v1145_v58 }
 0x1a5   : > { %v3483_v28 = vpop.eup %3482  ;;  %v1326_v32 = vpack.c.bf16 %v1299_v49, %v1298_v30  ;;  %v4533_v11 = vadd.f32 1e-06, %v1067_v42  ;;  %v1798_v50 = vadd.f32 %v1761_v20, %v1760_v3  ;;  %v1762_v49 = vmul.f32 %v4537_v52, %v4537_v52 }
 0x1a6   : > { %v1147_v62 = vmul.f32 %v3481_v1, %v1146_v61  ;;  %v1153_v13 = vmul.f32 %v3483_v28, %v4514_v39  ;;  %v1676_v53 = vpop.f32.mrf.mxu2  ;;  %v1581_v40 = vpop.f32.mrf.mxu0  ;;  %vm1159_vm3 = vweird.f32 %v3483_v28 }
 0x1a7   : > { %1342 = vst [vmem:[%s4445_s13 + $0x20] sm:$0xff] %v1326_v32  ;;  %3484 = vrsqrt.f32 %v4533_v11  ;;  %v1677_v35 = vadd.f32 %v1676_v53, %v4375_v55  ;;  %v1725_v29 = vpop.f32.mrf.mxu3  ;;  %1799 = vadd.xlane.f32.xlu0 %v1798_v50  ;;  %v1630_v3 = vpop.f32.mrf.mxu1  ;;  %v1582_v15 = vadd.f32 %v1581_v40, %v4365_v45  ;;  %vm1160_vm5 = vmor %vm1158_vm4, %vm1159_vm3  ;;  %vm1168_vm7 = vweird.f32 %v4533_v11 }
 0x1a8   : > { %v1151_v22 = vsel %vm1150_vm2, %v3481_v1, %v1147_v62  ;;  %v1154_v60 = vmul.f32 %v3483_v28, %v1153_v13 }
 0x1a9   : > { %v1262_v58 = vmul.f32 %v1151_v22, %v4248_v12  ;;  %v1263_v54 = vmul.f32 %v1151_v22, %v4251_v19  ;;  %v4544_v44 = vadd.f32 %v1725_v29, %v1677_v35  ;;  %2348 = vmatmul.bf16.gmra.mxu0 %v4137_v6  ;;  %v4558_v50 = vadd.f32 %v1630_v3, %v1582_v15 }
 0x1aa   : > { %v1155_v8 = vmul.f32 0.5, %v1154_v60  ;;  %v1031_v30 = vpop.xlane.xlu2 %1030  ;;  %2397 = vmatmul.bf16.gmra.mxu1 %v4139_v7 }
 0x1ab   : > { %v1300_v20 = vmul.f32 %v4417_v17, %v1262_v58  ;;  %v1301_v1 = vmul.f32 %v4419_v21, %v1263_v54  ;;  %v1068_v42 = vmul.f32 %v4368_v51, %v1031_v30  ;;  %v1763_v12 = vmul.f32 %v4544_v44, %v4544_v44  ;;  %2446 = vmatmul.bf16.gmra.mxu2 %v4137_v6 }
 0x1ac   : > { %v1156_v19 = vsub.f32 1.5, %v1155_v8  ;;  %2495 = vmatmul.bf16.gmra.mxu3 %v4139_v7  ;;  %v1764_v39 = vmul.f32 %v4558_v50, %v4558_v50 }
 0x1ad   : > { %v3485_v61 = vpop.eup %3484  ;;  %v1327_v32 = vpack.c.bf16 %v1301_v1, %v1300_v20  ;;  %v4560_v62 = vadd.f32 1e-06, %v1068_v42  ;;  %v1801_v13 = vadd.f32 %v1763_v12, %v1762_v49 }
 0x1ae   : > { %v1157_v53 = vmul.f32 %v3483_v28, %v1156_v19  ;;  %v1163_v35 = vmul.f32 %v3485_v61, %v4533_v11  ;;  %v1679_v29 = vpop.f32.mrf.mxu2  ;;  %v1583_v40 = vpop.f32.mrf.mxu0  ;;  %vm1169_vm6 = vweird.f32 %v3485_v61 }
 0x1af   : > { %1343 = vst [vmem:[%s4445_s13 + $0x28] sm:$0xff] %v1327_v32  ;;  %3486 = vrsqrt.f32 %v4560_v62  ;;  %v1680_v6 = vadd.f32 %v1679_v29, %v4375_v55  ;;  %v1728_v7 = vpop.f32.mrf.mxu3  ;;  %1802 = vadd.xlane.f32.xlu1 %v1801_v13  ;;  %v1632_v3 = vpop.f32.mrf.mxu1  ;;  %v1584_v30 = vadd.f32 %v1583_v40, %v4365_v45  ;;  %vm1170_vm8 = vmor %vm1168_vm7, %vm1169_vm6  ;;  %vm1178_vm10 = vweird.f32 %v4560_v62 }
 0x1b0   : > { %v1161_v22 = vsel %vm1160_vm5, %v3483_v28, %v1157_v53  ;;  %v1164_v60 = vmul.f32 %v3485_v61, %v1163_v35 }
 0x1b1   : > { %v1264_v58 = vmul.f32 %v1161_v22, %v4262_v37  ;;  %v1265_v54 = vmul.f32 %v1161_v22, %v4267_v59  ;;  %v4571_v15 = vadd.f32 %v1728_v7, %v1680_v6  ;;  %v4583_v35 = vadd.f32 %v1632_v3, %v1584_v30 }
 0x1b2   : > { %v1165_v8 = vmul.f32 0.5, %v1164_v60  ;;  %v1034_v49 = vpop.xlane.xlu1 %1033 }
 0x1b3   : > { %v1302_v20 = vmul.f32 %v4417_v17, %v1264_v58  ;;  %v1303_v28 = vmul.f32 %v4419_v21, %v1265_v54  ;;  %v1765_v1 = vmul.f32 %v4571_v15, %v4571_v15  ;;  %v1069_v37 = vmul.f32 %v4368_v51, %v1034_v49 }
 0x1b4   : > { %v1166_v59 = vsub.f32 1.5, %v1165_v8  ;;  %v1766_v30 = vmul.f32 %v4583_v35, %v4583_v35 }
 0x1b5   : > { %v3487_v42 = vpop.eup %3486  ;;  %v1328_v12 = vpack.c.bf16 %v1303_v28, %v1302_v20  ;;  %v4579_v19 = vadd.f32 1e-06, %v1069_v37  ;;  %v1804_v32 = vadd.f32 %v1765_v1, %v1764_v39 }
 0x1b6   : > { %v1167_v13 = vmul.f32 %v3485_v61, %v1166_v59  ;;  %v1173_v53 = vmul.f32 %v3487_v42, %v4560_v62  ;;  %v1681_v29 = vpop.f32.mrf.mxu2  ;;  %v1586_v40 = vpop.f32.mrf.mxu0  ;;  %vm1179_vm9 = vweird.f32 %v3487_v42 }
 0x1b7   : > { %1344 = vst [vmem:[%s4445_s13 + $0x30] sm:$0xff] %v1328_v12  ;;  %3488 = vrsqrt.f32 %v4579_v19  ;;  %v1682_v6 = vadd.f32 %v1681_v29, %v4375_v55  ;;  %v1730_v7 = vpop.f32.mrf.mxu3  ;;  %1805 = vadd.xlane.f32.xlu2 %v1804_v32  ;;  %v1635_v58 = vpop.f32.mrf.mxu1  ;;  %v1587_v3 = vadd.f32 %v1586_v40, %v4365_v45  ;;  %vm1180_vm11 = vmor %vm1178_vm10, %vm1179_vm9  ;;  %vm1188_vm13 = vweird.f32 %v4579_v19 }
 0x1b8   : > { %v1171_v22 = vsel %vm1170_vm8, %v3485_v61, %v1167_v13  ;;  %v1174_v60 = vmul.f32 %v3487_v42, %v1173_v53 }
 0x1b9   : > { %v1266_v54 = vmul.f32 %v1171_v22, %v4272_v9  ;;  %v1267_v11 = vmul.f32 %v1171_v22, %v4275_v18  ;;  %v4590_v39 = vadd.f32 %v1730_v7, %v1682_v6  ;;  %2353 = vmatmul.bf16.gmra.mxu0 %v4149_v26  ;;  %v4604_v59 = vadd.f32 %v1635_v58, %v1587_v3 }
 0x1ba   : > { %v1175_v8 = vmul.f32 0.5, %v1174_v60  ;;  %v1037_v49 = vpop.xlane.xlu2 %1036  ;;  %2402 = vmatmul.bf16.gmra.mxu1 %v4151_v27 }
 0x1bb   : > { %v1304_v20 = vmul.f32 %v4417_v17, %v1266_v54  ;;  %v1305_v61 = vmul.f32 %v4419_v21, %v1267_v11  ;;  %v1767_v9 = vmul.f32 %v4590_v39, %v4590_v39  ;;  %v1070_v18 = vmul.f32 %v4368_v51, %v1037_v49  ;;  %2451 = vmatmul.bf16.gmra.mxu2 %v4149_v26 }
 0x1bc   : > { %v1176_v28 = vsub.f32 1.5, %v1175_v8  ;;  %2500 = vmatmul.bf16.gmra.mxu3 %v4151_v27  ;;  %v1768_v62 = vmul.f32 %v4604_v59, %v4604_v59 }
 0x1bd   : > { %v3489_v1 = vpop.eup %3488  ;;  %v1329_v37 = vpack.c.bf16 %v1305_v61, %v1304_v20  ;;  %v4606_v12 = vadd.f32 1e-06, %v1070_v18  ;;  %v1807_v32 = vadd.f32 %v1767_v9, %v1766_v30 }
 0x1be   : > { %v1177_v13 = vmul.f32 %v3487_v42, %v1176_v28  ;;  %v1183_v53 = vmul.f32 %v3489_v1, %v4579_v19  ;;  %v1684_v29 = vpop.f32.mrf.mxu2  ;;  %v1588_v6 = vpop.f32.mrf.mxu0  ;;  %vm1189_vm12 = vweird.f32 %v3489_v1 }
 0x1bf   : > { %1345 = vst [vmem:[%s4445_s13 + $0x38] sm:$0xff] %v1329_v37  ;;  %3490 = vrsqrt.f32 %v4606_v12  ;;  %v1685_v26 = vadd.f32 %v1684_v29, %v4375_v55  ;;  %v1733_v27 = vpop.f32.mrf.mxu3  ;;  %1808 = vadd.xlane.f32.xlu0 %v1807_v32  ;;  %v1637_v22 = vpop.f32.mrf.mxu1  ;;  %v1589_v3 = vadd.f32 %v1588_v6, %v4365_v45  ;;  %vm1190_vm14 = vmor %vm1188_vm13, %vm1189_vm12  ;;  %vm1198_vm0 = vweird.f32 %v4606_v12 }
 0x1c0   : > { %v1181_v7 = vsel %vm1180_vm11, %v3487_v42, %v1177_v13  ;;  %v1184_v40 = vmul.f32 %v3489_v1, %v1183_v53 }
 0x1c1   : > { %v1268_v60 = vmul.f32 %v1181_v7, %v4286_v38  ;;  %v1269_v58 = vmul.f32 %v1181_v7, %v4291_v63  ;;  %v4617_v54 = vadd.f32 %v1733_v27, %v1685_v26  ;;  %v4629_v32 = vadd.f32 %v1637_v22, %v1589_v3 }
 0x1c2   : > { %v1185_v11 = vmul.f32 0.5, %v1184_v40  ;;  %v1040_v8 = vpop.xlane.xlu0 %1039 }
 0x1c3   : > { %v1306_v30 = vmul.f32 %v4417_v17, %v1268_v60  ;;  %v1307_v42 = vmul.f32 %v4419_v21, %v1269_v58  ;;  %v1769_v49 = vmul.f32 %v4617_v54, %v4617_v54  ;;  %v1071_v38 = vmul.f32 %v4368_v51, %v1040_v8 }
 0x1c4   : > { %v1186_v63 = vsub.f32 1.5, %v1185_v11 }
 0x1c5   : > { %v3491_v20 = vpop.eup %3490  ;;  %v1330_v61 = vpack.c.bf16 %v1307_v42, %v1306_v30  ;;  %v4625_v9 = vadd.f32 1e-06, %v1071_v38  ;;  %v1810_v18 = vadd.f32 %v1769_v49, %v1768_v62  ;;  %v1770_v62 = vmul.f32 %v4629_v32, %v4629_v32 }
 0x1c6   : > { %v1187_v28 = vmul.f32 %v3489_v1, %v1186_v63  ;;  %v1193_v37 = vmul.f32 %v3491_v20, %v4606_v12  ;;  %v1686_v13 = vpop.f32.mrf.mxu2  ;;  %v1591_v26 = vpop.f32.mrf.mxu0  ;;  %vm1199_vm15 = vweird.f32 %v3491_v20 }
 0x1c7   : > { %1346 = vst [vmem:[%s4445_s13 + $0x40] sm:$0xff] %v1330_v61  ;;  %3492 = vrsqrt.f32 %v4625_v9  ;;  %v1687_v53 = vadd.f32 %v1686_v13, %v4375_v55  ;;  %v1735_v29 = vpop.f32.mrf.mxu3  ;;  %1811 = vadd.xlane.f32.xlu1 %v1810_v18  ;;  %v1640_v7 = vpop.f32.mrf.mxu1  ;;  %v1592_v22 = vadd.f32 %v1591_v26, %v4365_v45  ;;  %vm1200_vm1 = vmor %vm1198_vm0, %vm1199_vm15  ;;  %vm1208_vm3 = vweird.f32 %v4625_v9 }
 0x1c8   : > { %v1191_v27 = vsel %vm1190_vm14, %v3489_v1, %v1187_v28  ;;  %v1194_v6 = vmul.f32 %v3491_v20, %v1193_v37 }
 0x1c9   : > { %v1270_v40 = vmul.f32 %v1191_v27, %v4296_v16  ;;  %v1271_v19 = vmul.f32 %v1191_v27, %v4299_v25  ;;  %v4636_v60 = vadd.f32 %v1735_v29, %v1687_v53  ;;  %2358 = vmatmul.bf16.gmra.mxu0 %v4161_v47  ;;  %v4650_v49 = vadd.f32 %v1640_v7, %v1592_v22 }
 0x1ca   : > { %v1195_v58 = vmul.f32 0.5, %v1194_v6  ;;  %v1043_v11 = vpop.xlane.xlu1 %1042  ;;  %2407 = vmatmul.bf16.gmra.mxu1 %v4163_v48 }
 0x1cb   : > { %v1308_v3 = vmul.f32 %v4417_v17, %v1270_v40  ;;  %v1309_v1 = vmul.f32 %v4419_v21, %v1271_v19  ;;  %v1771_v16 = vmul.f32 %v4636_v60, %v4636_v60  ;;  %v1072_v25 = vmul.f32 %v4368_v51, %v1043_v11  ;;  %2456 = vmatmul.bf16.gmra.mxu2 %v4161_v47 }
 0x1cc   : > { %v1196_v8 = vsub.f32 1.5, %v1195_v58  ;;  %2505 = vmatmul.bf16.gmra.mxu3 %v4163_v48  ;;  %v1772_v12 = vmul.f32 %v4650_v49, %v4650_v49 }
 0x1cd   : > { %v3493_v30 = vpop.eup %3492  ;;  %v1331_v42 = vpack.c.bf16 %v1309_v1, %v1308_v3  ;;  %v4652_v38 = vadd.f32 1e-06, %v1072_v25  ;;  %v1813_v63 = vadd.f32 %v1771_v16, %v1770_v62 }
 0x1ce   : > { %v1197_v61 = vmul.f32 %v3491_v20, %v1196_v8  ;;  %v1203_v18 = vmul.f32 %v3493_v30, %v4625_v9  ;;  %v1689_v28 = vpop.f32.mrf.mxu2  ;;  %v1593_v37 = vpop.f32.mrf.mxu0  ;;  %vm1209_vm2 = vweird.f32 %v3493_v30 }
 0x1cf   : > { %1347 = vst [vmem:[%s4445_s13 + $0x48] sm:$0xff] %v1331_v42  ;;  %3494 = vrsqrt.f32 %v4652_v38  ;;  %v1690_v47 = vadd.f32 %v1689_v28, %v4375_v55  ;;  %v1738_v48 = vpop.f32.mrf.mxu3  ;;  %1814 = vadd.xlane.f32.xlu2 %v1813_v63  ;;  %v1642_v29 = vpop.f32.mrf.mxu1  ;;  %v1594_v22 = vadd.f32 %v1593_v37, %v4365_v45  ;;  %vm1210_vm4 = vmor %vm1208_vm3, %vm1209_vm2  ;;  %vm1218_vm6 = vweird.f32 %v4652_v38 }
 0x1d0   : > { %v1201_v13 = vsel %vm1200_vm1, %v3491_v20, %v1197_v61  ;;  %v1204_v53 = vmul.f32 %v3493_v30, %v1203_v18 }
 0x1d1   : > { %v1272_v26 = vmul.f32 %v1201_v13, %v4310_v46  ;;  %v1273_v27 = vmul.f32 %v1201_v13, %v4315_v10  ;;  %v4663_v6 = vadd.f32 %v1738_v48, %v1690_v47  ;;  %v4673_v16 = vadd.f32 %v1642_v29, %v1594_v22 }
 0x1d2   : > { %v1205_v7 = vmul.f32 0.5, %v1204_v53 }
 0x1d3   : > { %v1310_v40 = vmul.f32 %v4417_v17, %v1272_v26  ;;  %v1311_v19 = vmul.f32 %v4419_v21, %v1273_v27  ;;  %v1773_v20 = vmul.f32 %v4663_v6, %v4663_v6 }
 0x1d4   : > { %v1206_v58 = vsub.f32 1.5, %v1205_v7 }
 0x1d5   : > { %v3495_v46 = vpop.eup %3494  ;;  %v1332_v10 = vpack.c.bf16 %v1311_v19, %v1310_v40  ;;  %v1816_v62 = vadd.f32 %v1773_v20, %v1772_v12 }
 0x1d6   : > { %v1207_v11 = vmul.f32 %v3493_v30, %v1206_v58  ;;  %v1213_v3 = vmul.f32 %v3495_v46, %v4652_v38  ;;  %v1691_v1 = vpop.f32.mrf.mxu2  ;;  %v1596_v42 = vpop.f32.mrf.mxu0  ;;  %vm1219_vm5 = vweird.f32 %v3495_v46  ;;  %v5176_v58 = vld [vmem:[#allocation24_spill] sm:$0xff] }
 0x1d7   : > { %1348 = vst [vmem:[%s4445_s13 + $0x50] sm:$0xff] %v1332_v10  ;;  %v1692_v25 = vadd.f32 %v1691_v1, %v4375_v55  ;;  %v1740_v8 = vpop.f32.mrf.mxu3  ;;  %1817 = vadd.xlane.f32.xlu0 %v1816_v62  ;;  %v1645_v18 = vpop.f32.mrf.mxu1  ;;  %v1597_v48 = vadd.f32 %v1596_v42, %v4365_v45  ;;  %vm1220_vm7 = vmor %vm1218_vm6, %vm1219_vm5  ;;  %v5177_v62 = vld [vmem:[#allocation25_spill] sm:$0xff]  ;;  %v1003_v42 = vmul.f32 %v4360_v24, %v4360_v24 }
 0x1d8   : > { %v1211_v63 = vsel %vm1210_vm4, %v3493_v30, %v1207_v11  ;;  %v1214_v61 = vmul.f32 %v3495_v46, %v1213_v3  ;;  %v1774_v30 = vmul.f32 %v4673_v16, %v4673_v16 }
 0x1d9   : > { %v1274_v28 = vmul.f32 %v1211_v63, %v4320_v31  ;;  %v1275_v47 = vmul.f32 %v1211_v63, %v4323_v43  ;;  %v4678_v9 = vadd.f32 %v1740_v8, %v1692_v25  ;;  %2363 = vmatmul.bf16.gmra.mxu0 %v4173_v56  ;;  %v4691_v26 = vadd.f32 %v1645_v18, %v1597_v48 }
 0x1da   : > { %v1215_v37 = vmul.f32 0.5, %v1214_v61  ;;  %2412 = vmatmul.bf16.gmra.mxu1 %v4175_v57 }
 0x1db   : > { %v1312_v13 = vmul.f32 %v4417_v17, %v1274_v28  ;;  %v1313_v53 = vmul.f32 %v4419_v21, %v1275_v47  ;;  %v1775_v31 = vmul.f32 %v4678_v9, %v4678_v9  ;;  %2461 = vmatmul.bf16.gmra.mxu2 %v4173_v56  ;;  %v1776_v38 = vmul.f32 %v4691_v26, %v4691_v26 }
 0x1dc   : > { %v1216_v43 = vsub.f32 1.5, %v1215_v37  ;;  %2510 = vmatmul.bf16.gmra.mxu3 %v4175_v57  ;;  %v1004_v57 = vmul.f32 %v4370_v0, %v4370_v0  ;;  %v2154_v37 = vld [vmem:[%s5121_s8] sm:$0x3] }
 0x1dd   : > { %v1333_v29 = vpack.c.bf16 %v1313_v53, %v1312_v13  ;;  %v1819_v27 = vadd.f32 %v1775_v31, %v1774_v30  ;;  %v4718_v53 = vperm.slane %v2154_v37, 0 }
 0x1de   : > { %v1217_v12 = vmul.f32 %v3495_v46, %v1216_v43  ;;  %v1694_v7 = vpop.f32.mrf.mxu2  ;;  %v1598_v56 = vpop.f32.mrf.mxu0  ;;  %v1050_v18 = vadd.f32 %v1004_v57, %v1003_v42  ;;  %v5178_v43 = vld [vmem:[#allocation27_spill] sm:$0xff]  ;;  %v5181_v42 = vld [vmem:[#allocation29_spill] sm:$0xff] }
 0x1df   : > { %1349 = vst [vmem:[%s4445_s13 + $0x58] sm:$0xff] %v1333_v29  ;;  %v1695_v40 = vadd.f32 %v1694_v7, %v4375_v55  ;;  %v1743_v19 = vpop.f32.mrf.mxu3  ;;  %1820 = vadd.xlane.f32.xlu1 %v1819_v27  ;;  %v1647_v22 = vpop.f32.mrf.mxu1  ;;  %v1599_v1 = vadd.f32 %v1598_v56, %v4365_v45  ;;  %v1000_v29 = vmul.f32 %v5178_v43, %v5178_v43 }
 0x1e0   : > { %v1221_v20 = vsel %vm1220_vm7, %v3495_v46, %v1217_v12  ;;  %v5179_v12 = vld [vmem:[#allocation26_spill] sm:$0xff] }
 0x1e1   : > { %v1276_v10 = vmul.f32 %v1221_v20, %v5176_v58  ;;  %v1277_v11 = vmul.f32 %v1221_v20, %v5177_v62  ;;  %v4702_v3 = vadd.f32 %v1743_v19, %v1695_v40  ;;  %v4711_v28 = vadd.f32 %v1647_v22, %v1599_v1 }
 0x1e2   : > { %v999_v7 = vmul.f32 %v5179_v12, %v5179_v12  ;;  %v4732_v20 = vperm.slane %v2154_v37, 1 }
 0x1e3   : > { %v1314_v25 = vmul.f32 %v4417_v17, %v1276_v10  ;;  %v1315_v46 = vmul.f32 %v4419_v21, %v1277_v11  ;;  %v1777_v8 = vmul.f32 %v4702_v3, %v4702_v3  ;;  %v1778_v27 = vmul.f32 %v4711_v28, %v4711_v28 }
 0x1e4   : > { %v1044_v57 = vadd.f32 %v1000_v29, %v999_v7 }
 0x1e5   : > { %v1334_v63 = vpack.c.bf16 %v1315_v46, %v1314_v25  ;;  %v1822_v61 = vadd.f32 %v1777_v8, %v1776_v38  ;;  %v5180_v46 = vld [vmem:[#allocation28_spill] sm:$0xff] }
 0x1e6   : > { %v1696_v47 = vpop.f32.mrf.mxu2  ;;  %v2329_v13 = vpop.f32.mrf.mxu0  ;;  %v1001_v8 = vmul.f32 %v5180_v46, %v5180_v46 }
 0x1e7   : > { %1350 = vst [vmem:[%s4445_s13 + $0x60] sm:$0xff] %v1334_v63  ;;  %v1697_v48 = vadd.f32 %v1696_v47, %v4375_v55  ;;  %v1745_v45 = vpop.f32.mrf.mxu3  ;;  %1823 = vadd.xlane.f32.xlu2 %v1822_v61  ;;  %1051 = vadd.xlane.f32.xlu1 %v1050_v18  ;;  %v2378_v30 = vpop.f32.mrf.mxu1  ;;  %v2330_v56 = vadd.f32 %v2329_v13, %v4718_v53 }
 0x1e8   : > { %v1002_v63 = vmul.f32 %v5181_v42, %v5181_v42 }
 0x1e9   : > { %v4720_v31 = vadd.f32 %v1745_v45, %v1697_v48  ;;  %v2379_v11 = vadd.f32 %v2378_v30, %v2330_v56 }
 0x1ea   : > { %v1782_v55 = vpop.xlane.xlu0 %1781  ;;  %v1047_v30 = vadd.f32 %v1002_v63, %v1001_v8 }
 0x1eb   : > { %v1779_v40 = vmul.f32 %v4720_v31, %v4720_v31  ;;  %v1828_v19 = vmul.f32 %v1782_v55, %v4368_v51 }
 0x1ed   : > { %v1844_v22 = vadd.f32 1e-06, %v1828_v19  ;;  %v1825_v58 = vadd.f32 %v1779_v40, %v1778_v27 }
 0x1ee   : > { %v2427_v10 = vpop.f32.mrf.mxu2  ;;  %v2331_v1 = vpop.f32.mrf.mxu0 }
 0x1ef   : > { %3496 = vrsqrt.f32 %v1844_v22  ;;  %1045 = vadd.xlane.f32.xlu2 %v1044_v57  ;;  %1826 = vadd.xlane.f32.xlu0 %v1825_v58  ;;  %v2428_v62 = vadd.f32 %v2427_v10, %v4732_v20  ;;  %v2476_v38 = vpop.f32.mrf.mxu3  ;;  %v2380_v25 = vpop.f32.mrf.mxu1  ;;  %v2332_v45 = vadd.f32 %v2331_v1, %v4718_v53  ;;  %vm1866_vm9 = vweird.f32 %v1844_v22 }
 0x1f1   : > { %v2477_v61 = vadd.f32 %v2476_v38, %v2428_v62  ;;  %v2381_v7 = vadd.f32 %v2380_v25, %v2332_v45 }
 0x1f2   : > { %v1785_v18 = vpop.xlane.xlu1 %1784 }
 0x1f3   : > { %v1829_v47 = vmul.f32 %v1785_v18, %v4368_v51  ;;  %v2516_v48 = vpack.c.bf16 %v2477_v61, %v2379_v11  ;;  %v2052_v11 = vld [vmem:[#allocation10] sm:$0x3] }
 0x1f4   : > { %v4754_v25 = vperm.slane %v2052_v11, 0 }
 0x1f5   : > { %v3497_v37 = vpop.eup %3496  ;;  %v4741_v13 = vadd.f32 1e-06, %v1829_v47  ;;  %2532 = vst [vmem:[%s4744_s4] sm:$0xff] %v2516_v48 }
 0x1f6   : > { %v1861_v29 = vmul.f32 %v3497_v37, %v1844_v22  ;;  %v2429_v27 = vpop.f32.mrf.mxu2  ;;  %v2334_v19 = vpop.f32.mrf.mxu0  ;;  %vm1867_vm8 = vweird.f32 %v3497_v37  ;;  %v5183_v22 = vld [vmem:[#allocation31_spill] sm:$0xff] }
 0x1f7   : > { %3498 = vrsqrt.f32 %v4741_v13  ;;  %1048 = vadd.xlane.f32.xlu0 %v1047_v30  ;;  %v2430_v55 = vadd.f32 %v2429_v27, %v4732_v20  ;;  %v2478_v40 = vpop.f32.mrf.mxu3  ;;  %v2383_v57 = vpop.f32.mrf.mxu1  ;;  %v2335_v8 = vadd.f32 %v2334_v19, %v4718_v53  ;;  %v4757_v30 = vperm.slane %v2052_v11, 1  ;;  %vm1868_vm10 = vmor %vm1866_vm9, %vm1867_vm8 }
 0x1f8   : > { %v1862_v56 = vmul.f32 %v3497_v37, %v1861_v29  ;;  %vm1876_vm12 = vweird.f32 %v4741_v13 }
 0x1f9   : > { %v2479_v58 = vadd.f32 %v2478_v40, %v2430_v55  ;;  %v2384_v27 = vadd.f32 %v2383_v57, %v2335_v8 }
 0x1fa   : > { %v1863_v10 = vmul.f32 0.5, %v1862_v56  ;;  %v1788_v62 = vpop.xlane.xlu2 %1787 }
 0x1fb   : > { %v1830_v38 = vmul.f32 %v1788_v62, %v4368_v51  ;;  %v2517_v1 = vpack.c.bf16 %v2479_v58, %v2381_v7  ;;  %v5182_v58 = vld [vmem:[#allocation30_spill] sm:$0xff] }
 0x1fc   : > { %v1864_v63 = vsub.f32 1.5, %v1863_v10 }
 0x1fd   : > { %v3499_v61 = vpop.eup %3498  ;;  %v4751_v18 = vadd.f32 1e-06, %v1830_v38  ;;  %2533 = vst [vmem:[%s4744_s4 + $0x8] sm:$0xff] %v2517_v1 }
 0x1fe   : > { %v1865_v47 = vmul.f32 %v3497_v37, %v1864_v63  ;;  %v1871_v48 = vmul.f32 %v3499_v61, %v4741_v13  ;;  %v2432_v45 = vpop.f32.mrf.mxu2  ;;  %v2336_v7 = vpop.f32.mrf.mxu0  ;;  %vm1877_vm11 = vweird.f32 %v3499_v61  ;;  %v5185_v13 = vld [vmem:[#allocation33_spill] sm:$0xff] }
 0x1ff   : > { %3500 = vrsqrt.f32 %v4751_v18  ;;  %v2433_v29 = vadd.f32 %v2432_v45, %v4732_v20  ;;  %v2481_v55 = vpop.f32.mrf.mxu3  ;;  %v2385_v56 = vpop.f32.mrf.mxu1  ;;  %v2337_v63 = vadd.f32 %v2336_v7, %v4718_v53  ;;  %vm1878_vm13 = vmor %vm1876_vm12, %vm1877_vm11  ;;  %vm1886_vm15 = vweird.f32 %v4751_v18 }
 0x200   : > { %v1869_v40 = vsel %vm1868_vm10, %v3497_v37, %v1865_v47  ;;  %v1872_v19 = vmul.f32 %v3499_v61, %v1871_v48 }
 0x201   : > { %v2020_v10 = vmul.f32 %v1869_v40, %v5182_v58  ;;  %v2021_v62 = vmul.f32 %v1869_v40, %v5183_v22  ;;  %v2482_v38 = vadd.f32 %v2481_v55, %v2433_v29  ;;  %v2386_v40 = vadd.f32 %v2385_v56, %v2337_v63 }
 0x202   : > { %v1873_v1 = vmul.f32 0.5, %v1872_v19  ;;  %v1791_v11 = vpop.xlane.xlu0 %1790 }
 0x203   : > { %v2058_v42 = vmul.f32 %v4754_v25, %v2020_v10  ;;  %v2059_v57 = vmul.f32 %v4757_v30, %v2021_v62  ;;  %v1831_v8 = vmul.f32 %v1791_v11, %v4368_v51  ;;  %v2518_v37 = vpack.c.bf16 %v2482_v38, %v2384_v27  ;;  %v5184_v62 = vld [vmem:[#allocation32_spill] sm:$0xff] }
 0x204   : > { %v1874_v47 = vsub.f32 1.5, %v1873_v1 }
 0x205   : > { %v3501_v48 = vpop.eup %3500  ;;  %v2090_v45 = vpack.c.bf16 %v2059_v57, %v2058_v42  ;;  %v4767_v58 = vadd.f32 1e-06, %v1831_v8  ;;  %2534 = vst [vmem:[%s4744_s4 + $0x10] sm:$0xff] %v2518_v37 }
 0x206   : > { %v1875_v29 = vmul.f32 %v3499_v61, %v1874_v47  ;;  %v1881_v55 = vmul.f32 %v3501_v48, %v4751_v18  ;;  %v2434_v7 = vpop.f32.mrf.mxu2  ;;  %v2339_v19 = vpop.f32.mrf.mxu0  ;;  %vm1887_vm14 = vweird.f32 %v3501_v48 }
 0x207   : > { %2106 = vst [vmem:[%s4773_s25] sm:$0xff] %v2090_v45  ;;  %3502 = vrsqrt.f32 %v4767_v58  ;;  %v2435_v27 = vadd.f32 %v2434_v7, %v4732_v20  ;;  %v2483_v42 = vpop.f32.mrf.mxu3  ;;  %v2388_v57 = vpop.f32.mrf.mxu1  ;;  %v2340_v47 = vadd.f32 %v2339_v19, %v4718_v53  ;;  %vm1888_vm0 = vmor %vm1886_vm15, %vm1887_vm14  ;;  %vm1896_vm2 = vweird.f32 %v4767_v58 }
 0x208   : > { %v1879_v10 = vsel %vm1878_vm13, %v3499_v61, %v1875_v29  ;;  %v1882_v22 = vmul.f32 %v3501_v48, %v1881_v55 }
 0x209   : > { %v2022_v38 = vmul.f32 %v1879_v10, %v5184_v62  ;;  %v2023_v1 = vmul.f32 %v1879_v10, %v5185_v13  ;;  %v2484_v11 = vadd.f32 %v2483_v42, %v2435_v27 }
 0x20a   : > { %v1883_v8 = vmul.f32 0.5, %v1882_v22  ;;  %v1794_v37 = vpop.xlane.xlu1 %1793 }
 0x20b   : > { %v2060_v45 = vmul.f32 %v4754_v25, %v2022_v38  ;;  %v2061_v56 = vmul.f32 %v4757_v30, %v2023_v1  ;;  %v1832_v63 = vmul.f32 %v1794_v37, %v4368_v51  ;;  %v2519_v61 = vpack.c.bf16 %v2484_v11, %v2386_v40 }
 0x20c   : > { %v1884_v29 = vsub.f32 1.5, %v1883_v8  ;;  %v2389_v40 = vadd.f32 %v2388_v57, %v2340_v47  ;;  %v5186_v8 = vld [vmem:[#allocation34_spill] sm:$0xff] }
 0x20d   : > { %v3503_v55 = vpop.eup %3502  ;;  %v2091_v7 = vpack.c.bf16 %v2061_v56, %v2060_v45  ;;  %v4784_v62 = vadd.f32 1e-06, %v1832_v63  ;;  %2535 = vst [vmem:[%s4744_s4 + $0x18] sm:$0xff] %v2519_v61 }
 0x20e   : > { %v1885_v27 = vmul.f32 %v3501_v48, %v1884_v29  ;;  %v1891_v42 = vmul.f32 %v3503_v55, %v4767_v58  ;;  %v2437_v19 = vpop.f32.mrf.mxu2  ;;  %v2341_v38 = vpop.f32.mrf.mxu0  ;;  %vm1897_vm1 = vweird.f32 %v3503_v55 }
 0x20f   : > { %2107 = vst [vmem:[%s4773_s25 + $0x8] sm:$0xff] %v2091_v7  ;;  %3504 = vrsqrt.f32 %v4784_v62  ;;  %v2438_v10 = vadd.f32 %v2437_v19, %v4732_v20  ;;  %v2486_v22 = vpop.f32.mrf.mxu3  ;;  %v2390_v45 = vpop.f32.mrf.mxu1  ;;  %v2342_v61 = vadd.f32 %v2341_v38, %v4718_v53  ;;  %vm1898_vm3 = vmor %vm1896_vm2, %vm1897_vm1  ;;  %vm1906_vm5 = vweird.f32 %v4784_v62 }
 0x210   : > { %v1889_v13 = vsel %vm1888_vm0, %v3501_v48, %v1885_v27  ;;  %v1892_v1 = vmul.f32 %v3503_v55, %v1891_v42 }
 0x211   : > { %v2024_v11 = vmul.f32 %v1889_v13, %v4412_v5  ;;  %v2025_v37 = vmul.f32 %v1889_v13, %v5186_v8  ;;  %v2487_v18 = vadd.f32 %v2486_v22, %v2438_v10 }
 0x212   : > { %v1893_v56 = vmul.f32 0.5, %v1892_v1  ;;  %v1797_v63 = vpop.xlane.xlu2 %1796 }
 0x213   : > { %v2062_v29 = vmul.f32 %v4754_v25, %v2024_v11  ;;  %v2063_v57 = vmul.f32 %v4757_v30, %v2025_v37  ;;  %v1833_v47 = vmul.f32 %v1797_v63, %v4368_v51  ;;  %v2520_v48 = vpack.c.bf16 %v2487_v18, %v2389_v40 }
 0x214   : > { %v1894_v7 = vsub.f32 1.5, %v1893_v56  ;;  %v2391_v40 = vadd.f32 %v2390_v45, %v2342_v61 }
 0x215   : > { %v3505_v5 = vpop.eup %3504  ;;  %v2092_v27 = vpack.c.bf16 %v2063_v57, %v2062_v29  ;;  %v4798_v42 = vadd.f32 1e-06, %v1833_v47  ;;  %2536 = vst [vmem:[%s4744_s4 + $0x20] sm:$0xff] %v2520_v48 }
 0x216   : > { %v1895_v19 = vmul.f32 %v3503_v55, %v1894_v7  ;;  %v1901_v10 = vmul.f32 %v3505_v5, %v4784_v62  ;;  %v2439_v22 = vpop.f32.mrf.mxu2  ;;  %v2344_v1 = vpop.f32.mrf.mxu0  ;;  %vm1907_vm4 = vweird.f32 %v3505_v5 }
 0x217   : > { %2108 = vst [vmem:[%s4773_s25 + $0x10] sm:$0xff] %v2092_v27  ;;  %3506 = vrsqrt.f32 %v4798_v42  ;;  %v2440_v38 = vadd.f32 %v2439_v22, %v4732_v20  ;;  %v2488_v13 = vpop.f32.mrf.mxu3  ;;  %v2393_v56 = vpop.f32.mrf.mxu1  ;;  %v2345_v57 = vadd.f32 %v2344_v1, %v4718_v53  ;;  %vm1908_vm6 = vmor %vm1906_vm5, %vm1907_vm4  ;;  %vm1916_vm8 = vweird.f32 %v4798_v42 }
 0x218   : > { %v1899_v11 = vsel %vm1898_vm3, %v3503_v55, %v1895_v19  ;;  %v1902_v8 = vmul.f32 %v3505_v5, %v1901_v10 }
 0x219   : > { %v2026_v37 = vmul.f32 %v1899_v11, %v4442_v36  ;;  %v2027_v18 = vmul.f32 %v1899_v11, %v4452_v2  ;;  %v2489_v58 = vadd.f32 %v2488_v13, %v2440_v38  ;;  %v2394_v38 = vadd.f32 %v2393_v56, %v2345_v57 }
 0x21a   : > { %v1903_v63 = vmul.f32 0.5, %v1902_v8  ;;  %v1800_v29 = vpop.xlane.xlu0 %1799 }
 0x21b   : > { %v2064_v47 = vmul.f32 %v4754_v25, %v2026_v37  ;;  %v2065_v45 = vmul.f32 %v4757_v30, %v2027_v18  ;;  %v1834_v61 = vmul.f32 %v1800_v29, %v4368_v51  ;;  %v2521_v55 = vpack.c.bf16 %v2489_v58, %v2391_v40 }
 0x21c   : > { %v1904_v48 = vsub.f32 1.5, %v1903_v63 }
 0x21d   : > { %v3507_v36 = vpop.eup %3506  ;;  %v2093_v7 = vpack.c.bf16 %v2065_v45, %v2064_v47  ;;  %v4812_v27 = vadd.f32 1e-06, %v1834_v61  ;;  %2537 = vst [vmem:[%s4744_s4 + $0x28] sm:$0xff] %v2521_v55 }
 0x21e   : > { %v1905_v2 = vmul.f32 %v3505_v5, %v1904_v48  ;;  %v1911_v19 = vmul.f32 %v3507_v36, %v4798_v42  ;;  %v2442_v10 = vpop.f32.mrf.mxu2  ;;  %v2346_v13 = vpop.f32.mrf.mxu0  ;;  %vm1917_vm7 = vweird.f32 %v3507_v36 }
 0x21f   : > { %2109 = vst [vmem:[%s4773_s25 + $0x18] sm:$0xff] %v2093_v7  ;;  %3508 = vrsqrt.f32 %v4812_v27  ;;  %v2443_v22 = vadd.f32 %v2442_v10, %v4732_v20  ;;  %v2491_v40 = vpop.f32.mrf.mxu3  ;;  %v2395_v18 = vpop.f32.mrf.mxu1  ;;  %v2347_v29 = vadd.f32 %v2346_v13, %v4718_v53  ;;  %vm1918_vm9 = vmor %vm1916_vm8, %vm1917_vm7  ;;  %vm1926_vm11 = vweird.f32 %v4812_v27 }
 0x220   : > { %v1909_v1 = vsel %vm1908_vm6, %v3505_v5, %v1905_v2  ;;  %v1912_v11 = vmul.f32 %v3507_v36, %v1911_v19 }
 0x221   : > { %v2028_v8 = vmul.f32 %v1909_v1, %v4466_v4  ;;  %v2029_v37 = vmul.f32 %v1909_v1, %v4479_v34  ;;  %v2492_v62 = vadd.f32 %v2491_v40, %v2443_v22  ;;  %v2396_v19 = vadd.f32 %v2395_v18, %v2347_v29 }
 0x222   : > { %v1913_v58 = vmul.f32 0.5, %v1912_v11  ;;  %v1803_v63 = vpop.xlane.xlu1 %1802 }
 0x223   : > { %v2066_v47 = vmul.f32 %v4754_v25, %v2028_v8  ;;  %v2067_v56 = vmul.f32 %v4757_v30, %v2029_v37  ;;  %v1835_v57 = vmul.f32 %v1803_v63, %v4368_v51  ;;  %v2522_v5 = vpack.c.bf16 %v2492_v62, %v2394_v38 }
 0x224   : > { %v1914_v45 = vsub.f32 1.5, %v1913_v58 }
 0x225   : > { %v3509_v4 = vpop.eup %3508  ;;  %v2094_v61 = vpack.c.bf16 %v2067_v56, %v2066_v47  ;;  %v4826_v55 = vadd.f32 1e-06, %v1835_v57  ;;  %2538 = vst [vmem:[%s4744_s4 + $0x30] sm:$0xff] %v2522_v5 }
 0x226   : > { %v1915_v34 = vmul.f32 %v3507_v36, %v1914_v45  ;;  %v1921_v48 = vmul.f32 %v3509_v4, %v4812_v27  ;;  %v2444_v7 = vpop.f32.mrf.mxu2  ;;  %v2349_v22 = vpop.f32.mrf.mxu0  ;;  %vm1927_vm10 = vweird.f32 %v3509_v4 }
 0x227   : > { %2110 = vst [vmem:[%s4773_s25 + $0x20] sm:$0xff] %v2094_v61  ;;  %3510 = vrsqrt.f32 %v4826_v55  ;;  %v2445_v2 = vadd.f32 %v2444_v7, %v4732_v20  ;;  %v2493_v10 = vpop.f32.mrf.mxu3  ;;  %v2398_v11 = vpop.f32.mrf.mxu1  ;;  %v2350_v62 = vadd.f32 %v2349_v22, %v4718_v53  ;;  %vm1928_vm12 = vmor %vm1926_vm11, %vm1927_vm10  ;;  %vm1936_vm14 = vweird.f32 %v4826_v55 }
 0x228   : > { %v1919_v38 = vsel %vm1918_vm9, %v3507_v36, %v1915_v34  ;;  %v1922_v40 = vmul.f32 %v3509_v4, %v1921_v48 }
 0x229   : > { %v2030_v13 = vmul.f32 %v1919_v38, %v4491_v23  ;;  %v2031_v1 = vmul.f32 %v1919_v38, %v4498_v14  ;;  %v2494_v42 = vadd.f32 %v2493_v10, %v2445_v2  ;;  %v2399_v61 = vadd.f32 %v2398_v11, %v2350_v62 }
 0x22a   : > { %v1923_v8 = vmul.f32 0.5, %v1922_v40  ;;  %v1806_v37 = vpop.xlane.xlu2 %1805 }
 0x22b   : > { %v2068_v58 = vmul.f32 %v4754_v25, %v2030_v13  ;;  %v2069_v18 = vmul.f32 %v4757_v30, %v2031_v1  ;;  %v1836_v63 = vmul.f32 %v1806_v37, %v4368_v51  ;;  %v2523_v36 = vpack.c.bf16 %v2494_v42, %v2396_v19 }
 0x22c   : > { %v1924_v29 = vsub.f32 1.5, %v1923_v8 }
 0x22d   : > { %v3511_v23 = vpop.eup %3510  ;;  %v2095_v47 = vpack.c.bf16 %v2069_v18, %v2068_v58  ;;  %v4840_v56 = vadd.f32 1e-06, %v1836_v63  ;;  %2539 = vst [vmem:[%s4744_s4 + $0x38] sm:$0xff] %v2523_v36 }
 0x22e   : > { %v1925_v14 = vmul.f32 %v3509_v4, %v1924_v29  ;;  %v1931_v57 = vmul.f32 %v3511_v23, %v4826_v55  ;;  %v2447_v5 = vpop.f32.mrf.mxu2  ;;  %v2351_v48 = vpop.f32.mrf.mxu0  ;;  %vm1937_vm13 = vweird.f32 %v3511_v23 }
 0x22f   : > { %2111 = vst [vmem:[%s4773_s25 + $0x28] sm:$0xff] %v2095_v47  ;;  %3512 = vrsqrt.f32 %v4840_v56  ;;  %v2448_v45 = vadd.f32 %v2447_v5, %v4732_v20  ;;  %v2496_v34 = vpop.f32.mrf.mxu3  ;;  %v2400_v22 = vpop.f32.mrf.mxu1  ;;  %v2352_v13 = vadd.f32 %v2351_v48, %v4718_v53  ;;  %vm1938_vm15 = vmor %vm1936_vm14, %vm1937_vm13  ;;  %vm1946_vm1 = vweird.f32 %v4840_v56 }
 0x230   : > { %v1929_v7 = vsel %vm1928_vm12, %v3509_v4, %v1925_v14  ;;  %v1932_v2 = vmul.f32 %v3511_v23, %v1931_v57 }
 0x231   : > { %v2032_v19 = vmul.f32 %v1929_v7, %v4512_v33  ;;  %v2033_v10 = vmul.f32 %v1929_v7, %v4525_v41  ;;  %v2497_v27 = vadd.f32 %v2496_v34, %v2448_v45  ;;  %v2401_v36 = vadd.f32 %v2400_v22, %v2352_v13 }
 0x232   : > { %v1933_v38 = vmul.f32 0.5, %v1932_v2  ;;  %v1809_v40 = vpop.xlane.xlu0 %1808 }
 0x233   : > { %v2070_v1 = vmul.f32 %v4754_v25, %v2032_v19  ;;  %v2071_v42 = vmul.f32 %v4757_v30, %v2033_v10  ;;  %v1837_v11 = vmul.f32 %v1809_v40, %v4368_v51  ;;  %v2524_v4 = vpack.c.bf16 %v2497_v27, %v2399_v61 }
 0x234   : > { %v1934_v8 = vsub.f32 1.5, %v1933_v38 }
 0x235   : > { %v3513_v33 = vpop.eup %3512  ;;  %v2096_v37 = vpack.c.bf16 %v2071_v42, %v2070_v1  ;;  %v4854_v62 = vadd.f32 1e-06, %v1837_v11  ;;  %2540 = vst [vmem:[%s4744_s4 + $0x40] sm:$0xff] %v2524_v4 }
 0x236   : > { %v1935_v41 = vmul.f32 %v3511_v23, %v1934_v8  ;;  %v1941_v58 = vmul.f32 %v3513_v33, %v4840_v56  ;;  %v2449_v18 = vpop.f32.mrf.mxu2  ;;  %v2354_v47 = vpop.f32.mrf.mxu0  ;;  %vm1947_vm0 = vweird.f32 %v3513_v33 }
 0x237   : > { %2112 = vst [vmem:[%s4773_s25 + $0x30] sm:$0xff] %v2096_v37  ;;  %3514 = vrsqrt.f32 %v4854_v62  ;;  %v2450_v63 = vadd.f32 %v2449_v18, %v4732_v20  ;;  %v2498_v29 = vpop.f32.mrf.mxu3  ;;  %v2403_v61 = vpop.f32.mrf.mxu1  ;;  %v2355_v7 = vadd.f32 %v2354_v47, %v4718_v53  ;;  %vm1948_vm2 = vmor %vm1946_vm1, %vm1947_vm0  ;;  %vm1956_vm4 = vweird.f32 %v4854_v62 }
 0x238   : > { %v1939_v14 = vsel %vm1938_vm15, %v3511_v23, %v1935_v41  ;;  %v1942_v57 = vmul.f32 %v3513_v33, %v1941_v58 }
 0x239   : > { %v2034_v5 = vmul.f32 %v1939_v14, %v4537_v52  ;;  %v2035_v45 = vmul.f32 %v1939_v14, %v4544_v44  ;;  %v2499_v55 = vadd.f32 %v2498_v29, %v2450_v63  ;;  %v2404_v42 = vadd.f32 %v2403_v61, %v2355_v7 }
 0x23a   : > { %v1943_v34 = vmul.f32 0.5, %v1942_v57  ;;  %v1812_v48 = vpop.xlane.xlu1 %1811 }
 0x23b   : > { %v2072_v2 = vmul.f32 %v4754_v25, %v2034_v5  ;;  %v2073_v19 = vmul.f32 %v4757_v30, %v2035_v45  ;;  %v1838_v10 = vmul.f32 %v1812_v48, %v4368_v51  ;;  %v2525_v23 = vpack.c.bf16 %v2499_v55, %v2401_v36 }
 0x23c   : > { %v1944_v27 = vsub.f32 1.5, %v1943_v34 }
 0x23d   : > { %v3515_v52 = vpop.eup %3514  ;;  %v2097_v22 = vpack.c.bf16 %v2073_v19, %v2072_v2  ;;  %v4868_v38 = vadd.f32 1e-06, %v1838_v10  ;;  %2541 = vst [vmem:[%s4744_s4 + $0x48] sm:$0xff] %v2525_v23 }
 0x23e   : > { %v1945_v44 = vmul.f32 %v3513_v33, %v1944_v27  ;;  %v1951_v40 = vmul.f32 %v3515_v52, %v4854_v62  ;;  %v2452_v13 = vpop.f32.mrf.mxu2  ;;  %v2356_v4 = vpop.f32.mrf.mxu0  ;;  %vm1957_vm3 = vweird.f32 %v3515_v52 }
 0x23f   : > { %2113 = vst [vmem:[%s4773_s25 + $0x38] sm:$0xff] %v2097_v22  ;;  %3516 = vrsqrt.f32 %v4868_v38  ;;  %v2453_v1 = vadd.f32 %v2452_v13, %v4732_v20  ;;  %v2501_v11 = vpop.f32.mrf.mxu3  ;;  %v2405_v18 = vpop.f32.mrf.mxu1  ;;  %v2357_v29 = vadd.f32 %v2356_v4, %v4718_v53  ;;  %vm1958_vm5 = vmor %vm1956_vm4, %vm1957_vm3  ;;  %vm1966_vm7 = vweird.f32 %v4868_v38 }
 0x240   : > { %v1949_v8 = vsel %vm1948_vm2, %v3513_v33, %v1945_v44  ;;  %v1952_v37 = vmul.f32 %v3515_v52, %v1951_v40 }
 0x241   : > { %v2036_v41 = vmul.f32 %v1949_v8, %v4558_v50  ;;  %v2037_v58 = vmul.f32 %v1949_v8, %v4571_v15  ;;  %v2502_v56 = vadd.f32 %v2501_v11, %v2453_v1  ;;  %v2406_v7 = vadd.f32 %v2405_v18, %v2357_v29 }
 0x242   : > { %v1953_v63 = vmul.f32 0.5, %v1952_v37  ;;  %v1815_v36 = vpop.xlane.xlu2 %1814 }
 0x243   : > { %v2074_v47 = vmul.f32 %v4754_v25, %v2036_v41  ;;  %v2075_v14 = vmul.f32 %v4757_v30, %v2037_v58  ;;  %v1839_v57 = vmul.f32 %v1815_v36, %v4368_v51  ;;  %v2526_v33 = vpack.c.bf16 %v2502_v56, %v2404_v42 }
 0x244   : > { %v1954_v5 = vsub.f32 1.5, %v1953_v63 }
 0x245   : > { %v3517_v50 = vpop.eup %3516  ;;  %v2098_v45 = vpack.c.bf16 %v2075_v14, %v2074_v47  ;;  %v4882_v55 = vadd.f32 1e-06, %v1839_v57  ;;  %2542 = vst [vmem:[%s4744_s4 + $0x50] sm:$0xff] %v2526_v33 }
 0x246   : > { %v1955_v15 = vmul.f32 %v3515_v52, %v1954_v5  ;;  %v1961_v61 = vmul.f32 %v3517_v50, %v4868_v38  ;;  %v2454_v34 = vpop.f32.mrf.mxu2  ;;  %v2359_v19 = vpop.f32.mrf.mxu0  ;;  %vm1967_vm6 = vweird.f32 %v3517_v50 }
 0x247   : > { %2114 = vst [vmem:[%s4773_s25 + $0x40] sm:$0xff] %v2098_v45  ;;  %3518 = vrsqrt.f32 %v4882_v55  ;;  %v2455_v48 = vadd.f32 %v2454_v34, %v4732_v20  ;;  %v2503_v2 = vpop.f32.mrf.mxu3  ;;  %v2408_v44 = vpop.f32.mrf.mxu1  ;;  %v2360_v1 = vadd.f32 %v2359_v19, %v4718_v53  ;;  %vm1968_vm8 = vmor %vm1966_vm7, %vm1967_vm6  ;;  %vm1976_vm10 = vweird.f32 %v4882_v55 }
 0x248   : > { %v1959_v10 = vsel %vm1958_vm5, %v3515_v52, %v1955_v15  ;;  %v1962_v23 = vmul.f32 %v3517_v50, %v1961_v61 }
 0x249   : > { %v2038_v27 = vmul.f32 %v1959_v10, %v4583_v35  ;;  %v2039_v22 = vmul.f32 %v1959_v10, %v4590_v39  ;;  %v2504_v62 = vadd.f32 %v2503_v2, %v2455_v48  ;;  %v2409_v63 = vadd.f32 %v2408_v44, %v2360_v1 }
 0x24a   : > { %v1963_v40 = vmul.f32 0.5, %v1962_v23  ;;  %v1818_v13 = vpop.xlane.xlu0 %1817 }
 0x24b   : > { %v2076_v42 = vmul.f32 %v4754_v25, %v2038_v27  ;;  %v2077_v11 = vmul.f32 %v4757_v30, %v2039_v22  ;;  %v1840_v4 = vmul.f32 %v1818_v13, %v4368_v51  ;;  %v2527_v52 = vpack.c.bf16 %v2504_v62, %v2406_v7 }
 0x24c   : > { %v1964_v8 = vsub.f32 1.5, %v1963_v40 }
 0x24d   : > { %v3519_v35 = vpop.eup %3518  ;;  %v2099_v37 = vpack.c.bf16 %v2077_v11, %v2076_v42  ;;  %v4896_v41 = vadd.f32 1e-06, %v1840_v4  ;;  %2543 = vst [vmem:[%s4744_s4 + $0x58] sm:$0xff] %v2527_v52 }
 0x24e   : > { %v1965_v39 = vmul.f32 %v3517_v50, %v1964_v8  ;;  %v1971_v58 = vmul.f32 %v3519_v35, %v4882_v55  ;;  %v2457_v56 = vpop.f32.mrf.mxu2  ;;  %v2361_v29 = vpop.f32.mrf.mxu0  ;;  %vm1977_vm9 = vweird.f32 %v3519_v35 }
 0x24f   : > { %2115 = vst [vmem:[%s4773_s25 + $0x48] sm:$0xff] %v2099_v37  ;;  %3520 = vrsqrt.f32 %v4896_v41  ;;  %v2458_v18 = vadd.f32 %v2457_v56, %v4732_v20  ;;  %v2506_v36 = vpop.f32.mrf.mxu3  ;;  %v2410_v7 = vpop.f32.mrf.mxu1  ;;  %vm1978_vm11 = vmor %vm1976_vm10, %vm1977_vm9  ;;  %vm1986_vm13 = vweird.f32 %v4896_v41 }
 0x250   : > { %v1969_v47 = vsel %vm1968_vm8, %v3517_v50, %v1965_v39  ;;  %v1972_v14 = vmul.f32 %v3519_v35, %v1971_v58  ;;  %v2362_v50 = vadd.f32 %v2361_v29, %v4718_v53 }
 0x251   : > { %v2040_v57 = vmul.f32 %v1969_v47, %v4604_v59  ;;  %v2041_v33 = vmul.f32 %v1969_v47, %v4617_v54  ;;  %v2507_v38 = vadd.f32 %v2506_v36, %v2458_v18 }
 0x252   : > { %v1973_v5 = vmul.f32 0.5, %v1972_v14  ;;  %v1821_v45 = vpop.xlane.xlu1 %1820  ;;  %v2411_v13 = vadd.f32 %v2410_v7, %v2362_v50 }
 0x253   : > { %v2078_v15 = vmul.f32 %v4754_v25, %v2040_v57  ;;  %v2079_v61 = vmul.f32 %v4757_v30, %v2041_v33  ;;  %v1841_v34 = vmul.f32 %v1821_v45, %v4368_v51  ;;  %v2528_v48 = vpack.c.bf16 %v2507_v38, %v2409_v63 }
 0x254   : > { %v1974_v2 = vsub.f32 1.5, %v1973_v5 }
 0x255   : > { %v3521_v59 = vpop.eup %3520  ;;  %v2100_v19 = vpack.c.bf16 %v2079_v61, %v2078_v15  ;;  %v4910_v10 = vadd.f32 1e-06, %v1841_v34  ;;  %2544 = vst [vmem:[%s4744_s4 + $0x60] sm:$0xff] %v2528_v48 }
 0x256   : > { %v1975_v54 = vmul.f32 %v3519_v35, %v1974_v2  ;;  %v1981_v23 = vmul.f32 %v3521_v59, %v4896_v41  ;;  %v2459_v27 = vpop.f32.mrf.mxu2  ;;  %v2364_v4 = vpop.f32.mrf.mxu0  ;;  %vm1987_vm12 = vweird.f32 %v3521_v59 }
 0x257   : > { %2116 = vst [vmem:[%s4773_s25 + $0x50] sm:$0xff] %v2100_v19  ;;  %3522 = vrsqrt.f32 %v4910_v10  ;;  %v2460_v22 = vadd.f32 %v2459_v27, %v4732_v20  ;;  %v2508_v62 = vpop.f32.mrf.mxu3  ;;  %v2413_v47 = vpop.f32.mrf.mxu1  ;;  %vm1988_vm14 = vmor %vm1986_vm13, %vm1987_vm12  ;;  %vm1996_vm0 = vweird.f32 %v4910_v10 }
 0x258   : > { %v1979_v44 = vsel %vm1978_vm11, %v3519_v35, %v1975_v54  ;;  %v1982_v40 = vmul.f32 %v3521_v59, %v1981_v23 }
 0x259   : > { %v2042_v1 = vmul.f32 %v1979_v44, %v4629_v32  ;;  %v2043_v42 = vmul.f32 %v1979_v44, %v4636_v60  ;;  %v2509_v11 = vadd.f32 %v2508_v62, %v2460_v22  ;;  %v2365_v60 = vadd.f32 %v2364_v4, %v4718_v53 }
 0x25a   : > { %v1983_v55 = vmul.f32 0.5, %v1982_v40  ;;  %v1824_v52 = vpop.xlane.xlu2 %1823  ;;  %v1052_v8 = vpop.xlane.xlu1 %1051 }
 0x25b   : > { %v2080_v37 = vmul.f32 %v4754_v25, %v2042_v1  ;;  %v2081_v39 = vmul.f32 %v4757_v30, %v2043_v42  ;;  %v1842_v58 = vmul.f32 %v1824_v52, %v4368_v51  ;;  %v1075_v35 = vmul.f32 %v4368_v51, %v1052_v8 }
 0x25c   : > { %v1984_v56 = vsub.f32 1.5, %v1983_v55  ;;  %v2529_v32 = vpack.c.bf16 %v2509_v11, %v2411_v13  ;;  %v2414_v61 = vadd.f32 %v2413_v47, %v2365_v60 }
 0x25d   : > { %v3523_v18 = vpop.eup %3522  ;;  %v2101_v63 = vpack.c.bf16 %v2081_v39, %v2080_v37  ;;  %v4925_v36 = vadd.f32 1e-06, %v1842_v58  ;;  %v4927_v29 = vadd.f32 1e-06, %v1075_v35 }
 0x25e   : > { %v1985_v14 = vmul.f32 %v3521_v59, %v1984_v56  ;;  %v1991_v57 = vmul.f32 %v3523_v18, %v4910_v10  ;;  %2545 = vst [vmem:[%s4744_s4 + $0x68] sm:$0xff] %v2529_v32  ;;  %v2462_v33 = vpop.f32.mrf.mxu2  ;;  %v2366_v27 = vpop.f32.mrf.mxu0  ;;  %vm1997_vm15 = vweird.f32 %v3523_v18 }
 0x25f   : > { %2117 = vst [vmem:[%s4773_s25 + $0x58] sm:$0xff] %v2101_v63  ;;  %3524 = vrsqrt.f32 %v4925_v36  ;;  %v2463_v38 = vadd.f32 %v2462_v33, %v4732_v20  ;;  %v2511_v5 = vpop.f32.mrf.mxu3  ;;  %v2367_v11 = vadd.f32 %v2366_v27, %v4718_v53  ;;  %vm1998_vm1 = vmor %vm1996_vm0, %vm1997_vm15  ;;  %v2415_v52 = vpop.f32.mrf.mxu1  ;;  %vm2006_vm4 = vweird.f32 %v4925_v36 }
 0x260   : > { %v1989_v45 = vsel %vm1988_vm14, %v3521_v59, %v1985_v14  ;;  %v1992_v15 = vmul.f32 %v3523_v18, %v1991_v57  ;;  %3526 = vrsqrt.f32 %v4927_v29  ;;  %vm1248_vm6 = vweird.f32 %v4927_v29 }
 0x261   : > { %v2044_v34 = vmul.f32 %v1989_v45, %v4650_v49  ;;  %v2045_v41 = vmul.f32 %v1989_v45, %v4663_v6  ;;  %v2512_v48 = vadd.f32 %v2511_v5, %v2463_v38  ;;  %v2416_v60 = vadd.f32 %v2415_v52, %v2367_v11 }
 0x262   : > { %v1993_v7 = vmul.f32 0.5, %v1992_v15  ;;  %v1046_v2 = vpop.xlane.xlu2 %1045  ;;  %v1827_v50 = vpop.xlane.xlu0 %1826 }
 0x263   : > { %v2082_v19 = vmul.f32 %v4754_v25, %v2044_v34  ;;  %v2083_v54 = vmul.f32 %v4757_v30, %v2045_v41  ;;  %v1073_v23 = vmul.f32 %v4368_v51, %v1046_v2  ;;  %v1843_v59 = vmul.f32 %v1827_v50, %v4368_v51 }
 0x264   : > { %v1994_v22 = vsub.f32 1.5, %v1993_v7  ;;  %v2530_v49 = vpack.c.bf16 %v2512_v48, %v2414_v61 }
 0x265   : > { %v3525_v62 = vpop.eup %3524  ;;  %v2102_v6 = vpack.c.bf16 %v2083_v54, %v2082_v19  ;;  %v4942_v44 = vadd.f32 1e-06, %v1073_v23  ;;  %v4944_v40 = vadd.f32 1e-06, %v1843_v59 }
 0x266   : > { %v3527_v13 = vpop.eup %3526  ;;  %v1995_v1 = vmul.f32 %v3523_v18, %v1994_v22  ;;  %v2001_v42 = vmul.f32 %v3525_v62, %v4925_v36  ;;  %2546 = vst [vmem:[%s4744_s4 + $0x70] sm:$0xff] %v2530_v49  ;;  %v2464_v4 = vpop.f32.mrf.mxu2  ;;  %vm2007_vm2 = vweird.f32 %v3525_v62 }
 0x267   : > { %2118 = vst [vmem:[%s4773_s25 + $0x60] sm:$0xff] %v2102_v6  ;;  %v1243_v55 = vmul.f32 %v3527_v13, %v4927_v29  ;;  %3528 = vrsqrt.f32 %v4942_v44  ;;  %v2465_v35 = vadd.f32 %v2464_v4, %v4732_v20  ;;  %v2513_v53 = vpop.f32.mrf.mxu3  ;;  %vm1249_vm3 = vweird.f32 %v3527_v13  ;;  %vm2008_vm5 = vmor %vm2006_vm4, %vm2007_vm2 }
 0x268   : > { %v1999_v8 = vsel %vm1998_vm1, %v3523_v18, %v1995_v1  ;;  %v2002_v37 = vmul.f32 %v3525_v62, %v2001_v42  ;;  %3530 = vrsqrt.f32 %v4944_v40  ;;  %vm1250_vm7 = vmor %vm1248_vm6, %vm1249_vm3  ;;  %vm1228_vm10 = vweird.f32 %v4942_v44 }
 0x269   : > { %v2046_v39 = vmul.f32 %v1999_v8, %v4673_v16  ;;  %v2047_v10 = vmul.f32 %v1999_v8, %v4678_v9  ;;  %v1244_v58 = vmul.f32 %v3527_v13, %v1243_v55  ;;  %v2514_v16 = vadd.f32 %v2513_v53, %v2465_v35  ;;  %v5190_v35 = vld [vmem:[#allocation29_spill] sm:$0xff] }
 0x26a   : > { %v2003_v56 = vmul.f32 0.5, %v2002_v37  ;;  %v1049_v32 = vpop.xlane.xlu0 %1048  ;;  %vm2016_vm12 = vweird.f32 %v4944_v40 }
 0x26b   : > { %v2084_v63 = vmul.f32 %v4754_v25, %v2046_v39  ;;  %v2085_v47 = vmul.f32 %v4757_v30, %v2047_v10  ;;  %v1245_v18 = vmul.f32 0.5, %v1244_v58  ;;  %v1074_v14 = vmul.f32 %v4368_v51, %v1049_v32 }
 0x26c   : > { %v2004_v57 = vsub.f32 1.5, %v2003_v56  ;;  %v2531_v61 = vpack.c.bf16 %v2514_v16, %v2416_v60 }
 0x26d   : > { %v3529_v33 = vpop.eup %3528  ;;  %v2103_v9 = vpack.c.bf16 %v2085_v47, %v2084_v63  ;;  %v1246_v38 = vsub.f32 1.5, %v1245_v18  ;;  %v4960_v20 = vadd.f32 1e-06, %v1074_v14 }
 0x26e   : > { %v3531_v5 = vpop.eup %3530  ;;  %v2005_v45 = vmul.f32 %v3525_v62, %v2004_v57  ;;  %v1223_v15 = vmul.f32 %v3529_v33, %v4942_v44  ;;  %2547 = vst [vmem:[%s4744_s4 + $0x78] sm:$0xff] %v2531_v61  ;;  %vm1229_vm8 = vweird.f32 %v3529_v33 }
 0x26f   : > { %2119 = vst [vmem:[%s4773_s25 + $0x68] sm:$0xff] %v2103_v9  ;;  %v1247_v51 = vmul.f32 %v3527_v13, %v1246_v38  ;;  %v2011_v34 = vmul.f32 %v3531_v5, %v4944_v40  ;;  %3532 = vrsqrt.f32 %v4960_v20  ;;  %vm2017_vm9 = vweird.f32 %v3531_v5  ;;  %vm1230_vm11 = vmor %vm1228_vm10, %vm1229_vm8 }
 0x270   : > { %v2009_v41 = vsel %vm2008_vm5, %v3525_v62, %v2005_v45  ;;  %v1224_v48 = vmul.f32 %v3529_v33, %v1223_v15  ;;  %vm2018_vm13 = vmor %vm2016_vm12, %vm2017_vm9  ;;  %vm1238_vm15 = vweird.f32 %v4960_v20 }
 0x271   : > { %v2048_v7 = vmul.f32 %v2009_v41, %v4691_v26  ;;  %v2049_v36 = vmul.f32 %v2009_v41, %v4702_v3  ;;  %v1251_v2 = vsel %vm1250_vm7, %v3527_v13, %v1247_v51  ;;  %v2012_v50 = vmul.f32 %v3531_v5, %v2011_v34 }
 0x272   : > { %v1282_v19 = vmul.f32 %v1251_v2, %v4360_v24  ;;  %v1283_v54 = vmul.f32 %v1251_v2, %v4370_v0  ;;  %v1225_v29 = vmul.f32 0.5, %v1224_v48 }
 0x273   : > { %v2086_v23 = vmul.f32 %v4754_v25, %v2048_v7  ;;  %v2087_v59 = vmul.f32 %v4757_v30, %v2049_v36  ;;  %v2013_v27 = vmul.f32 0.5, %v2012_v50 }
 0x274   : > { %v1320_v22 = vmul.f32 %v4417_v17, %v1282_v19  ;;  %v1321_v26 = vmul.f32 %v4419_v21, %v1283_v54  ;;  %v1226_v3 = vsub.f32 1.5, %v1225_v29 }
 0x275   : > { %v3533_v49 = vpop.eup %3532  ;;  %v2104_v62 = vpack.c.bf16 %v2087_v59, %v2086_v23  ;;  %v2014_v24 = vsub.f32 1.5, %v2013_v27 }
 0x276   : > { %v1337_v0 = vpack.c.bf16 %v1321_v26, %v1320_v22  ;;  %v1227_v6 = vmul.f32 %v3529_v33, %v1226_v3  ;;  %v1233_v13 = vmul.f32 %v3533_v49, %v4960_v20  ;;  %vm1239_vm14 = vweird.f32 %v3533_v49 }
 0x277   : > { %2120 = vst [vmem:[%s4773_s25 + $0x70] sm:$0xff] %v2104_v62  ;;  %v2015_v1 = vmul.f32 %v3531_v5, %v2014_v24  ;;  %vm1240_vm0 = vmor %vm1238_vm15, %vm1239_vm14 }
 0x278   : > { %1353 = vst [vmem:[%s4445_s13 + $0x78] sm:$0xff] %v1337_v0  ;;  %v1231_v42 = vsel %vm1230_vm11, %v3529_v33, %v1227_v6  ;;  %v1234_v11 = vmul.f32 %v3533_v49, %v1233_v13 }
 0x279   : > { %v1278_v4 = vmul.f32 %v1231_v42, %v5179_v12  ;;  %v1279_v44 = vmul.f32 %v1231_v42, %v5178_v43  ;;  %v2019_v55 = vsel %vm2018_vm13, %v3531_v5, %v2015_v1 }
 0x27a   : > { %v2050_v40 = vmul.f32 %v2019_v55, %v4711_v28  ;;  %v2051_v52 = vmul.f32 %v2019_v55, %v4720_v31  ;;  %v1235_v8 = vmul.f32 0.5, %v1234_v11 }
 0x27b   : > { %v1316_v37 = vmul.f32 %v4417_v17, %v1278_v4  ;;  %v1317_v12 = vmul.f32 %v4419_v21, %v1279_v44 }
 0x27c   : > { %v2088_v43 = vmul.f32 %v4754_v25, %v2050_v40  ;;  %v2089_v39 = vmul.f32 %v4757_v30, %v2051_v52  ;;  %v1236_v10 = vsub.f32 1.5, %v1235_v8 }
 0x27d   : > { %v1335_v28 = vpack.c.bf16 %v1317_v12, %v1316_v37 }
 0x27e   : > { %v2105_v31 = vpack.c.bf16 %v2089_v39, %v2088_v43  ;;  %v1237_v58 = vmul.f32 %v3533_v49, %v1236_v10 }
 0x27f   : > { %1351 = vst [vmem:[%s4445_s13 + $0x68] sm:$0xff] %v1335_v28 }
 0x280   : > { %2121 = vst [vmem:[%s4773_s25 + $0x78] sm:$0xff] %v2105_v31  ;;  %v1241_v25 = vsel %vm1240_vm0, %v3533_v49, %v1237_v58 }
 0x281   : > { %v1280_v30 = vmul.f32 %v1241_v25, %v5180_v46  ;;  %v1281_v53 = vmul.f32 %v1241_v25, %v5190_v35 }
 0x282   : > { %3741 = shalt.err (!%p3738_p13)
}
 0x283   : > { %s3880_s23 = smov 128   ;;  %s5191_s12 = sld [smem:[#allocation35_spill]] }
 0x284   : > { %s3881_s0 = smov 8   ;;  %s3762_s14 = scalar_lea.hbm %s5187_s6, 256 }
 0x285   : > { %3361 = dma.vmem_to_hbm [thread:$0]  (%p4041_p4), %s5013_s27, 2048, %s2597_s9, %s5028_s15, %s3880_s23, %s3880_s23, %s3881_s0  }
 0x289   : > { %s5192_s30 = int_to_ptr.hbm [resolvable:$true] %s5191_s12 }
 0x28a   : > { %s3756_s4 = sshra.s32 %s5192_s30, 4  ;;  %s3757_s4 = int_to_ptr.hbm [resolvable:$true] %s3756_s4 }
 0x28b   : > { %s3758_s7 = scalar_lea.hbm %s3757_s4, 128  ;;  %p3763_p8 = scmp.lt.s32.totalorder %s3757_s4, %s5187_s6 }
 0x28c   : > { %p3759_p0 = scmp.ne.s32.totalorder %s3757_s4, %s3758_s7  ;;  %p3764_p1 = scmp.lt.s32.totalorder %s3762_s14, %s3758_s7 }
 0x28e   : > { %p3760_p2 = pnand %p3759_p0, %p4041_p4  ;;  %p3765_p3 = por %p3764_p1, %p3763_p8 }
 0x290   : > { %p3761_p5 = pneg %p3760_p2 }
 0x292   : > { %p3766_p9 = pnand %p3765_p3, %p3761_p5 }
 0x294   : > { %3769 = shalt.err (!%p3766_p9)
}
 0x295   : > { %s5193_s27 = smov %s5192_s30  ;;  %v1318_v46 = vmul.f32 %v4417_v17, %v1280_v30  ;;  %v1319_v56 = vmul.f32 %v4419_v21, %v1281_v53  ;;  %s5194_s3 = sshll.u32 %s4445_s13, 4  ;;  %s2575_s3 = int_to_ptr.vmem [resolvable:$true] %s5194_s3 }
 0x296   : > { %3362 = dma.vmem_to_hbm [thread:$0]  (%p4041_p4), %s5018_s29, 2048, %s5193_s27, %s5028_s15, %s3880_s23, %s3880_s23, %s3881_s0  }
 0x297   : > { %v1336_v32 = vpack.c.bf16 %v1319_v56, %v1318_v46  ;;  %s2549_s9 = scalar_lea.sflag [#allocation4], %s4063_s28  ;;  %s3784_s30 = sshra.s32 %s2577_s11, 4  ;;  %s3785_s30 = int_to_ptr.hbm [resolvable:$true] %s3784_s30 }
 0x298   : > { %s3786_s12 = scalar_lea.hbm %s3785_s30, 128  ;;  %s3790_s29 = scalar_lea.hbm %s5189_s24, 256 }
 0x299   : > { %1352 = vst [vmem:[%s4445_s13 + $0x70] sm:$0xff] %v1336_v32  ;;  %p3787_p10 = scmp.ne.s32.totalorder %s3785_s30, %s3786_s12  ;;  %p3791_p13 = scmp.lt.s32.totalorder %s3785_s30, %s5189_s24 }
 0x29a   : > { %p3792_p0 = scmp.lt.s32.totalorder %s3790_s29, %s3786_s12 }
 0x29b   : > { %p3788_p11 = pnand %p3787_p10, %p4041_p4 }
 0x29c   : > { %p3793_p2 = por %p3792_p0, %p3791_p13 }
 0x29d   : > { %p3789_p12 = pneg %p3788_p11 }
 0x29f   : > { %p3794_p5 = pnand %p3793_p2, %p3789_p12 }
 0x2a1   : > { %3797 = shalt.err (!%p3794_p5)
}
 0x2a2   : > { %3360 = dma.vmem_to_hbm [thread:$0]  (%p4041_p4), %s2575_s3, 2048, %s2577_s11, %s2549_s9, %s3880_s23, %s3880_s23, %s3881_s0  }
 0x2a3 PF: > { %s2631_s28 = sand.u32 1, %s3848_s17   ;;  %p3387_p8 = pnand %p2829_p6, %p4049_p7 }
 0x2a4   : > { %s2632_s13 = scalar_lea.sflag [#allocation4], %s2631_s28 }
 0x2a5   : > { %p3388_p1 = pneg %p3387_p8 }
 0x2a7   : > { %3839 = dma.done.wait (%p3388_p1), %s2632_s13, 2048  }
 0x2a8   : > { %3841 = vsyncadd (%p3388_p1), %s2632_s13, 4294965248  ;;  %s5195_s25 = sadd.s32 4294967294, %s3868_s22  }
 0x2a9   : > { %s2641_s14 = sand.u32 1, %s5195_s25  }
 0x2aa   : > { %s2642_s16 = scalar_lea.sflag [#allocation15], %s2641_s14 }
 0x2ab   : > { %3843 = dma.done.wait (%p3388_p1), %s2642_s16, 4096  }
 0x2ac   : > { %3845 = vsyncadd (%p3388_p1), %s2642_s16, 4294963200  ;;  %s34_s22 = sadd.s32 1, %s3868_s22   ;;  %s5196_s0 = sld [smem:[#allocation23_spill]] }
 0x2ad   : > { %p31_p4 = scmp.ge.s32.totalorder %s34_s22, 4   ;;  %s5197_s17 = smov %s3852_s18 }
 0x2ae   : > { %s5198_s18 = smov %s3856_s19  ;;  %s5199_s19 = smov %s4047_s26 }
 0x2af   : > { %s5200_s20 = smov %s3864_s21  ;;  %33 = sbr.rel (!%p31_p4) target bundleno = 21 (0x15), region = 153 }
 0x2b2   : > { %s5201_s21 = smov %s5196_s0 }
 0x2b4   :  { %2658 = vsyncpa [#allocation3], 1 }
 0x2b5   :  { %2660 = vsyncpa [#allocation3 + $0x1], 1 }
 0x2b6   :  { %2661 = vsyncpa [#allocation6], 1 }
 0x2b7   :  { %2662 = vsyncpa [#allocation9], 1 }
 0x2b8   :  { %2663 = vsyncpa [#allocation12], 1 }
 0x2b9   :  { %2664 = vsyncpa [#allocation4], 1 }
 0x2ba   :  { %2666 = vsyncpa [#allocation4 + $0x1], 1 }
 0x2bb   :  { %2667 = vsyncpa [#allocation15], 1 }
 0x2bc   :  { %2669 = vsyncpa [#allocation15 + $0x1], 1 }

</bundles_post_ra>
